<compile_context>
chip_gen: v5e
topology: v5e:2x2
jax: 0.10.0
libtpu: 0.0.40
codegen_flags: <defaults>
</compile_context>

<pallas_src>
import functools

import numpy as np

import jax
import jax.numpy as jnp
from jax.experimental import pallas as pl
from jax.experimental.pallas import tpu as pltpu


# ----------------------------- small math helpers -----------------------------

def _acti(x, name):
    if name == "relu":
        return jnp.maximum(x, 0.0)
    if name == "sigmoid":
        return jax.nn.sigmoid(x)
    raise ValueError(f"acti_name error: {name}")


def _end_norm_ref(x, name):
    if name == "softmax":
        return jax.nn.softmax(x, axis=-1)

    def norm(v):
        s = jnp.sum(v, axis=-1, keepdims=True)
        s = jnp.where(s == 0.0, jnp.ones_like(s), s)
        return v / s

    if name == "linear":
        return norm(x)
    if name == "relu":
        return norm(jnp.maximum(x, 0.0))
    if name == "mix":
        y = jnp.where(x >= 0, jnp.exp(x),
                      jnp.where(x >= -1.0, x + 1.0, jnp.zeros_like(x)))
        return norm(y)
    if name == "none":
        return x
    raise ValueError(f"end_norm error: {name}")


# --------------------- host-built constant index-map matrices ---------------------

def _build_shift_mats(H, W):
    """Shift[k, p_src, p_dst] = 1 iff 3x3 tap k (k = 3*di + dj) of a padding-1
    conv maps flat input position p_src = (h+di-1)*W + (w+dj-1) (in-bounds) to
    flat output position p_dst = h*W + w."""
    HW = H * W
    S = np.zeros((9, HW, HW), np.float32)
    for di in range(3):
        for dj in range(3):
            k = 3 * di + dj
            for h in range(H):
                for w in range(W):
                    hs, ws = h + di - 1, w + dj - 1
                    if 0 <= hs < H and 0 <= ws < W:
                        S[k, hs * W + ws, h * W + w] = 1.0
    return S


def _build_pool_cat(H, W):
    """Simulate torch's channel-regroup .reshape(C//4, 2H, 2W) + MaxPool2d(2).

    Returns Pcat of shape (4*HW, 4*HW):
      Pcat[cl*HW + p, k*HW + o] = 1  iff the k-th (k = 2a+b) pooling candidate
    of pooled output position o of a 4-channel group comes from
    channel-within-group cl at flat position p.  Applying one group's 4
    channels (flattened to 4*HW lanes) to Pcat yields all 4 candidate maps
    side by side; an elementwise max over the 4 HW-lane segments reproduces
    torch's regroup + pool exactly."""
    HW = H * W
    src = np.arange(4 * HW).reshape(2 * H, 2 * W)      # flat ids of regrouped map
    P = np.zeros((4 * HW, 4 * HW), np.float32)
    for a in range(2):
        for b in range(2):
            k = 2 * a + b
            cand = src[a::2, b::2].reshape(HW)          # source id per output pos
            for o in range(HW):
                P[int(cand[o]), k * HW + o] = 1.0
    return P


def _fuse_conv(w, shift):
    """G[(cin*HW + p_src), (cout*HW + p_dst)] = sum_k w[cout,cin,k] * shift[k]."""
    n_out, n_in = w.shape[0], w.shape[1]
    HW = shift.shape[1]
    wk = w.reshape(n_out, n_in, 9)
    G = jnp.einsum('oik,kpq->ipoq', wk, shift)          # (n_in, HW, n_out, HW)
    return G.reshape(n_in * HW, n_out * HW)


# --------------------------------- fused kernel ---------------------------------

def _fused_kernel(x_ref, g1_ref, b1_ref, pcat_ref, g2_ref, b2_ref,
                  l12_ref, b12_ref, out_ref, *, acti_name, end_norm, hw, w_out):
    f32 = jnp.float32

    def mxu(a, m_ref):
        # bf16 (or f32) MXU matmul with f32 accumulation
        return jnp.dot(a.astype(m_ref.dtype), m_ref[...],
                       preferred_element_type=f32)

    def conv_pool(m, g_ref, b_ref):
        # m: (b_blk, n_in*HW) f32, lanes = (cin, p)
        n_groups = g_ref.shape[1] // (4 * hw)
        z = mxu(m, g_ref) + b_ref[...]                  # (b_blk, n_out*HW)
        a = _acti(z, acti_name)
        pooled = []
        for g in range(n_groups):
            ag = a[:, g * 4 * hw:(g + 1) * 4 * hw]      # group g: lanes (cl, p)
            cand = mxu(ag, pcat_ref)                    # 4 candidates, lane-dense
            pooled.append(jnp.maximum(
                jnp.maximum(cand[:, 0 * hw:1 * hw], cand[:, 1 * hw:2 * hw]),
                jnp.maximum(cand[:, 2 * hw:3 * hw], cand[:, 3 * hw:4 * hw])))
        return jnp.concatenate(pooled, axis=1)          # (b_blk, n_groups*HW)

    m1 = conv_pool(x_ref[...], g1_ref, b1_ref)          # conv1 -> acti -> pool
    m2 = conv_pool(m1, g2_ref, b2_ref)                  # conv2 -> acti -> pool

    # fused linear1 + linear2 (+ the two surrounding transposes), lanes = (o, w)
    pre = mxu(m2, l12_ref) + b12_ref[...]               # (b_blk, O*W)

    if end_norm == "none":
        out_ref[...] = pre
        return

    n_seg = out_ref.shape[1] // w_out
    for o in range(n_seg):                              # normalize each W-segment
        seg = pre[:, o * w_out:(o + 1) * w_out]
        if end_norm == "softmax":
            mx = jnp.max(seg, axis=-1, keepdims=True)
            e = jnp.exp(seg - mx)
            s = jnp.sum(e, axis=-1, keepdims=True)
            res = e * pl.reciprocal(s, approx=True)
        else:
            if end_norm == "relu":
                seg = jnp.maximum(seg, 0.0)
            elif end_norm == "mix":
                seg = jnp.where(seg >= 0, jnp.exp(seg),
                                jnp.where(seg >= -1.0, seg + 1.0,
                                          jnp.zeros_like(seg)))
            elif end_norm != "linear":
                raise ValueError(f"end_norm error: {end_norm}")
            s = jnp.sum(seg, axis=-1, keepdims=True)
            s = jnp.where(s == 0.0, jnp.ones_like(s), s)
            res = seg * pl.reciprocal(s, approx=True)
        out_ref[:, o * w_out:(o + 1) * w_out] = res


# ------------------------------- wrapper (host) -------------------------------

def _nbytes(a):
    return int(np.prod(a.shape)) * jnp.dtype(a.dtype).itemsize


def cnn_forward(x, params, *, acti_name="relu", end_norm="softmax",
                block_batch=None, use_bf16=True):
    """x: (batch, input_size, kspace_size) -> (batch, output_size, kspace_size)."""
    B, H, W = x.shape
    HW = H * W

    w1, b1 = params["conv1_w"], params["conv1_b"]      # (C1, 1, 3, 3), (C1,)
    w2, b2 = params["conv2_w"], params["conv2_b"]      # (C2, C1//4, 3, 3), (C2,)
    l1w, l1b = params["lin1_w"], params["lin1_b"]      # (1, C2//4), (1,)
    l2w, l2b = params["lin2_w"], params["lin2_b"]      # (O, H), (O,)
    C1, C2, O = w1.shape[0], w2.shape[0], l2w.shape[0]
    assert C1 % 4 == 0 and C2 % 4 == 0 and H % 4 == 0 and W % 2 == 0
    assert w1.shape[1] == 1 and w2.shape[1] == C1 // 4
    assert l1w.shape == (1, C2 // 4) and l2w.shape == (O, H)

    if block_batch is None:
        block_batch = 8 if B % 8 == 0 else B
    assert B % block_batch == 0
    assert block_batch % 8 == 0 or block_batch == B

    cdtype = jnp.bfloat16 if use_bf16 else jnp.float32

    # ---- host-built constants (tiny einsums over params; compile-time / per call) ----
    shift = jnp.asarray(_build_shift_mats(H, W))                    # (9, HW, HW)
    pcat = jnp.asarray(_build_pool_cat(H, W)).astype(cdtype)        # (4HW, 4HW)

    G1 = _fuse_conv(w1, shift).astype(cdtype)                       # (HW, C1*HW)
    G2 = _fuse_conv(w2, shift).astype(cdtype)                       # (C1//4*HW, C2*HW)
    b1l = jnp.repeat(b1, HW).reshape(1, C1 * HW).astype(jnp.float32)
    b2l = jnp.repeat(b2, HW).reshape(1, C2 * HW).astype(jnp.float32)

    # fused linear1 + linear2 (+ transposes):
    #   out[b, (o, w)] = b12[(o,w)] + sum_{g,h} l1w[g]*l2w[o,h]*m2[b,(g, h*W+w)]
    eyeW = jnp.eye(W, dtype=jnp.float32)
    L12 = jnp.einsum('g,oh,vw->ghvow', l1w[0], l2w, eyeW).reshape(
        (C2 // 4) * HW, O * W).astype(cdtype)
    b12 = jnp.repeat(l2b + l1b[0] * jnp.sum(l2w, axis=1), W).reshape(
        1, O * W).astype(jnp.float32)

    x_flat = x.reshape(B, HW).astype(jnp.float32)

    # ---- VMEM budget + cost estimate ----
    const_bytes = (_nbytes(G1) + _nbytes(b1l) + _nbytes(pcat) + _nbytes(G2)
                   + _nbytes(b2l) + _nbytes(L12) + _nbytes(b12))
    block_bytes = block_batch * HW * 4 + block_batch * O * W * 4 + const_bytes
    vmem_limit = int(min(128 * 1024 * 1024,
                         max(16 * 1024 * 1024, 2 * block_bytes + (8 << 20))))

    flops = 2 * B * (
        (1 * HW) * (C1 * HW)                      # conv1 as dense matmul
        + (C1 // 4) * (4 * HW) * (4 * HW)         # pool1 candidate matmuls
        + ((C1 // 4) * HW) * (C2 * HW)            # conv2
        + (C2 // 4) * (4 * HW) * (4 * HW)         # pool2
        + ((C2 // 4) * HW) * (O * W))             # fused linear1+linear2
    transcendentals = 0
    if end_norm in ("softmax", "mix"):
        transcendentals += B * O * W
    if acti_name == "sigmoid":
        transcendentals += B * (C1 + C2) * HW
    bytes_accessed = _nbytes(x_flat) + B * O * W * 4 + const_bytes
    cost = pl.CostEstimate(flops=int(flops), transcendentals=int(transcendentals),
                           bytes_accessed=int(bytes_accessed))

    kernel = functools.partial(_fused_kernel, acti_name=acti_name,
                               end_norm=end_norm, hw=HW, w_out=W)

    out_flat = pl.pallas_call(
        kernel,
        out_shape=jax.ShapeDtypeStruct((B, O * W), jnp.float32),
        grid=(B // block_batch,),
        in_specs=[
            pl.BlockSpec((block_batch, HW), lambda i: (i, 0)),       # x (flat)
            pl.BlockSpec(G1.shape, lambda i: (0, 0)),                # conv1 (w (x) shift)
            pl.BlockSpec(b1l.shape, lambda i: (0, 0)),               # conv1 bias lanes
            pl.BlockSpec(pcat.shape, lambda i: (0, 0)),              # pool candidate sel
            pl.BlockSpec(G2.shape, lambda i: (0, 0)),                # conv2 (w (x) shift)
            pl.BlockSpec(b2l.shape, lambda i: (0, 0)),               # conv2 bias lanes
            pl.BlockSpec(L12.shape, lambda i: (0, 0)),               # fused linear1+2
            pl.BlockSpec(b12.shape, lambda i: (0, 0)),               # fused linear bias
        ],
        out_specs=pl.BlockSpec((block_batch, O * W), lambda i: (i, 0)),
        compiler_params=pltpu.CompilerParams(
            dimension_semantics=("parallel",),
            vmem_limit_bytes=vmem_limit),
        cost_estimate=cost,
    )(x_flat, G1, b1l, pcat, G2, b2l, L12, b12)

    return out_flat.reshape(B, O, W)


# ------------------------- plain-XLA reference (for check) -------------------------

def reference_forward(x, params, *, acti_name="relu", end_norm="softmax"):
    B, H, W = x.shape
    w1, b1 = params["conv1_w"], params["conv1_b"]
    w2, b2 = params["conv2_w"], params["conv2_b"]
    l1w, l1b = params["lin1_w"], params["lin1_b"]
    l2w, l2b = params["lin2_w"], params["lin2_b"]
    C2 = w2.shape[0]

    def stage(inp, w, b):
        cout = w.shape[0]
        c = jax.lax.conv_general_dilated(
            inp, w, window_strides=(1, 1), padding=((1, 1), (1, 1)),
            dimension_numbers=("NCHW", "OIHW", "NCHW"))
        c = c + b.reshape(1, cout, 1, 1)
        r = c.reshape(B, cout // 4, 2 * H, 2 * W)
        a = _acti(r, acti_name)
        return jnp.maximum(
            jnp.maximum(a[:, :, 0::2, 0::2], a[:, :, 0::2, 1::2]),
            jnp.maximum(a[:, :, 1::2, 0::2], a[:, :, 1::2, 1::2]))

    m1 = stage(x.reshape(B, 1, H, W), w1, b1)
    m2 = stage(m1, w2, b2)
    y = m2.reshape(B, C2 // 4, H * W).transpose(0, 2, 1) @ l1w.T + l1b   # (B, HW, 1)
    y = y.reshape(B, H, W).transpose(0, 2, 1)                            # (B, W, H)
    z = y @ l2w.T + l2b                                                  # (B, W, O)
    z = z.transpose(0, 2, 1)                                             # (B, O, W)
    return _end_norm_ref(z, end_norm)


# ------------------------------------ setup ------------------------------------

def init_params(key, conv1_channels, conv2_channels, input_size, output_size):
    ks = jax.random.split(key, 8)

    def u(k, shape, scale):
        return jax.random.uniform(k, shape, jnp.float32, -1.0, 1.0) * scale

    return dict(
        conv1_w=u(ks[0], (conv1_channels, 1, 3, 3), 0.3),
        conv1_b=u(ks[1], (conv1_channels,), 0.1),
        conv2_w=u(ks[2], (conv2_channels, conv1_channels // 4, 3, 3), 0.3),
        conv2_b=u(ks[3], (conv2_channels,), 0.1),
        lin1_w=u(ks[4], (1, conv2_channels // 4), 0.5),
        lin1_b=u(ks[5], (1,), 0.1),
        lin2_w=u(ks[6], (output_size, input_size), 0.3),
        lin2_b=u(ks[7], (output_size,), 0.1),
    )


if __name__ == "__main__":
    # args: conv1_channels=8, conv2_channels=8, input_size=8, output_size=4,
    #       acti_name='relu', end_norm='softmax'; kspace_size=16, batch=16
    B, INPUT_SIZE, KSPACE = 16, 8, 16
    C1, C2, OUT = 8, 8, 4

    key = jax.random.PRNGKey(0)
    kx, kp = jax.random.split(key)
    x = jax.random.normal(kx, (B, INPUT_SIZE, KSPACE), jnp.float32)
    params = init_params(kp, C1, C2, INPUT_SIZE, OUT)

    fwd = jax.jit(functools.partial(cnn_forward, acti_name="relu",
                                    end_norm="softmax"))
    out = jax.block_until_ready(fwd(x, params))
    assert out.shape == (B, OUT, KSPACE), out.shape
    assert bool(jnp.all(jnp.isfinite(out)))

    # numerical check vs a plain-XLA implementation of the PyTorch forward
    ref = jax.block_until_ready(
        reference_forward(x, params, acti_name="relu", end_norm="softmax"))
    err = float(jnp.max(jnp.abs(out - ref)))
    assert err < 3e-2, f"kernel/reference mismatch: {err}"
    print("KERNEL_OK")
</pallas_src>

<mosaic_0001>
module attributes {stable_mosaic.version = 11 : i64} {
  func.func @_fused_kernel(%arg0: i32, %arg1: memref<8x128xf32, #tpu.memory_space<vmem>>, %arg2: memref<128x1024xbf16, #tpu.memory_space<vmem>>, %arg3: memref<1x1024xf32, #tpu.memory_space<vmem>>, %arg4: memref<512x512xbf16, #tpu.memory_space<vmem>>, %arg5: memref<256x1024xbf16, #tpu.memory_space<vmem>>, %arg6: memref<1x1024xf32, #tpu.memory_space<vmem>>, %arg7: memref<256x64xbf16, #tpu.memory_space<vmem>>, %arg8: memref<1x64xf32, #tpu.memory_space<vmem>>, %arg9: memref<8x64xf32, #tpu.memory_space<vmem>>) attributes {dimension_semantics = [#tpu.dimension_semantics<parallel>], iteration_bounds = array<i64: 2>, scalar_prefetch = 0 : i64, scratch_operands = 0 : i64, tpu.core_type = #tpu.core_type<tc>, window_params = [{transform_indices = @transform_0, window_bounds = array<i64: 8, 128>}, {pipeline_mode = #tpu.pipeline_mode<synchronous>, transform_indices = @transform_1, window_bounds = array<i64: 128, 1024>}, {pipeline_mode = #tpu.pipeline_mode<synchronous>, transform_indices = @transform_2, window_bounds = array<i64: 1, 1024>}, {pipeline_mode = #tpu.pipeline_mode<synchronous>, transform_indices = @transform_3, window_bounds = array<i64: 512, 512>}, {pipeline_mode = #tpu.pipeline_mode<synchronous>, transform_indices = @transform_4, window_bounds = array<i64: 256, 1024>}, {pipeline_mode = #tpu.pipeline_mode<synchronous>, transform_indices = @transform_5, window_bounds = array<i64: 1, 1024>}, {pipeline_mode = #tpu.pipeline_mode<synchronous>, transform_indices = @transform_6, window_bounds = array<i64: 256, 64>}, {pipeline_mode = #tpu.pipeline_mode<synchronous>, transform_indices = @transform_7, window_bounds = array<i64: 1, 64>}, {transform_indices = @transform_8, window_bounds = array<i64: 8, 64>}]} {
    %c0 = arith.constant 0 : index
    %c0_0 = arith.constant 0 : index
    %0 = vector.load %arg1[%c0, %c0_0] : memref<8x128xf32, #tpu.memory_space<vmem>>, vector<8x128xf32>
    %1 = arith.truncf %0 : vector<8x128xf32> to vector<8x128xbf16>
    %c0_1 = arith.constant 0 : index
    %c0_2 = arith.constant 0 : index
    %2 = vector.load %arg2[%c0_1, %c0_2] : memref<128x1024xbf16, #tpu.memory_space<vmem>>, vector<128x1024xbf16>
    %cst = arith.constant dense<0.000000e+00> : vector<8x1024xf32>
    %3 = tpu.matmul %1, %2, %cst {dimension_numbers = #tpu.dot_dimension_numbers<[1], [0], [0], [1], [0, 0, 1, 1], [], []>} : vector<8x128xbf16>, vector<128x1024xbf16>, vector<8x1024xf32> -> vector<8x1024xf32>
    %c0_3 = arith.constant 0 : index
    %c0_4 = arith.constant 0 : index
    %4 = vector.load %arg3[%c0_3, %c0_4] : memref<1x1024xf32, #tpu.memory_space<vmem>>, vector<1x1024xf32>
    %5 = vector.broadcast %4 : vector<1x1024xf32> to vector<8x1024xf32>
    %6 = arith.addf %3, %5 : vector<8x1024xf32>
    %cst_5 = arith.constant 0.000000e+00 : f32
    %7 = vector.broadcast %cst_5 : f32 to vector<8x1024xf32>
    %8 = arith.maximumf %6, %7 : vector<8x1024xf32>
    %9 = vector.extract_strided_slice %8 {offsets = [0, 0], sizes = [8, 512], strides = [1, 1]} : vector<8x1024xf32> to vector<8x512xf32>
    %10 = arith.truncf %9 : vector<8x512xf32> to vector<8x512xbf16>
    %c0_6 = arith.constant 0 : index
    %c0_7 = arith.constant 0 : index
    %11 = vector.load %arg4[%c0_6, %c0_7] : memref<512x512xbf16, #tpu.memory_space<vmem>>, vector<512x512xbf16>
    %cst_8 = arith.constant dense<0.000000e+00> : vector<8x512xf32>
    %12 = tpu.matmul %10, %11, %cst_8 {dimension_numbers = #tpu.dot_dimension_numbers<[1], [0], [0], [1], [0, 0, 1, 1], [], []>} : vector<8x512xbf16>, vector<512x512xbf16>, vector<8x512xf32> -> vector<8x512xf32>
    %13 = vector.extract_strided_slice %12 {offsets = [0, 0], sizes = [8, 128], strides = [1, 1]} : vector<8x512xf32> to vector<8x128xf32>
    %14 = vector.extract_strided_slice %12 {offsets = [0, 128], sizes = [8, 128], strides = [1, 1]} : vector<8x512xf32> to vector<8x128xf32>
    %15 = arith.maximumf %13, %14 : vector<8x128xf32>
    %16 = vector.extract_strided_slice %12 {offsets = [0, 256], sizes = [8, 128], strides = [1, 1]} : vector<8x512xf32> to vector<8x128xf32>
    %17 = vector.extract_strided_slice %12 {offsets = [0, 384], sizes = [8, 128], strides = [1, 1]} : vector<8x512xf32> to vector<8x128xf32>
    %18 = arith.maximumf %16, %17 : vector<8x128xf32>
    %19 = arith.maximumf %15, %18 : vector<8x128xf32>
    %20 = vector.extract_strided_slice %8 {offsets = [0, 512], sizes = [8, 512], strides = [1, 1]} : vector<8x1024xf32> to vector<8x512xf32>
    %21 = arith.truncf %20 : vector<8x512xf32> to vector<8x512xbf16>
    %c0_9 = arith.constant 0 : index
    %c0_10 = arith.constant 0 : index
    %22 = vector.load %arg4[%c0_9, %c0_10] : memref<512x512xbf16, #tpu.memory_space<vmem>>, vector<512x512xbf16>
    %cst_11 = arith.constant dense<0.000000e+00> : vector<8x512xf32>
    %23 = tpu.matmul %21, %22, %cst_11 {dimension_numbers = #tpu.dot_dimension_numbers<[1], [0], [0], [1], [0, 0, 1, 1], [], []>} : vector<8x512xbf16>, vector<512x512xbf16>, vector<8x512xf32> -> vector<8x512xf32>
    %24 = vector.extract_strided_slice %23 {offsets = [0, 0], sizes = [8, 128], strides = [1, 1]} : vector<8x512xf32> to vector<8x128xf32>
    %25 = vector.extract_strided_slice %23 {offsets = [0, 128], sizes = [8, 128], strides = [1, 1]} : vector<8x512xf32> to vector<8x128xf32>
    %26 = arith.maximumf %24, %25 : vector<8x128xf32>
    %27 = vector.extract_strided_slice %23 {offsets = [0, 256], sizes = [8, 128], strides = [1, 1]} : vector<8x512xf32> to vector<8x128xf32>
    %28 = vector.extract_strided_slice %23 {offsets = [0, 384], sizes = [8, 128], strides = [1, 1]} : vector<8x512xf32> to vector<8x128xf32>
    %29 = arith.maximumf %27, %28 : vector<8x128xf32>
    %30 = arith.maximumf %26, %29 : vector<8x128xf32>
    %31 = tpu.concatenate %19, %30 in 1 : vector<8x128xf32>, vector<8x128xf32> -> vector<8x256xf32>
    %32 = arith.truncf %31 : vector<8x256xf32> to vector<8x256xbf16>
    %c0_12 = arith.constant 0 : index
    %c0_13 = arith.constant 0 : index
    %33 = vector.load %arg5[%c0_12, %c0_13] : memref<256x1024xbf16, #tpu.memory_space<vmem>>, vector<256x1024xbf16>
    %cst_14 = arith.constant dense<0.000000e+00> : vector<8x1024xf32>
    %34 = tpu.matmul %32, %33, %cst_14 {dimension_numbers = #tpu.dot_dimension_numbers<[1], [0], [0], [1], [0, 0, 1, 1], [], []>} : vector<8x256xbf16>, vector<256x1024xbf16>, vector<8x1024xf32> -> vector<8x1024xf32>
    %c0_15 = arith.constant 0 : index
    %c0_16 = arith.constant 0 : index
    %35 = vector.load %arg6[%c0_15, %c0_16] : memref<1x1024xf32, #tpu.memory_space<vmem>>, vector<1x1024xf32>
    %36 = vector.broadcast %35 : vector<1x1024xf32> to vector<8x1024xf32>
    %37 = arith.addf %34, %36 : vector<8x1024xf32>
    %cst_17 = arith.constant 0.000000e+00 : f32
    %38 = vector.broadcast %cst_17 : f32 to vector<8x1024xf32>
    %39 = arith.maximumf %37, %38 : vector<8x1024xf32>
    %40 = vector.extract_strided_slice %39 {offsets = [0, 0], sizes = [8, 512], strides = [1, 1]} : vector<8x1024xf32> to vector<8x512xf32>
    %41 = arith.truncf %40 : vector<8x512xf32> to vector<8x512xbf16>
    %c0_18 = arith.constant 0 : index
    %c0_19 = arith.constant 0 : index
    %42 = vector.load %arg4[%c0_18, %c0_19] : memref<512x512xbf16, #tpu.memory_space<vmem>>, vector<512x512xbf16>
    %cst_20 = arith.constant dense<0.000000e+00> : vector<8x512xf32>
    %43 = tpu.matmul %41, %42, %cst_20 {dimension_numbers = #tpu.dot_dimension_numbers<[1], [0], [0], [1], [0, 0, 1, 1], [], []>} : vector<8x512xbf16>, vector<512x512xbf16>, vector<8x512xf32> -> vector<8x512xf32>
    %44 = vector.extract_strided_slice %43 {offsets = [0, 0], sizes = [8, 128], strides = [1, 1]} : vector<8x512xf32> to vector<8x128xf32>
    %45 = vector.extract_strided_slice %43 {offsets = [0, 128], sizes = [8, 128], strides = [1, 1]} : vector<8x512xf32> to vector<8x128xf32>
    %46 = arith.maximumf %44, %45 : vector<8x128xf32>
    %47 = vector.extract_strided_slice %43 {offsets = [0, 256], sizes = [8, 128], strides = [1, 1]} : vector<8x512xf32> to vector<8x128xf32>
    %48 = vector.extract_strided_slice %43 {offsets = [0, 384], sizes = [8, 128], strides = [1, 1]} : vector<8x512xf32> to vector<8x128xf32>
    %49 = arith.maximumf %47, %48 : vector<8x128xf32>
    %50 = arith.maximumf %46, %49 : vector<8x128xf32>
    %51 = vector.extract_strided_slice %39 {offsets = [0, 512], sizes = [8, 512], strides = [1, 1]} : vector<8x1024xf32> to vector<8x512xf32>
    %52 = arith.truncf %51 : vector<8x512xf32> to vector<8x512xbf16>
    %c0_21 = arith.constant 0 : index
    %c0_22 = arith.constant 0 : index
    %53 = vector.load %arg4[%c0_21, %c0_22] : memref<512x512xbf16, #tpu.memory_space<vmem>>, vector<512x512xbf16>
    %cst_23 = arith.constant dense<0.000000e+00> : vector<8x512xf32>
    %54 = tpu.matmul %52, %53, %cst_23 {dimension_numbers = #tpu.dot_dimension_numbers<[1], [0], [0], [1], [0, 0, 1, 1], [], []>} : vector<8x512xbf16>, vector<512x512xbf16>, vector<8x512xf32> -> vector<8x512xf32>
    %55 = vector.extract_strided_slice %54 {offsets = [0, 0], sizes = [8, 128], strides = [1, 1]} : vector<8x512xf32> to vector<8x128xf32>
    %56 = vector.extract_strided_slice %54 {offsets = [0, 128], sizes = [8, 128], strides = [1, 1]} : vector<8x512xf32> to vector<8x128xf32>
    %57 = arith.maximumf %55, %56 : vector<8x128xf32>
    %58 = vector.extract_strided_slice %54 {offsets = [0, 256], sizes = [8, 128], strides = [1, 1]} : vector<8x512xf32> to vector<8x128xf32>
    %59 = vector.extract_strided_slice %54 {offsets = [0, 384], sizes = [8, 128], strides = [1, 1]} : vector<8x512xf32> to vector<8x128xf32>
    %60 = arith.maximumf %58, %59 : vector<8x128xf32>
    %61 = arith.maximumf %57, %60 : vector<8x128xf32>
    %62 = tpu.concatenate %50, %61 in 1 : vector<8x128xf32>, vector<8x128xf32> -> vector<8x256xf32>
    %63 = arith.truncf %62 : vector<8x256xf32> to vector<8x256xbf16>
    %c0_24 = arith.constant 0 : index
    %c0_25 = arith.constant 0 : index
    %64 = vector.load %arg7[%c0_24, %c0_25] : memref<256x64xbf16, #tpu.memory_space<vmem>>, vector<256x64xbf16>
    %cst_26 = arith.constant dense<0.000000e+00> : vector<8x64xf32>
    %65 = tpu.matmul %63, %64, %cst_26 {dimension_numbers = #tpu.dot_dimension_numbers<[1], [0], [0], [1], [0, 0, 1, 1], [], []>} : vector<8x256xbf16>, vector<256x64xbf16>, vector<8x64xf32> -> vector<8x64xf32>
    %c0_27 = arith.constant 0 : index
    %c0_28 = arith.constant 0 : index
    %66 = vector.load %arg8[%c0_27, %c0_28] : memref<1x64xf32, #tpu.memory_space<vmem>>, vector<1x64xf32>
    %67 = vector.broadcast %66 : vector<1x64xf32> to vector<8x64xf32>
    %68 = arith.addf %65, %67 : vector<8x64xf32>
    %69 = vector.extract_strided_slice %68 {offsets = [0, 0], sizes = [8, 16], strides = [1, 1]} : vector<8x64xf32> to vector<8x16xf32>
    %cst_29 = arith.constant dense<0xFF800000> : vector<8xf32>
    %70 = vector.multi_reduction <maximumf>, %69, %cst_29 [1] : vector<8x16xf32> to vector<8xf32>
    %71 = vector.shape_cast %70 : vector<8xf32> to vector<8x1xf32>
    %72 = vector.broadcast %71 : vector<8x1xf32> to vector<8x16xf32>
    %73 = arith.subf %69, %72 : vector<8x16xf32>
    %74 = math.exp %73 : vector<8x16xf32>
    %cst_30 = arith.constant dense<0.000000e+00> : vector<8xf32>
    %75 = vector.multi_reduction <add>, %74, %cst_30 [1] : vector<8x16xf32> to vector<8xf32>
    %76 = vector.shape_cast %75 : vector<8xf32> to vector<8x1xf32>
    %77 = tpu.reciprocal %76 {approx = true} : vector<8x1xf32> -> vector<8x1xf32>
    %78 = vector.broadcast %77 : vector<8x1xf32> to vector<8x16xf32>
    %79 = arith.mulf %74, %78 : vector<8x16xf32>
    %c0_31 = arith.constant 0 : index
    %c0_32 = arith.constant 0 : index
    %80 = vector.load %arg9[%c0_31, %c0_32] : memref<8x64xf32, #tpu.memory_space<vmem>>, vector<8x16xf32>
    tpu.vector_store %arg9[%c0_31, %c0_32], %79 {strides = array<i32>} : memref<8x64xf32, #tpu.memory_space<vmem>>, vector<8x16xf32>,
    %81 = vector.extract_strided_slice %68 {offsets = [0, 16], sizes = [8, 16], strides = [1, 1]} : vector<8x64xf32> to vector<8x16xf32>
    %cst_33 = arith.constant dense<0xFF800000> : vector<8xf32>
    %82 = vector.multi_reduction <maximumf>, %81, %cst_33 [1] : vector<8x16xf32> to vector<8xf32>
    %83 = vector.shape_cast %82 : vector<8xf32> to vector<8x1xf32>
    %84 = vector.broadcast %83 : vector<8x1xf32> to vector<8x16xf32>
    %85 = arith.subf %81, %84 : vector<8x16xf32>
    %86 = math.exp %85 : vector<8x16xf32>
    %cst_34 = arith.constant dense<0.000000e+00> : vector<8xf32>
    %87 = vector.multi_reduction <add>, %86, %cst_34 [1] : vector<8x16xf32> to vector<8xf32>
    %88 = vector.shape_cast %87 : vector<8xf32> to vector<8x1xf32>
    %89 = tpu.reciprocal %88 {approx = true} : vector<8x1xf32> -> vector<8x1xf32>
    %90 = vector.broadcast %89 : vector<8x1xf32> to vector<8x16xf32>
    %91 = arith.mulf %86, %90 : vector<8x16xf32>
    %c0_35 = arith.constant 0 : index
    %c16 = arith.constant 16 : index
    %92 = vector.load %arg9[%c0_35, %c16] : memref<8x64xf32, #tpu.memory_space<vmem>>, vector<8x16xf32>
    tpu.vector_store %arg9[%c0_35, %c16], %91 {strides = array<i32>} : memref<8x64xf32, #tpu.memory_space<vmem>>, vector<8x16xf32>,
    %93 = vector.extract_strided_slice %68 {offsets = [0, 32], sizes = [8, 16], strides = [1, 1]} : vector<8x64xf32> to vector<8x16xf32>
    %cst_36 = arith.constant dense<0xFF800000> : vector<8xf32>
    %94 = vector.multi_reduction <maximumf>, %93, %cst_36 [1] : vector<8x16xf32> to vector<8xf32>
    %95 = vector.shape_cast %94 : vector<8xf32> to vector<8x1xf32>
    %96 = vector.broadcast %95 : vector<8x1xf32> to vector<8x16xf32>
    %97 = arith.subf %93, %96 : vector<8x16xf32>
    %98 = math.exp %97 : vector<8x16xf32>
    %cst_37 = arith.constant dense<0.000000e+00> : vector<8xf32>
    %99 = vector.multi_reduction <add>, %98, %cst_37 [1] : vector<8x16xf32> to vector<8xf32>
    %100 = vector.shape_cast %99 : vector<8xf32> to vector<8x1xf32>
    %101 = tpu.reciprocal %100 {approx = true} : vector<8x1xf32> -> vector<8x1xf32>
    %102 = vector.broadcast %101 : vector<8x1xf32> to vector<8x16xf32>
    %103 = arith.mulf %98, %102 : vector<8x16xf32>
    %c0_38 = arith.constant 0 : index
    %c32 = arith.constant 32 : index
    %104 = vector.load %arg9[%c0_38, %c32] : memref<8x64xf32, #tpu.memory_space<vmem>>, vector<8x16xf32>
    tpu.vector_store %arg9[%c0_38, %c32], %103 {strides = array<i32>} : memref<8x64xf32, #tpu.memory_space<vmem>>, vector<8x16xf32>,
    %105 = vector.extract_strided_slice %68 {offsets = [0, 48], sizes = [8, 16], strides = [1, 1]} : vector<8x64xf32> to vector<8x16xf32>
    %cst_39 = arith.constant dense<0xFF800000> : vector<8xf32>
    %106 = vector.multi_reduction <maximumf>, %105, %cst_39 [1] : vector<8x16xf32> to vector<8xf32>
    %107 = vector.shape_cast %106 : vector<8xf32> to vector<8x1xf32>
    %108 = vector.broadcast %107 : vector<8x1xf32> to vector<8x16xf32>
    %109 = arith.subf %105, %108 : vector<8x16xf32>
    %110 = math.exp %109 : vector<8x16xf32>
    %cst_40 = arith.constant dense<0.000000e+00> : vector<8xf32>
    %111 = vector.multi_reduction <add>, %110, %cst_40 [1] : vector<8x16xf32> to vector<8xf32>
    %112 = vector.shape_cast %111 : vector<8xf32> to vector<8x1xf32>
    %113 = tpu.reciprocal %112 {approx = true} : vector<8x1xf32> -> vector<8x1xf32>
    %114 = vector.broadcast %113 : vector<8x1xf32> to vector<8x16xf32>
    %115 = arith.mulf %110, %114 : vector<8x16xf32>
    %c0_41 = arith.constant 0 : index
    %c48 = arith.constant 48 : index
    %116 = vector.load %arg9[%c0_41, %c48] : memref<8x64xf32, #tpu.memory_space<vmem>>, vector<8x16xf32>
    tpu.vector_store %arg9[%c0_41, %c48], %115 {strides = array<i32>} : memref<8x64xf32, #tpu.memory_space<vmem>>, vector<8x16xf32>,
    return
  }
  func.func @transform_0(%arg0: i32) -> (i32, i32) {
    %c0_i32 = arith.constant 0 : i32
    %c0_i32_0 = arith.constant 0 : i32
    return %arg0, %c0_i32 : i32, i32
  }
  func.func @transform_1(%arg0: i32) -> (i32, i32) {
    %c0_i32 = arith.constant 0 : i32
    %c0_i32_0 = arith.constant 0 : i32
    %c0_i32_1 = arith.constant 0 : i32
    return %c0_i32, %c0_i32_0 : i32, i32
  }
  func.func @transform_2(%arg0: i32) -> (i32, i32) {
    %c0_i32 = arith.constant 0 : i32
    %c0_i32_0 = arith.constant 0 : i32
    %c0_i32_1 = arith.constant 0 : i32
    return %c0_i32, %c0_i32_0 : i32, i32
  }
  func.func @transform_3(%arg0: i32) -> (i32, i32) {
    %c0_i32 = arith.constant 0 : i32
    %c0_i32_0 = arith.constant 0 : i32
    %c0_i32_1 = arith.constant 0 : i32
    return %c0_i32, %c0_i32_0 : i32, i32
  }
  func.func @transform_4(%arg0: i32) -> (i32, i32) {
    %c0_i32 = arith.constant 0 : i32
    %c0_i32_0 = arith.constant 0 : i32
    %c0_i32_1 = arith.constant 0 : i32
    return %c0_i32, %c0_i32_0 : i32, i32
  }
  func.func @transform_5(%arg0: i32) -> (i32, i32) {
    %c0_i32 = arith.constant 0 : i32
    %c0_i32_0 = arith.constant 0 : i32
    %c0_i32_1 = arith.constant 0 : i32
    return %c0_i32, %c0_i32_0 : i32, i32
  }
  func.func @transform_6(%arg0: i32) -> (i32, i32) {
    %c0_i32 = arith.constant 0 : i32
    %c0_i32_0 = arith.constant 0 : i32
    %c0_i32_1 = arith.constant 0 : i32
    return %c0_i32, %c0_i32_0 : i32, i32
  }
  func.func @transform_7(%arg0: i32) -> (i32, i32) {
    %c0_i32 = arith.constant 0 : i32
    %c0_i32_0 = arith.constant 0 : i32
    %c0_i32_1 = arith.constant 0 : i32
    return %c0_i32, %c0_i32_0 : i32, i32
  }
  func.func @transform_8(%arg0: i32) -> (i32, i32) {
    %c0_i32 = arith.constant 0 : i32
    %c0_i32_0 = arith.constant 0 : i32
    return %arg0, %c0_i32 : i32, i32
  }
}

</mosaic_0001>

<bundles_post_ra>
// kernel: cnn_forward.1
= control target key start
LH: loop header
LB: loop body
LE: loop exit
PB: predicated region body
PF: predicated region fallthrough
CT: control target
= control target key end

     0   :  { %s5499_s27 = smov 0   ;;  %s8526_s0 = inlined_call_operand.vmem [shape: f32[16,128], index: 0, kind: input, shape index: {}]   ;;  %s8527_s1 = inlined_call_operand.vmem [shape: bf16[128,1024], index: 1, kind: input, shape index: {}]   ;;  %s8528_s2 = inlined_call_operand.vmem [shape: f32[1,1024], index: 2, kind: input, shape index: {}]   ;;  %s8529_s3 = inlined_call_operand.vmem [shape: bf16[512,512], index: 3, kind: input, shape index: {}]   ;;  %s8530_s4 = inlined_call_operand.vmem [shape: bf16[256,1024], index: 4, kind: input, shape index: {}]   ;;  %s8531_s5 = inlined_call_operand.vmem [shape: f32[1,1024], index: 5, kind: input, shape index: {}]   ;;  %s8532_s6 = inlined_call_operand.vmem [shape: bf16[256,64], index: 6, kind: input, shape index: {}]   ;;  %s8533_s7 = inlined_call_operand.vmem [shape: f32[1,64], index: 7, kind: input, shape index: {}]   ;;  %s8534_s8 = inlined_call_operand.vmem [shape: f32[16,64], index: 8, kind: output, shape index: {}]  }
   0x1 LB: > { %s3726_s28 = sadd.s32 4294967295, %s5449_s27   ;;  %p3730_p0 = scmp.ge.s32.totalorder %s5449_s27, 1  ;;  %s5449_s27 = sphi %s5499_s27, %s18_s27  }
   0x2   : > { %p261_p1 = scmp.lt.s32.totalorder %s5449_s27, 3 }
   0x4   : > { %p262_p2 = pnand %p3730_p0, %p261_p1 }
   0x6   : > { %265 = sbr.rel (%p262_p2) target bundleno = 1505 (0x5e1), region = 52 }
   0xb   : > { %v3959_v0 = vld [vmem:[%s8527_s1 + $0x1c0] sm:$0xf]  ;;  %v5135_v2 = vld [vmem:[%s8527_s1 + $0x1c4] sm:$0xf]  ;;  %v3967_v5 = vld [vmem:[%s8527_s1 + $0x1c8] sm:$0xf] }
   0xc   : > { %v5139_v1 = vld [vmem:[%s8527_s1 + $0x1dc] sm:$0xf0]  ;;  %v3961_v4 = vld [vmem:[%s8527_s1 + $0x1e0] sm:$0xf0]  ;;  %v5140_v6 = vld [vmem:[%s8527_s1 + $0x1e4] sm:$0xf0] }
   0xd   : > { %v3960_v3 = vor.u32 %v5139_v1, %v3959_v0  ;;  %v3964_v7 = vor.u32 %v5135_v2, %v3961_v4  ;;  %v3968_v8 = vor.u32 %v5140_v6, %v3967_v5  ;;  %v5136_v9 = vld [vmem:[%s8527_s1 + $0x1cc] sm:$0xf]  ;;  %v3927_v11 = vld [vmem:[%s8527_s1 + $0x180] sm:$0xf]  ;;  %v5127_v14 = vld [vmem:[%s8527_s1 + $0x184] sm:$0xf] }
   0xe   : > { %v3969_v10 = vld [vmem:[%s8527_s1 + $0x1e8] sm:$0xf0]  ;;  %v5131_v13 = vld [vmem:[%s8527_s1 + $0x19c] sm:$0xf0]  ;;  %v3929_v15 = vld [vmem:[%s8527_s1 + $0x1a0] sm:$0xf0] }
   0xf   : > { %705 = vmatpush.bf16.msra.mxu0 %v3960_v3  ;;  %v3972_v12 = vor.u32 %v5136_v9, %v3969_v10  ;;  %718 = vmatpush.bf16.msra.mxu1 %v3964_v7  ;;  %v3928_v16 = vor.u32 %v5131_v13, %v3927_v11  ;;  %v3932_v17 = vor.u32 %v5127_v14, %v3929_v15  ;;  %v3935_v18 = vld [vmem:[%s8527_s1 + $0x188] sm:$0xf]  ;;  %v5128_v20 = vld [vmem:[%s8527_s1 + $0x18c] sm:$0xf]  ;;  %v3895_v23 = vld [vmem:[%s8527_s1 + $0x140] sm:$0xf] }
  0x10   : > { %731 = vmatpush.bf16.msra.mxu2 %v3968_v8  ;;  %v5132_v19 = vld [vmem:[%s8527_s1 + $0x1a4] sm:$0xf0]  ;;  %v3937_v22 = vld [vmem:[%s8527_s1 + $0x1a8] sm:$0xf0]  ;;  %v5123_v24 = vld [vmem:[%s8527_s1 + $0x15c] sm:$0xf0] }
  0x11   : > { %744 = vmatpush.bf16.msra.mxu3 %v3972_v12  ;;  %v3936_v21 = vor.u32 %v5132_v19, %v3935_v18  ;;  %v3940_v25 = vor.u32 %v5128_v20, %v3937_v22  ;;  %v5119_v26 = vld [vmem:[%s8527_s1 + $0x144] sm:$0xf]  ;;  %v3903_v28 = vld [vmem:[%s8527_s1 + $0x148] sm:$0xf]  ;;  %v3896_v29 = vor.u32 %v5123_v24, %v3895_v23  ;;  %v5120_v31 = vld [vmem:[%s8527_s1 + $0x14c] sm:$0xf] }
  0x12   : > { %v3897_v27 = vld [vmem:[%s8527_s1 + $0x160] sm:$0xf0]  ;;  %v5124_v30 = vld [vmem:[%s8527_s1 + $0x164] sm:$0xf0]  ;;  %v3905_v32 = vld [vmem:[%s8527_s1 + $0x168] sm:$0xf0] }
  0x13   : > { %706 = vmatpush.bf16.msra.mxu0 %v3928_v16  ;;  %719 = vmatpush.bf16.msra.mxu1 %v3932_v17  ;;  %v3900_v33 = vor.u32 %v5119_v26, %v3897_v27  ;;  %v3904_v34 = vor.u32 %v5124_v30, %v3903_v28  ;;  %v3863_v35 = vld [vmem:[%s8527_s1 + $0x100] sm:$0xf]  ;;  %v5111_v37 = vld [vmem:[%s8527_s1 + $0x104] sm:$0xf]  ;;  %v3908_v38 = vor.u32 %v5120_v31, %v3905_v32  ;;  %v3871_v40 = vld [vmem:[%s8527_s1 + $0x108] sm:$0xf] }
  0x14   : > { %732 = vmatpush.bf16.msra.mxu2 %v3936_v21  ;;  %v5115_v36 = vld [vmem:[%s8527_s1 + $0x11c] sm:$0xf0]  ;;  %v3865_v39 = vld [vmem:[%s8527_s1 + $0x120] sm:$0xf0]  ;;  %v5116_v41 = vld [vmem:[%s8527_s1 + $0x124] sm:$0xf0] }
  0x15   : > { %745 = vmatpush.bf16.msra.mxu3 %v3940_v25  ;;  %v5112_v42 = vld [vmem:[%s8527_s1 + $0x10c] sm:$0xf]  ;;  %v3864_v44 = vor.u32 %v5115_v36, %v3863_v35  ;;  %v3868_v45 = vor.u32 %v5111_v37, %v3865_v39  ;;  %v3872_v46 = vor.u32 %v5116_v41, %v3871_v40  ;;  %v3831_v47 = vld [vmem:[%s8527_s1 + $0xc0] sm:$0xf]  ;;  %v5103_v49 = vld [vmem:[%s8527_s1 + $0xc4] sm:$0xf] }
  0x16   : > { %v3873_v43 = vld [vmem:[%s8527_s1 + $0x128] sm:$0xf0]  ;;  %v5107_v48 = vld [vmem:[%s8527_s1 + $0xdc] sm:$0xf0]  ;;  %v3833_v51 = vld [vmem:[%s8527_s1 + $0xe0] sm:$0xf0] }
  0x17   : > { %707 = vmatpush.bf16.msra.mxu0 %v3896_v29  ;;  %720 = vmatpush.bf16.msra.mxu1 %v3900_v33  ;;  %v3876_v50 = vor.u32 %v5112_v42, %v3873_v43  ;;  %v3839_v52 = vld [vmem:[%s8527_s1 + $0xc8] sm:$0xf]  ;;  %v5104_v54 = vld [vmem:[%s8527_s1 + $0xcc] sm:$0xf]  ;;  %v3832_v56 = vor.u32 %v5107_v48, %v3831_v47  ;;  %v3836_v57 = vor.u32 %v5103_v49, %v3833_v51  ;;  %v3799_v59 = vld [vmem:[%s8527_s1 + $0x80] sm:$0xf] }
  0x18   : > { %733 = vmatpush.bf16.msra.mxu2 %v3904_v34  ;;  %v5108_v53 = vld [vmem:[%s8527_s1 + $0xe4] sm:$0xf0]  ;;  %v3841_v55 = vld [vmem:[%s8527_s1 + $0xe8] sm:$0xf0]  ;;  %v5099_v60 = vld [vmem:[%s8527_s1 + $0x9c] sm:$0xf0] }
  0x19   : > { %746 = vmatpush.bf16.msra.mxu3 %v3908_v38  ;;  %v3840_v58 = vor.u32 %v5108_v53, %v3839_v52  ;;  %v5095_v61 = vld [vmem:[%s8527_s1 + $0x84] sm:$0xf]  ;;  %v3844_v62 = vor.u32 %v5104_v54, %v3841_v55  ;;  %v3807_v0 = vld [vmem:[%s8527_s1 + $0x88] sm:$0xf]  ;;  %v5096_v2 = vld [vmem:[%s8527_s1 + $0x8c] sm:$0xf]  ;;  %v3800_v4 = vor.u32 %v5099_v60, %v3799_v59 }
  0x1a   : > { %v3801_v63 = vld [vmem:[%s8527_s1 + $0xa0] sm:$0xf0]  ;;  %v5100_v1 = vld [vmem:[%s8527_s1 + $0xa4] sm:$0xf0]  ;;  %v3809_v3 = vld [vmem:[%s8527_s1 + $0xa8] sm:$0xf0] }
  0x1b   : > { %708 = vmatpush.bf16.msra.mxu0 %v3864_v44  ;;  %721 = vmatpush.bf16.msra.mxu1 %v3868_v45  ;;  %v3767_v5 = vld [vmem:[%s8527_s1 + $0x40] sm:$0xf]  ;;  %v3804_v6 = vor.u32 %v5095_v61, %v3801_v63  ;;  %v3808_v7 = vor.u32 %v5100_v1, %v3807_v0  ;;  %v5087_v9 = vld [vmem:[%s8527_s1 + $0x44] sm:$0xf]  ;;  %v3812_v11 = vor.u32 %v5096_v2, %v3809_v3  ;;  %v3775_v12 = vld [vmem:[%s8527_s1 + $0x48] sm:$0xf] }
  0x1c   : > { %734 = vmatpush.bf16.msra.mxu2 %v3872_v46  ;;  %v5091_v8 = vld [vmem:[%s8527_s1 + $0x5c] sm:$0xf0]  ;;  %v3769_v10 = vld [vmem:[%s8527_s1 + $0x60] sm:$0xf0]  ;;  %v5092_v13 = vld [vmem:[%s8527_s1 + $0x64] sm:$0xf0] }
  0x1d   : > { %747 = vmatpush.bf16.msra.mxu3 %v3876_v50  ;;  %p293_p3 = scmp.lt.s32.totalorder %s3726_s28, 1  ;;  %v5088_v14 = vld [vmem:[%s8527_s1 + $0x4c] sm:$0xf]  ;;  %v3768_v16 = vor.u32 %v5091_v8, %v3767_v5  ;;  %v3735_v17 = vld [vmem:[%s8527_s1] sm:$0xf]  ;;  %v3772_v19 = vor.u32 %v5087_v9, %v3769_v10  ;;  %v3776_v20 = vor.u32 %v5092_v13, %v3775_v12  ;;  %vm3656_vm0 = vcmask 523648  }
  0x1e   : > { %v3777_v15 = vld [vmem:[%s8527_s1 + $0x68] sm:$0xf0]  ;;  %v5083_v18 = vld [vmem:[%s8527_s1 + $0x1c] sm:$0xf0]  ;;  %v5079_v21 = vld [vmem:[%s8527_s1 + $0x4] sm:$0xf] }
  0x1f   : > { %709 = vmatpush.bf16.msra.mxu0 %v3832_v56  ;;  %722 = vmatpush.bf16.msra.mxu1 %v3836_v57  ;;  %s9113_s28 = smov (!%p293_p3, %s3726_s28), 1  ;;  %v3737_v22 = vld [vmem:[%s8527_s1 + $0x20] sm:$0xf0]  ;;  %v3743_v23 = vld [vmem:[%s8527_s1 + $0x8] sm:$0xf]  ;;  %v3780_v24 = vor.u32 %v5088_v14, %v3777_v15  ;;  %v3736_v30 = vor.u32 %v5083_v18, %v3735_v17  ;;  %vm3622_vm1 = vcmask 261248  }
  0x20   : > { %735 = vmatpush.bf16.msra.mxu2 %v3840_v58  ;;  %v5084_v25 = vld [vmem:[%s8527_s1 + $0x24] sm:$0xf0]  ;;  %v5080_v26 = vld [vmem:[%s8527_s1 + $0xc] sm:$0xf]  ;;  %s3731_s13 = sshll.u32 %s9113_s28, 3  ;;  %v3740_v34 = vor.u32 %v5079_v21, %v3737_v22  ;;  %vm3639_vm2 = vcmask 392448  }
  0x21   : > { %748 = vmatpush.bf16.msra.mxu3 %v3844_v62  ;;  %v3745_v27 = vld [vmem:[%s8527_s1 + $0x28] sm:$0xf0]  ;;  %s296_s18 = scalar_lea.vmem %s8526_s0, %s3731_s13  ;;  %v3975_v28 = vld [vmem:[%s8527_s1 + $0x1d0] sm:$0xf]  ;;  %v5137_v32 = vld [vmem:[%s8527_s1 + $0x1d4] sm:$0xf]  ;;  %v3744_v35 = vor.u32 %v5084_v25, %v3743_v23  ;;  %s300_s17 = scalar_lea.vmem %s8534_s8, %s3731_s13 }
  0x22   : > { %v5141_v29 = vld [vmem:[%s8527_s1 + $0x1ec] sm:$0xf0]  ;;  %v301_v31 = vld [vmem:[%s296_s18] sm:$0xff]  ;;  %v3977_v33 = vld [vmem:[%s8527_s1 + $0x1f0] sm:$0xf0]  ;;  %v3748_v36 = vor.u32 %v5080_v26, %v3745_v27  ;;  %vm3609_vm3 = vcmask 130048  }
  0x23   : > { %710 = vmatpush.bf16.msra.mxu0 %v3800_v4  ;;  %723 = vmatpush.bf16.msra.mxu1 %v3804_v6  ;;  %v3976_v37 = vor.u32 %v5141_v29, %v3975_v28  ;;  %v3943_v38 = vld [vmem:[%s8527_s1 + $0x190] sm:$0xf]  ;;  %v3983_v39 = vld [vmem:[%s8527_s1 + $0x1d8] sm:$0xf]  ;;  %v5732_v41 = vpack.c.bf16 %v301_v31, %v301_v31  ;;  %v3980_v42 = vor.u32 %v5137_v32, %v3977_v33  ;;  %v5138_v44 = vld [vmem:[%s8527_s1 + $0x1dc] sm:$0xf] }
  0x24   : > { %736 = vmatpush.bf16.msra.mxu2 %v3808_v7  ;;  %v5142_v40 = vld [vmem:[%s8527_s1 + $0x1f4] sm:$0xf0]  ;;  %v5133_v43 = vld [vmem:[%s8527_s1 + $0x1ac] sm:$0xf0]  ;;  %v3985_v45 = vld [vmem:[%s8527_s1 + $0x1f8] sm:$0xf0] }
  0x25   : > { %749 = vmatpush.bf16.msra.mxu3 %v3812_v11  ;;  %v5129_v46 = vld [vmem:[%s8527_s1 + $0x194] sm:$0xf]  ;;  %v3984_v48 = vor.u32 %v5142_v40, %v3983_v39  ;;  %v3944_v49 = vor.u32 %v5133_v43, %v3943_v38  ;;  %v3988_v50 = vor.u32 %v5138_v44, %v3985_v45  ;;  %v3911_v51 = vld [vmem:[%s8527_s1 + $0x150] sm:$0xf]  ;;  %v3951_v52 = vld [vmem:[%s8527_s1 + $0x198] sm:$0xf] }
  0x26   : > { %v3945_v47 = vld [vmem:[%s8527_s1 + $0x1b0] sm:$0xf0]  ;;  %v5134_v53 = vld [vmem:[%s8527_s1 + $0x1b4] sm:$0xf0]  ;;  %v5125_v55 = vld [vmem:[%s8527_s1 + $0x16c] sm:$0xf0] }
  0x27   : > { %711 = vmatpush.bf16.msra.mxu0 %v3768_v16  ;;  %724 = vmatpush.bf16.msra.mxu1 %v3772_v19  ;;  %v3948_v54 = vor.u32 %v5129_v46, %v3945_v47  ;;  %v5130_v56 = vld [vmem:[%s8527_s1 + $0x19c] sm:$0xf]  ;;  %v5121_v58 = vld [vmem:[%s8527_s1 + $0x154] sm:$0xf]  ;;  %v3952_v60 = vor.u32 %v5134_v53, %v3951_v52  ;;  %v3912_v61 = vor.u32 %v5125_v55, %v3911_v51  ;;  %v3879_v63 = vld [vmem:[%s8527_s1 + $0x110] sm:$0xf] }
  0x28   : > { %737 = vmatpush.bf16.msra.mxu2 %v3776_v20  ;;  %v3953_v57 = vld [vmem:[%s8527_s1 + $0x1b8] sm:$0xf0]  ;;  %v3913_v59 = vld [vmem:[%s8527_s1 + $0x170] sm:$0xf0]  ;;  %v3919_v0 = vld [vmem:[%s8527_s1 + $0x158] sm:$0xf] }
  0x29   : > { %750 = vmatpush.bf16.msra.mxu3 %v3780_v24  ;;  %v3956_v62 = vor.u32 %v5130_v56, %v3953_v57  ;;  %v5126_v1 = vld [vmem:[%s8527_s1 + $0x174] sm:$0xf0]  ;;  %v3916_v2 = vor.u32 %v5121_v58, %v3913_v59  ;;  %v5117_v3 = vld [vmem:[%s8527_s1 + $0x12c] sm:$0xf0]  ;;  %v5122_v4 = vld [vmem:[%s8527_s1 + $0x15c] sm:$0xf] }
  0x2a   : > { %v3921_v5 = vld [vmem:[%s8527_s1 + $0x178] sm:$0xf0]  ;;  %v5113_v6 = vld [vmem:[%s8527_s1 + $0x114] sm:$0xf]  ;;  %v3920_v8 = vor.u32 %v5126_v1, %v3919_v0  ;;  %v3880_v9 = vor.u32 %v5117_v3, %v3879_v63  ;;  %v3847_v11 = vld [vmem:[%s8527_s1 + $0xd0] sm:$0xf] }
  0x2b   : > { %712 = vmatpush.bf16.msra.mxu0 %v3736_v30  ;;  %725 = vmatpush.bf16.msra.mxu1 %v3740_v34  ;;  %v3881_v7 = vld [vmem:[%s8527_s1 + $0x130] sm:$0xf0]  ;;  %v3924_v10 = vor.u32 %v5122_v4, %v3921_v5  ;;  %v3887_v12 = vld [vmem:[%s8527_s1 + $0x118] sm:$0xf]  ;;  %v5109_v15 = vld [vmem:[%s8527_s1 + $0xec] sm:$0xf0] }
  0x2c   : > { %738 = vmatpush.bf16.msra.mxu2 %v3744_v35  ;;  %v5118_v13 = vld [vmem:[%s8527_s1 + $0x134] sm:$0xf0]  ;;  %v3884_v14 = vor.u32 %v5113_v6, %v3881_v7  ;;  %v5114_v16 = vld [vmem:[%s8527_s1 + $0x11c] sm:$0xf]  ;;  %v5105_v18 = vld [vmem:[%s8527_s1 + $0xd4] sm:$0xf]  ;;  %v3848_v21 = vor.u32 %v5109_v15, %v3847_v11 }
  0x2d   : > { %751 = vmatpush.bf16.msra.mxu3 %v3748_v36  ;;  %v3889_v17 = vld [vmem:[%s8527_s1 + $0x138] sm:$0xf0]  ;;  %v3849_v19 = vld [vmem:[%s8527_s1 + $0xf0] sm:$0xf0]  ;;  %v3888_v20 = vor.u32 %v5118_v13, %v3887_v12  ;;  %v3815_v23 = vld [vmem:[%s8527_s1 + $0x90] sm:$0xf] }
  0x2e   : > { %713 = vmatmul.bf16.vlgmr.msra.gmra.mxu0 %v5732_v41  ;;  %726 = vmatmul.bf16.vlgmr.msra.gmra.mxu1 %v5732_v41  ;;  %v3892_v22 = vor.u32 %v5114_v16, %v3889_v17  ;;  %v3855_v24 = vld [vmem:[%s8527_s1 + $0xd8] sm:$0xf]  ;;  %v3852_v26 = vor.u32 %v5105_v18, %v3849_v19  ;;  %v5101_v27 = vld [vmem:[%s8527_s1 + $0xac] sm:$0xf0]  ;;  %v5106_v28 = vld [vmem:[%s8527_s1 + $0xdc] sm:$0xf] }
  0x2f   : > { %757 = vmatpush.bf16.msrb.mxu0 %v3976_v37  ;;  %770 = vmatpush.bf16.msrb.mxu1 %v3980_v42  ;;  %v5110_v25 = vld [vmem:[%s8527_s1 + $0xf4] sm:$0xf0]  ;;  %v3857_v29 = vld [vmem:[%s8527_s1 + $0xf8] sm:$0xf0]  ;;  %v5097_v30 = vld [vmem:[%s8527_s1 + $0x94] sm:$0xf]  ;;  %v3816_v33 = vor.u32 %v5101_v27, %v3815_v23 }
  0x30   : > { %739 = vmatmul.bf16.vlgmr.msra.gmra.mxu2 %v5732_v41  ;;  %752 = vmatmul.bf16.vlgmr.msra.gmra.mxu3 %v5732_v41  ;;  %v3817_v31 = vld [vmem:[%s8527_s1 + $0xb0] sm:$0xf0]  ;;  %v3856_v32 = vor.u32 %v5110_v25, %v3855_v24  ;;  %v3860_v34 = vor.u32 %v5106_v28, %v3857_v29  ;;  %v3783_v35 = vld [vmem:[%s8527_s1 + $0x50] sm:$0xf]  ;;  %v3823_v36 = vld [vmem:[%s8527_s1 + $0x98] sm:$0xf] }
  0x31   : > { %783 = vmatpush.bf16.msrb.mxu2 %v3984_v48  ;;  %796 = vmatpush.bf16.msrb.mxu3 %v3988_v50  ;;  %v5102_v37 = vld [vmem:[%s8527_s1 + $0xb4] sm:$0xf0]  ;;  %v3820_v38 = vor.u32 %v5097_v30, %v3817_v31  ;;  %v5093_v39 = vld [vmem:[%s8527_s1 + $0x6c] sm:$0xf0]  ;;  %v5098_v40 = vld [vmem:[%s8527_s1 + $0x9c] sm:$0xf] }
  0x32   : > { %v3825_v42 = vld [vmem:[%s8527_s1 + $0xb8] sm:$0xf0]  ;;  %v5089_v43 = vld [vmem:[%s8527_s1 + $0x54] sm:$0xf]  ;;  %v3824_v45 = vor.u32 %v5102_v37, %v3823_v36  ;;  %v3751_v46 = vld [vmem:[%s8527_s1 + $0x10] sm:$0xf]  ;;  %v3784_v47 = vor.u32 %v5093_v39, %v3783_v35 }
  0x33   : > { %758 = vmatpush.bf16.msrb.mxu0 %v3944_v49  ;;  %771 = vmatpush.bf16.msrb.mxu1 %v3948_v54  ;;  %v3785_v44 = vld [vmem:[%s8527_s1 + $0x70] sm:$0xf0]  ;;  %v3828_v48 = vor.u32 %v5098_v40, %v3825_v42  ;;  %v5085_v49 = vld [vmem:[%s8527_s1 + $0x2c] sm:$0xf0]  ;;  %v3791_v50 = vld [vmem:[%s8527_s1 + $0x58] sm:$0xf] }
  0x34   : > { %v5094_v51 = vld [vmem:[%s8527_s1 + $0x74] sm:$0xf0]  ;;  %v3788_v52 = vor.u32 %v5089_v43, %v3785_v44  ;;  %v5081_v53 = vld [vmem:[%s8527_s1 + $0x14] sm:$0xf]  ;;  %v5090_v54 = vld [vmem:[%s8527_s1 + $0x5c] sm:$0xf] }
  0x35   : > { %784 = vmatpush.bf16.msrb.mxu2 %v3952_v60  ;;  %797 = vmatpush.bf16.msrb.mxu3 %v3956_v62  ;;  %v3793_v55 = vld [vmem:[%s8527_s1 + $0x78] sm:$0xf0]  ;;  %v3753_v56 = vld [vmem:[%s8527_s1 + $0x30] sm:$0xf0]  ;;  %v4103_v57 = vld [vmem:[%s8529_s3 + $0xe0] sm:$0xf]  ;;  %v3752_v62 = vor.u32 %v5085_v49, %v3751_v46 }
  0x36   : > { %v5173_v58 = vld [vmem:[%s8529_s3 + $0xec] sm:$0xf0]  ;;  %v4231_v59 = vld [vmem:[%s8529_s3 + $0x1e0] sm:$0xf]  ;;  %v3796_v63 = vor.u32 %v5090_v54, %v3793_v55  ;;  %v3759_v1 = vld [vmem:[%s8527_s1 + $0x18] sm:$0xf]  ;;  %v3756_v4 = vor.u32 %v5081_v53, %v3753_v56 }
  0x37   : > { %759 = vmatpush.bf16.msrb.mxu0 %v3912_v61  ;;  %772 = vmatpush.bf16.msrb.mxu1 %v3916_v2  ;;  %v5205_v60 = vld [vmem:[%s8529_s3 + $0x1ec] sm:$0xf0]  ;;  %v3792_v61 = vor.u32 %v5094_v51, %v3791_v50  ;;  %v4087_v0 = vld [vmem:[%s8529_s3 + $0xc0] sm:$0xf]  ;;  %v5086_v2 = vld [vmem:[%s8527_s1 + $0x34] sm:$0xf0]  ;;  %v5921_v5 = vor.u32 %v5173_v58, %v4103_v57 }
  0x38   : > { %v5082_v3 = vld [vmem:[%s8527_s1 + $0x1c] sm:$0xf]  ;;  %v4359_v7 = vld [vmem:[%s8529_s3 + $0x2e0] sm:$0xf]  ;;  %v5269_v12 = vld [vmem:[%s8529_s3 + $0x3ec] sm:$0xf0]  ;;  %v3760_v15 = vor.u32 %v5086_v2, %v3759_v1 }
  0x39   : > { %785 = vmatpush.bf16.msrb.mxu2 %v3920_v8  ;;  %798 = vmatpush.bf16.msrb.mxu3 %v3924_v10  ;;  %v3761_v6 = vld [vmem:[%s8527_s1 + $0x38] sm:$0xf0]  ;;  %v5237_v8 = vld [vmem:[%s8529_s3 + $0x2ec] sm:$0xf0]  ;;  %v4487_v11 = vld [vmem:[%s8529_s3 + $0x3e0] sm:$0xf] }
  0x3a   : > { %v5169_v10 = vld [vmem:[%s8529_s3 + $0xcc] sm:$0xf0]  ;;  %v4215_v13 = vld [vmem:[%s8529_s3 + $0x1c0] sm:$0xf]  ;;  %v3764_v16 = vor.u32 %v5082_v3, %v3761_v6  ;;  %v5949_v17 = vor.u32 %v5237_v8, %v4359_v7  ;;  %v5954_v19 = vor.u32 %v5269_v12, %v4487_v11  ;;  %s5451_s11 = smov 80   ;;  %s5452_s12 = smov 112  }
  0x3b   : > { %760 = vmatpush.bf16.msrb.mxu0 %v3880_v9  ;;  %773 = vmatpush.bf16.msrb.mxu1 %v3884_v14  ;;  %v5932_v9 = vor.u32 %v5205_v60, %v4231_v59  ;;  %v5201_v14 = vld [vmem:[%s8529_s3 + $0x1cc] sm:$0xf0]  ;;  %v5952_v18 = vor.u32 %v5169_v10, %v4087_v0  ;;  %v4471_v25 = vld [vmem:[%s8529_s3 + $0x3c0] sm:$0xf]  ;;  %s5453_s14 = smov 96  }
  0x3c   : > { %8762 = vst [vmem:[#allocation3_spill] sm:$0xff] %v5954_v19  ;;  %v5966_v23 = vor.u32 %v5201_v14, %v4215_v13  ;;  %v5165_v24 = vld [vmem:[%s8529_s3 + $0xac] sm:$0xf0]  ;;  %v4199_v27 = vld [vmem:[%s8529_s3 + $0x1a0] sm:$0xf] }
  0x3d   : > { %786 = vmatpush.bf16.msrb.mxu2 %v3888_v20  ;;  %799 = vmatpush.bf16.msrb.mxu3 %v3892_v22  ;;  %8761 = vst [vmem:[#allocation2_spill] sm:$0xff] %v5932_v9  ;;  %v4071_v20 = vld [vmem:[%s8529_s3 + $0xa0] sm:$0xf]  ;;  %v5233_v22 = vld [vmem:[%s8529_s3 + $0x2cc] sm:$0xf0] }
  0x3e   : > { %8763 = vst [vmem:[#allocation4_spill] sm:$0xff] %v5966_v23  ;;  %v5197_v28 = vld [vmem:[%s8529_s3 + $0x1ac] sm:$0xf0]  ;;  %v5989_v30 = vor.u32 %v5165_v24, %v4071_v20  ;;  %v4455_v37 = vld [vmem:[%s8529_s3 + $0x3a0] sm:$0xf] }
  0x3f   : > { %761 = vmatpush.bf16.msrb.mxu0 %v3848_v21  ;;  %774 = vmatpush.bf16.msrb.mxu1 %v3852_v26  ;;  %v4343_v21 = vld [vmem:[%s8529_s3 + $0x2c0] sm:$0xf]  ;;  %v5265_v26 = vld [vmem:[%s8529_s3 + $0x3cc] sm:$0xf0]  ;;  %v6003_v35 = vor.u32 %v5197_v28, %v4199_v27 }
  0x40   : > { %v5985_v29 = vor.u32 %v5233_v22, %v4343_v21  ;;  %v5991_v31 = vor.u32 %v5265_v26, %v4471_v25  ;;  %v5161_v36 = vld [vmem:[%s8529_s3 + $0x8c] sm:$0xf0]  ;;  %v4183_v39 = vld [vmem:[%s8529_s3 + $0x180] sm:$0xf] }
  0x41   : > { %787 = vmatpush.bf16.msrb.mxu2 %v3856_v32  ;;  %800 = vmatpush.bf16.msrb.mxu3 %v3860_v34  ;;  %v4055_v32 = vld [vmem:[%s8529_s3 + $0x80] sm:$0xf]  ;;  %v5229_v34 = vld [vmem:[%s8529_s3 + $0x2ac] sm:$0xf0]  ;;  %8765 = vst [vmem:[#allocation6_spill] sm:$0xff] %v6003_v35 }
  0x42   : > { %8764 = vst [vmem:[#allocation5_spill] sm:$0xff] %v5991_v31  ;;  %v5193_v40 = vld [vmem:[%s8529_s3 + $0x18c] sm:$0xf0]  ;;  %v6028_v43 = vor.u32 %v5161_v36, %v4055_v32  ;;  %v4439_v49 = vld [vmem:[%s8529_s3 + $0x380] sm:$0xf] }
  0x43   : > { %762 = vmatpush.bf16.msrb.mxu0 %v3816_v33  ;;  %775 = vmatpush.bf16.msrb.mxu1 %v3820_v38  ;;  %v4327_v33 = vld [vmem:[%s8529_s3 + $0x2a0] sm:$0xf]  ;;  %v5261_v38 = vld [vmem:[%s8529_s3 + $0x3ac] sm:$0xf0]  ;;  %v4105_v36 = vld [vmem:[%s8529_s3 + $0xf0] sm:$0xf0] }
  0x44   : > { %v6024_v42 = vor.u32 %v5229_v34, %v4327_v33  ;;  %v6030_v44 = vor.u32 %v5261_v38, %v4455_v37  ;;  %v5225_v46 = vld [vmem:[%s8529_s3 + $0x28c] sm:$0xf0]  ;;  %v4167_v51 = vld [vmem:[%s8529_s3 + $0x160] sm:$0xf]  ;;  %v5171_v34 = vld [vmem:[%s8529_s3 + $0xe4] sm:$0xf] }
  0x45   : > { %788 = vmatpush.bf16.msrb.mxu2 %v3824_v45  ;;  %801 = vmatpush.bf16.msrb.mxu3 %v3828_v48  ;;  %v4039_v45 = vld [vmem:[%s8529_s3 + $0x60] sm:$0xf]  ;;  %v5157_v48 = vld [vmem:[%s8529_s3 + $0x6c] sm:$0xf0]  ;;  %v5203_v37 = vld [vmem:[%s8529_s3 + $0x1e4] sm:$0xf] }
  0x46   : > { %8766 = vst [vmem:[#allocation7_spill] sm:$0xff] %v6030_v44  ;;  %v5257_v50 = vld [vmem:[%s8529_s3 + $0x38c] sm:$0xf0]  ;;  %v6064_v54 = vor.u32 %v5157_v48, %v4039_v45  ;;  %v4023_v56 = vld [vmem:[%s8529_s3 + $0x40] sm:$0xf] }
  0x47   : > { %763 = vmatpush.bf16.msrb.mxu0 %v3784_v47  ;;  %776 = vmatpush.bf16.msrb.mxu1 %v3788_v52  ;;  %v6042_v47 = vor.u32 %v5193_v40, %v4183_v39  ;;  %v5189_v52 = vld [vmem:[%s8529_s3 + $0x16c] sm:$0xf0]  ;;  %v6066_v55 = vor.u32 %v5257_v50, %v4439_v49  ;;  %v4295_v57 = vld [vmem:[%s8529_s3 + $0x260] sm:$0xf]  ;;  %v4233_v38 = vld [vmem:[%s8529_s3 + $0x1f0] sm:$0xf0] }
  0x48   : > { %v5221_v58 = vld [vmem:[%s8529_s3 + $0x26c] sm:$0xf0]  ;;  %v6078_v59 = vor.u32 %v5189_v52, %v4167_v51  ;;  %v4007_v2 = vld [vmem:[%s8529_s3 + $0x20] sm:$0xf]  ;;  %v6203_v51 = vor.u32 %v5171_v34, %v4105_v36  ;;  %v5159_v36 = vld [vmem:[%s8529_s3 + $0x84] sm:$0xf] }
  0x49   : > { %789 = vmatpush.bf16.msrb.mxu2 %v3792_v61  ;;  %802 = vmatpush.bf16.msrb.mxu3 %v3796_v63  ;;  %8767 = vst [vmem:[#allocation8_spill] sm:$0xff] %v6042_v47  ;;  %v5153_v60 = vld [vmem:[%s8529_s3 + $0x4c] sm:$0xf0]  ;;  %v4423_v61 = vld [vmem:[%s8529_s3 + $0x360] sm:$0xf]  ;;  %v6096_v1 = vor.u32 %v5221_v58, %v4295_v57  ;;  %v6214_v58 = vor.u32 %v5203_v37, %v4233_v38 }
  0x4a   : > { %8768 = vst [vmem:[#allocation9_spill] sm:$0xff] %v6066_v55  ;;  %v4151_v63 = vld [vmem:[%s8529_s3 + $0x140] sm:$0xf]  ;;  %v5185_v0 = vld [vmem:[%s8529_s3 + $0x14c] sm:$0xf0]  ;;  %v6103_v3 = vor.u32 %v5153_v60, %v4023_v56 }
  0x4b   : > { %764 = vmatpush.bf16.msrb.mxu0 %v3752_v62  ;;  %777 = vmatpush.bf16.msrb.mxu1 %v3756_v4  ;;  %8769 = vst [vmem:[#allocation10_spill] sm:$0xff] %v6078_v59  ;;  %v5253_v62 = vld [vmem:[%s8529_s3 + $0x36c] sm:$0xf0]  ;;  %v4279_v6 = vld [vmem:[%s8529_s3 + $0x240] sm:$0xf]  ;;  %v6114_v8 = vor.u32 %v5185_v0, %v4151_v63 }
  0x4c   : > { %v6105_v4 = vor.u32 %v5253_v62, %v4423_v61  ;;  %v5217_v7 = vld [vmem:[%s8529_s3 + $0x24c] sm:$0xf0]  ;;  %v4407_v11 = vld [vmem:[%s8529_s3 + $0x340] sm:$0xf]  ;;  %v5235_v56 = vld [vmem:[%s8529_s3 + $0x2e4] sm:$0xf] }
  0x4d   : > { %790 = vmatpush.bf16.msrb.mxu2 %v3760_v15  ;;  %803 = vmatpush.bf16.msrb.mxu3 %v3764_v16  ;;  %8771 = vst [vmem:[#allocation12_spill] sm:$0xff] %v6114_v8  ;;  %v5149_v10 = vld [vmem:[%s8529_s3 + $0x2c] sm:$0xf0]  ;;  %v4135_v13 = vld [vmem:[%s8529_s3 + $0x120] sm:$0xf]  ;;  %v6132_v15 = vor.u32 %v5217_v7, %v4279_v6 }
  0x4e   : > { %765 = vmatmul.bf16.vlgmr.msrb.gmra.mxu0 %v5732_v41  ;;  %778 = vmatmul.bf16.vlgmr.msrb.gmra.mxu1 %v5732_v41  ;;  %8770 = vst [vmem:[#allocation11_spill] sm:$0xff] %v6105_v4  ;;  %v5249_v12 = vld [vmem:[%s8529_s3 + $0x34c] sm:$0xf0]  ;;  %v3991_v16 = vld [vmem:[%s8529_s3] sm:$0xf]  ;;  %v6139_v20 = vor.u32 %v5149_v10, %v4007_v2 }
  0x4f   : > { %1589 = vmatpush.bf16.msra.mxu0 %v5921_v5  ;;  %1602 = vmatpush.bf16.msra.mxu1 %v5932_v9  ;;  %v5181_v14 = vld [vmem:[%s8529_s3 + $0x12c] sm:$0xf0]  ;;  %v6141_v21 = vor.u32 %v5249_v12, %v4407_v11  ;;  %v4263_v24 = vld [vmem:[%s8529_s3 + $0x220] sm:$0xf]  ;;  %v4361_v57 = vld [vmem:[%s8529_s3 + $0x2f0] sm:$0xf0] }
  0x50   : > { %791 = vmatmul.bf16.vlgmr.msrb.gmra.mxu2 %v5732_v41  ;;  %804 = vmatmul.bf16.vlgmr.msrb.gmra.mxu3 %v5732_v41  ;;  %v4311_v41 = vld [vmem:[%s8529_s3 + $0x280] sm:$0xf]  ;;  %v5145_v22 = vld [vmem:[%s8529_s3 + $0xc] sm:$0xf0]  ;;  %v6153_v26 = vor.u32 %v5181_v14, %v4135_v13  ;;  %8776 = vst [vmem:[#allocation17_spill] sm:$0xff] %v6214_v58  ;;  %v6238_v7 = vor.u32 %v5235_v56, %v4361_v57 }
  0x51   : > { %1615 = vmatpush.bf16.msra.mxu2 %v5949_v17  ;;  %1628 = vmatpush.bf16.msra.mxu3 %v5954_v19  ;;  %v6060_v53 = vor.u32 %v5225_v46, %v4311_v41  ;;  %8772 = vst [vmem:[#allocation13_spill] sm:$0xff] %v6141_v21  ;;  %v5213_v25 = vld [vmem:[%s8529_s3 + $0x22c] sm:$0xf0]  ;;  %v4119_v27 = vld [vmem:[%s8529_s3 + $0x100] sm:$0xf]  ;;  %v6184_v40 = vor.u32 %v5145_v22, %v3991_v16 }
  0x52   : > { %8773 = vst [vmem:[#allocation14_spill] sm:$0xff] %v6153_v26  ;;  %v4391_v28 = vld [vmem:[%s8529_s3 + $0x320] sm:$0xf]  ;;  %v5245_v32 = vld [vmem:[%s8529_s3 + $0x32c] sm:$0xf0]  ;;  %v6180_v39 = vor.u32 %v5213_v25, %v4263_v24 }
  0x53   : > { %1590 = vmatpush.bf16.msra.mxu0 %v5952_v18  ;;  %1603 = vmatpush.bf16.msra.mxu1 %v5966_v23  ;;  %v5177_v33 = vld [vmem:[%s8529_s3 + $0x10c] sm:$0xf0]  ;;  %v6186_v45 = vor.u32 %v5245_v32, %v4391_v28  ;;  %v5167_v41 = vld [vmem:[%s8529_s3 + $0xc4] sm:$0xf]  ;;  %v4247_v46 = vld [vmem:[%s8529_s3 + $0x200] sm:$0xf] }
  0x54   : > { %v5209_v48 = vld [vmem:[%s8529_s3 + $0x20c] sm:$0xf0]  ;;  %v4375_v49 = vld [vmem:[%s8529_s3 + $0x300] sm:$0xf]  ;;  %v6201_v50 = vor.u32 %v5177_v33, %v4119_v27  ;;  %v4089_v60 = vld [vmem:[%s8529_s3 + $0xd0] sm:$0xf0] }
  0x55   : > { %1616 = vmatpush.bf16.msra.mxu2 %v5985_v29  ;;  %1629 = vmatpush.bf16.msra.mxu3 %v5991_v31  ;;  %8774 = vst [vmem:[#allocation15_spill] sm:$0xff] %v6186_v45  ;;  %v5241_v52 = vld [vmem:[%s8529_s3 + $0x30c] sm:$0xf0]  ;;  %v5267_v61 = vld [vmem:[%s8529_s3 + $0x3e4] sm:$0xf]  ;;  %v6232_v2 = vor.u32 %v5209_v48, %v4247_v46  ;;  %v6242_v10 = vor.u32 %v5167_v41, %v4089_v60 }
  0x56   : > { %8775 = vst [vmem:[#allocation16_spill] sm:$0xff] %v6201_v50  ;;  %v4489_v62 = vld [vmem:[%s8529_s3 + $0x3f0] sm:$0xf0]  ;;  %v5199_v63 = vld [vmem:[%s8529_s3 + $0x1c4] sm:$0xf]  ;;  %v6236_v6 = vor.u32 %v5241_v52, %v4375_v49 }
  0x57   : > { %1591 = vmatpush.bf16.msra.mxu0 %v5989_v30  ;;  %1604 = vmatpush.bf16.msra.mxu1 %v6003_v35  ;;  %v4217_v0 = vld [vmem:[%s8529_s3 + $0x1d0] sm:$0xf0]  ;;  %8777 = vst [vmem:[#allocation18_spill] sm:$0xff] %v6232_v2  ;;  %v6244_v11 = vor.u32 %v5267_v61, %v4489_v62  ;;  %v5163_v12 = vld [vmem:[%s8529_s3 + $0xa4] sm:$0xf] }
  0x58   : > { %8778 = vst [vmem:[#allocation19_spill] sm:$0xff] %v6236_v6  ;;  %v5231_v13 = vld [vmem:[%s8529_s3 + $0x2c4] sm:$0xf]  ;;  %v4345_v14 = vld [vmem:[%s8529_s3 + $0x2d0] sm:$0xf0]  ;;  %v6256_v16 = vor.u32 %v5199_v63, %v4217_v0 }
  0x59   : > { %1617 = vmatpush.bf16.msra.mxu2 %v6024_v42  ;;  %1630 = vmatpush.bf16.msra.mxu3 %v6030_v44  ;;  %8779 = vst [vmem:[#allocation20_spill] sm:$0xff] %v6238_v7  ;;  %v4073_v22 = vld [vmem:[%s8529_s3 + $0xb0] sm:$0xf0]  ;;  %v5263_v24 = vld [vmem:[%s8529_s3 + $0x3c4] sm:$0xf]  ;;  %v6276_v32 = vor.u32 %v5231_v13, %v4345_v14 }
  0x5a   : > { %8780 = vst [vmem:[#allocation21_spill] sm:$0xff] %v6244_v11  ;;  %v4473_v25 = vld [vmem:[%s8529_s3 + $0x3d0] sm:$0xf0]  ;;  %v5195_v27 = vld [vmem:[%s8529_s3 + $0x1a4] sm:$0xf]  ;;  %v6280_v33 = vor.u32 %v5163_v12, %v4073_v22 }
  0x5b   : > { %1592 = vmatpush.bf16.msra.mxu0 %v6028_v43  ;;  %1605 = vmatpush.bf16.msra.mxu1 %v6042_v47  ;;  %8781 = vst [vmem:[#allocation22_spill] sm:$0xff] %v6256_v16  ;;  %v4201_v28 = vld [vmem:[%s8529_s3 + $0x1b0] sm:$0xf0]  ;;  %v6282_v34 = vor.u32 %v5263_v24, %v4473_v25  ;;  %v5227_v37 = vld [vmem:[%s8529_s3 + $0x2a4] sm:$0xf] }
  0x5c   : > { %8782 = vst [vmem:[#allocation23_spill] sm:$0xff] %v6276_v32  ;;  %v4329_v38 = vld [vmem:[%s8529_s3 + $0x2b0] sm:$0xf0]  ;;  %v6294_v41 = vor.u32 %v5195_v27, %v4201_v28  ;;  %v5259_v48 = vld [vmem:[%s8529_s3 + $0x3a4] sm:$0xf] }
  0x5d   : > { %1618 = vmatpush.bf16.msra.mxu2 %v6060_v53  ;;  %1631 = vmatpush.bf16.msra.mxu3 %v6066_v55  ;;  %8783 = vst [vmem:[#allocation24_spill] sm:$0xff] %v6282_v34  ;;  %v4057_v46 = vld [vmem:[%s8529_s3 + $0x90] sm:$0xf0]  ;;  %v5191_v52 = vld [vmem:[%s8529_s3 + $0x184] sm:$0xf]  ;;  %v6312_v57 = vor.u32 %v5227_v37, %v4329_v38 }
  0x5e   : > { %8784 = vst [vmem:[#allocation25_spill] sm:$0xff] %v6294_v41  ;;  %v4457_v49 = vld [vmem:[%s8529_s3 + $0x3b0] sm:$0xf0]  ;;  %v6316_v60 = vor.u32 %v5159_v36, %v4057_v46  ;;  %v5155_v62 = vld [vmem:[%s8529_s3 + $0x64] sm:$0xf] }
  0x5f   : > { %1593 = vmatpush.bf16.msra.mxu0 %v6064_v54  ;;  %1606 = vmatpush.bf16.msra.mxu1 %v6078_v59  ;;  %v4185_v56 = vld [vmem:[%s8529_s3 + $0x190] sm:$0xf0]  ;;  %8785 = vst [vmem:[#allocation26_spill] sm:$0xff] %v6312_v57  ;;  %v6318_v61 = vor.u32 %v5259_v48, %v4457_v49  ;;  %v5223_v63 = vld [vmem:[%s8529_s3 + $0x284] sm:$0xf] }
  0x60   : > { %8786 = vst [vmem:[#allocation27_spill] sm:$0xff] %v6316_v60  ;;  %v4313_v0 = vld [vmem:[%s8529_s3 + $0x290] sm:$0xf0]  ;;  %v6330_v12 = vor.u32 %v5191_v52, %v4185_v56  ;;  %v5255_v14 = vld [vmem:[%s8529_s3 + $0x384] sm:$0xf] }
  0x61   : > { %1619 = vmatpush.bf16.msra.mxu2 %v6096_v1  ;;  %1632 = vmatpush.bf16.msra.mxu3 %v6105_v4  ;;  %8787 = vst [vmem:[#allocation28_spill] sm:$0xff] %v6318_v61  ;;  %v4041_v13 = vld [vmem:[%s8529_s3 + $0x70] sm:$0xf0]  ;;  %v5187_v24 = vld [vmem:[%s8529_s3 + $0x164] sm:$0xf]  ;;  %v6348_v27 = vor.u32 %v5223_v63, %v4313_v0 }
  0x62   : > { %8788 = vst [vmem:[#allocation29_spill] sm:$0xff] %v6330_v12  ;;  %v4441_v22 = vld [vmem:[%s8529_s3 + $0x390] sm:$0xf0]  ;;  %v6352_v28 = vor.u32 %v5155_v62, %v4041_v13  ;;  %v5151_v38 = vld [vmem:[%s8529_s3 + $0x44] sm:$0xf] }
  0x63   : > { %1594 = vmatpush.bf16.msra.mxu0 %v6103_v3  ;;  %1607 = vmatpush.bf16.msra.mxu1 %v6114_v8  ;;  %v4169_v25 = vld [vmem:[%s8529_s3 + $0x170] sm:$0xf0]  ;;  %8789 = vst [vmem:[#allocation30_spill] sm:$0xff] %v6348_v27  ;;  %v6354_v36 = vor.u32 %v5255_v14, %v4441_v22  ;;  %v5183_v48 = vld [vmem:[%s8529_s3 + $0x144] sm:$0xf] }
  0x64   : > { %8790 = vst [vmem:[#allocation31_spill] sm:$0xff] %v6352_v28  ;;  %v6357_v37 = vor.u32 %v5187_v24, %v4169_v25  ;;  %v4025_v46 = vld [vmem:[%s8529_s3 + $0x50] sm:$0xf0]  ;;  %v5219_v62 = vld [vmem:[%s8529_s3 + $0x264] sm:$0xf] }
  0x65   : > { %1620 = vmatpush.bf16.msra.mxu2 %v6132_v15  ;;  %1633 = vmatpush.bf16.msra.mxu3 %v6141_v21  ;;  %8791 = vst [vmem:[#allocation32_spill] sm:$0xff] %v6354_v36  ;;  %v4153_v49 = vld [vmem:[%s8529_s3 + $0x150] sm:$0xf0]  ;;  %v6374_v52 = vor.u32 %v5151_v38, %v4025_v46  ;;  %v5251_v0 = vld [vmem:[%s8529_s3 + $0x364] sm:$0xf] }
  0x66   : > { %8792 = vst [vmem:[#allocation33_spill] sm:$0xff] %v6357_v37  ;;  %v6377_v56 = vor.u32 %v5183_v48, %v4153_v49  ;;  %v4297_v63 = vld [vmem:[%s8529_s3 + $0x270] sm:$0xf0]  ;;  %v5147_v24 = vld [vmem:[%s8529_s3 + $0x24] sm:$0xf] }
  0x67   : > { %1595 = vmatpush.bf16.msra.mxu0 %v6139_v20  ;;  %1608 = vmatpush.bf16.msra.mxu1 %v6153_v26  ;;  %8793 = vst [vmem:[#allocation34_spill] sm:$0xff] %v6374_v52  ;;  %v6390_v13 = vor.u32 %v5219_v62, %v4297_v63  ;;  %v4425_v14 = vld [vmem:[%s8529_s3 + $0x370] sm:$0xf0]  ;;  %v5179_v46 = vld [vmem:[%s8529_s3 + $0x124] sm:$0xf] }
  0x68   : > { %8794 = vst [vmem:[#allocation35_spill] sm:$0xff] %v6377_v56  ;;  %v6395_v22 = vor.u32 %v5251_v0, %v4425_v14  ;;  %v4009_v25 = vld [vmem:[%s8529_s3 + $0x30] sm:$0xf0]  ;;  %v5215_v62 = vld [vmem:[%s8529_s3 + $0x244] sm:$0xf] }
  0x69   : > { %1621 = vmatpush.bf16.msra.mxu2 %v6180_v39  ;;  %1634 = vmatpush.bf16.msra.mxu3 %v6186_v45  ;;  %8795 = vst [vmem:[#allocation36_spill] sm:$0xff] %v6390_v13  ;;  %v6404_v38 = vor.u32 %v5147_v24, %v4009_v25  ;;  %v4137_v48 = vld [vmem:[%s8529_s3 + $0x130] sm:$0xf0]  ;;  %v5247_v0 = vld [vmem:[%s8529_s3 + $0x344] sm:$0xf] }
  0x6a   : > { %8796 = vst [vmem:[#allocation37_spill] sm:$0xff] %v6395_v22  ;;  %v6413_v49 = vor.u32 %v5179_v46, %v4137_v48  ;;  %v4281_v63 = vld [vmem:[%s8529_s3 + $0x250] sm:$0xf0]  ;;  %v5143_v46 = vld [vmem:[%s8529_s3 + $0x4] sm:$0xf] }
  0x6b   : > { %1596 = vmatpush.bf16.msra.mxu0 %v6184_v40  ;;  %1609 = vmatpush.bf16.msra.mxu1 %v6201_v50  ;;  %8797 = vst [vmem:[#allocation38_spill] sm:$0xff] %v6404_v38  ;;  %v6425_v14 = vor.u32 %v5215_v62, %v4281_v63  ;;  %v4409_v24 = vld [vmem:[%s8529_s3 + $0x350] sm:$0xf0]  ;;  %v5175_v62 = vld [vmem:[%s8529_s3 + $0x104] sm:$0xf] }
  0x6c   : > { %8798 = vst [vmem:[#allocation39_spill] sm:$0xff] %v6413_v49  ;;  %v6431_v25 = vor.u32 %v5247_v0, %v4409_v24  ;;  %v3993_v48 = vld [vmem:[%s8529_s3 + $0x10] sm:$0xf0] }
  0x6d   : > { %1622 = vmatpush.bf16.msra.mxu2 %v6232_v2  ;;  %1635 = vmatpush.bf16.msra.mxu3 %v6236_v6  ;;  %8799 = vst [vmem:[#allocation40_spill] sm:$0xff] %v6425_v14  ;;  %v6443_v63 = vor.u32 %v5143_v46, %v3993_v48  ;;  %v4121_v0 = vld [vmem:[%s8529_s3 + $0x110] sm:$0xf0]  ;;  %v5243_v48 = vld [vmem:[%s8529_s3 + $0x324] sm:$0xf] }
  0x6e   : > { %8800 = vst [vmem:[#allocation41_spill] sm:$0xff] %v6431_v25  ;;  %v6449_v24 = vor.u32 %v5175_v62, %v4121_v0  ;;  %v4393_v62 = vld [vmem:[%s8529_s3 + $0x330] sm:$0xf0] }
  0x6f   : > { %1641 = vmatpush.bf16.msrb.mxu0 %v6203_v51  ;;  %1654 = vmatpush.bf16.msrb.mxu1 %v6214_v58  ;;  %8801 = vst [vmem:[#allocation42_spill] sm:$0xff] %v6443_v63  ;;  %v6467_v0 = vor.u32 %v5243_v48, %v4393_v62  ;;  %v4377_v48 = vld [vmem:[%s8529_s3 + $0x310] sm:$0xf0] }
  0x70   : > { %8802 = vst [vmem:[#allocation43_spill] sm:$0xff] %v6449_v24 }
  0x71   : > { %1667 = vmatpush.bf16.msrb.mxu2 %v6238_v7  ;;  %1680 = vmatpush.bf16.msrb.mxu3 %v6244_v11  ;;  %8804 = vst [vmem:[#allocation45_spill] sm:$0xff] %v6467_v0 }
  0x73   : > { %1642 = vmatpush.bf16.msrb.mxu0 %v6242_v10  ;;  %1655 = vmatpush.bf16.msrb.mxu1 %v6256_v16 }
  0x75   : > { %1668 = vmatpush.bf16.msrb.mxu2 %v6276_v32  ;;  %1681 = vmatpush.bf16.msrb.mxu3 %v6282_v34  ;;  %v4335_v34 = vld [vmem:[%s8529_s3 + $0x2a8] sm:$0xf] }
  0x77   : > { %1643 = vmatpush.bf16.msrb.mxu0 %v6280_v33  ;;  %1656 = vmatpush.bf16.msrb.mxu1 %v6294_v41 }
  0x79   : > { %1669 = vmatpush.bf16.msrb.mxu2 %v6312_v57  ;;  %1682 = vmatpush.bf16.msrb.mxu3 %v6318_v61 }
  0x7b   : > { %1644 = vmatpush.bf16.msrb.mxu0 %v6316_v60  ;;  %1657 = vmatpush.bf16.msrb.mxu1 %v6330_v12  ;;  %v5234_v60 = vld [vmem:[%s8529_s3 + $0x2d4] sm:$0xf0] }
  0x7d   : > { %1670 = vmatpush.bf16.msrb.mxu2 %v6348_v27  ;;  %1683 = vmatpush.bf16.msrb.mxu3 %v6354_v36 }
  0x7f   : > { %1645 = vmatpush.bf16.msrb.mxu0 %v6352_v28  ;;  %1658 = vmatpush.bf16.msrb.mxu1 %v6357_v37  ;;  %v4367_v37 = vld [vmem:[%s8529_s3 + $0x2e8] sm:$0xf]  ;;  %v5238_v28 = vld [vmem:[%s8529_s3 + $0x2f4] sm:$0xf0] }
  0x81   : > { %1671 = vmatpush.bf16.msrb.mxu2 %v6390_v13  ;;  %1684 = vmatpush.bf16.msrb.mxu3 %v6395_v22  ;;  %v5206_v22 = vld [vmem:[%s8529_s3 + $0x1f4] sm:$0xf0] }
  0x83   : > { %1646 = vmatpush.bf16.msrb.mxu0 %v6374_v52  ;;  %1659 = vmatpush.bf16.msrb.mxu1 %v6377_v56 }
  0x85   : > { %1672 = vmatpush.bf16.msrb.mxu2 %v6425_v14  ;;  %1685 = vmatpush.bf16.msrb.mxu3 %v6431_v25  ;;  %v4265_v14 = vld [vmem:[%s8529_s3 + $0x230] sm:$0xf0] }
  0x87   : > { %1647 = vmatpush.bf16.msrb.mxu0 %v6404_v38  ;;  %1660 = vmatpush.bf16.msrb.mxu1 %v6413_v49  ;;  %v5211_v49 = vld [vmem:[%s8529_s3 + $0x224] sm:$0xf] }
  0x88   : > { %v6459_v46 = vor.u32 %v5211_v49, %v4265_v14  ;;  %v4249_v49 = vld [vmem:[%s8529_s3 + $0x210] sm:$0xf0] }
  0x89   : > { %1686 = vmatpush.bf16.msrb.mxu3 %v6467_v0  ;;  %v6492_v0 = vld [vmem:[%s8528_s2] sm:$0xff] }
  0x8a   : > { %8803 = vst [vmem:[#allocation44_spill] sm:$0xff] %v6459_v46  ;;  %1673 = vmatpush.bf16.msrb.mxu2 %v6459_v46  ;;  %v372_v36 = vperm.slane %v6492_v0, 3 }
  0x8b   : > { %1648 = vmatpush.bf16.msrb.mxu0 %v6443_v63  ;;  %1661 = vmatpush.bf16.msrb.mxu1 %v6449_v24  ;;  %v5207_v63 = vld [vmem:[%s8529_s3 + $0x204] sm:$0xf] }
  0x8c   : > { %v6477_v14 = vor.u32 %v5207_v63, %v4249_v49  ;;  %v5239_v24 = vld [vmem:[%s8529_s3 + $0x304] sm:$0xf]  ;;  %v369_v63 = vperm.slane %v6492_v0, 0  ;;  %v370_v49 = vperm.slane %v6492_v0, 1 }
  0x8d   : > { %v6485_v62 = vor.u32 %v5239_v24, %v4377_v48  ;;  %v4111_v24 = vld [vmem:[%s8529_s3 + $0xe8] sm:$0xf]  ;;  %v5174_v48 = vld [vmem:[%s8529_s3 + $0xf4] sm:$0xf0] }
  0x8e   : > { %8805 = vst [vmem:[#allocation46_spill] sm:$0xff] %v6477_v14  ;;  %1674 = vmatpush.bf16.msrb.mxu2 %v6477_v14  ;;  %v4239_v14 = vld [vmem:[%s8529_s3 + $0x1e8] sm:$0xf]  ;;  %v6509_v56 = vor.u32 %v5174_v48, %v4111_v24 }
  0x8f   : > { %8806 = vst [vmem:[#allocation47_spill] sm:$0xff] %v6485_v62  ;;  %1687 = vmatpush.bf16.msrb.mxu3 %v6485_v62  ;;  %v6514_v27 = vor.u32 %v5206_v22, %v4239_v14 }
  0x90   : > { %8807 = vst [vmem:[#allocation48_spill] sm:$0xff] %v6509_v56 }
  0x91   : > { %8808 = vst [vmem:[#allocation49_spill] sm:$0xff] %v6514_v27 }
  0xab   : > { %v714_v46 = vpop.f32.mrf.mxu0  ;;  %v727_v38 = vpop.f32.mrf.mxu1 }
  0xac   : > { %v715_v25 = vadd.f32 %v714_v46, %v369_v63  ;;  %v728_v62 = vadd.f32 %v727_v38, %v370_v49  ;;  %v371_v63 = vperm.slane %v6492_v0, 2  ;;  %v4095_v38 = vld [vmem:[%s8529_s3 + $0xc8] sm:$0xf]  ;;  %v5170_v49 = vld [vmem:[%s8529_s3 + $0xd4] sm:$0xf0] }
  0xae   : > { %v809_v13 = vmax.f32 %v715_v25, 0.0  ;;  %v810_v46 = vmax.f32 %v728_v62, 0.0  ;;  %v4223_v62 = vld [vmem:[%s8529_s3 + $0x1c8] sm:$0xf] }
  0xb0   : > { %v6511_v52 = vpack.c.bf16 %v809_v13, %v809_v13  ;;  %v6522_v25 = vpack.c.bf16 %v810_v46, %v810_v46  ;;  %v5202_v13 = vld [vmem:[%s8529_s3 + $0x1d4] sm:$0xf0]  ;;  %v6533_v46 = vor.u32 %v5170_v49, %v4095_v38  ;;  %v4079_v49 = vld [vmem:[%s8529_s3 + $0xa8] sm:$0xf] }
  0xb1   : > { %v5270_v38 = vld [vmem:[%s8529_s3 + $0x3f4] sm:$0xf0] }
  0xb2   : > { %1597 = vmatmul.bf16.vlgmr.msra.gmra.mxu0 %v6511_v52  ;;  %1610 = vmatmul.bf16.vlgmr.msra.gmra.mxu1 %v6522_v25  ;;  %8809 = vst [vmem:[#allocation50_spill] sm:$0xff] %v6533_v46 }
  0xb3   : > { %v740_v22 = vpop.f32.mrf.mxu2  ;;  %v753_v24 = vpop.f32.mrf.mxu3  ;;  %1693 = vmatpush.bf16.msra.mxu0 %v6509_v56  ;;  %1706 = vmatpush.bf16.msra.mxu1 %v6514_v27  ;;  %v6545_v56 = vor.u32 %v5202_v13, %v4223_v62  ;;  %v6562_v13 = vor.u32 %v5238_v28, %v4367_v37  ;;  %v4479_v28 = vld [vmem:[%s8529_s3 + $0x3c8] sm:$0xf] }
  0xb4   : > { %v741_v14 = vadd.f32 %v740_v22, %v371_v63  ;;  %v716_v48 = vpop.f32.mrf.mxu0  ;;  %v4495_v63 = vld [vmem:[%s8529_s3 + $0x3e8] sm:$0xf]  ;;  %v754_v22 = vadd.f32 %v753_v24, %v372_v36  ;;  %v729_v61 = vpop.f32.mrf.mxu1 }
  0xb5   : > { %8810 = vst [vmem:[#allocation51_spill] sm:$0xff] %v6545_v56  ;;  %v5166_v48 = vld [vmem:[%s8529_s3 + $0xb4] sm:$0xf0]  ;;  %v4207_v36 = vld [vmem:[%s8529_s3 + $0x1a8] sm:$0xf]  ;;  %v6567_v27 = vor.u32 %v5270_v38, %v4495_v63 }
  0xb6   : > { %v811_v57 = vmax.f32 %v741_v14, 0.0  ;;  %v5198_v61 = vld [vmem:[%s8529_s3 + $0x1b4] sm:$0xf0]  ;;  %v812_v62 = vmax.f32 %v754_v22, 0.0  ;;  %8811 = vst [vmem:[#allocation52_spill] sm:$0xff] %v6562_v13  ;;  %v6569_v12 = vor.u32 %v5166_v48, %v4079_v49 }
  0xb7   : > { %1694 = vmatpush.bf16.msra.mxu0 %v6533_v46  ;;  %8812 = vst [vmem:[#allocation53_spill] sm:$0xff] %v6567_v27  ;;  %v4351_v14 = vld [vmem:[%s8529_s3 + $0x2c8] sm:$0xf]  ;;  %1707 = vmatpush.bf16.msra.mxu1 %v6545_v56  ;;  %v6583_v37 = vor.u32 %v5198_v61, %v4207_v36  ;;  %v5266_v63 = vld [vmem:[%s8529_s3 + $0x3d4] sm:$0xf0] }
  0xb8   : > { %v6564_v24 = vpack.c.bf16 %v811_v57, %v811_v57  ;;  %8813 = vst [vmem:[#allocation54_spill] sm:$0xff] %v6569_v12  ;;  %v6580_v57 = vpack.c.bf16 %v812_v62, %v812_v62  ;;  %v4063_v22 = vld [vmem:[%s8529_s3 + $0x88] sm:$0xf]  ;;  %v5162_v38 = vld [vmem:[%s8529_s3 + $0x94] sm:$0xf0]  ;;  %v6603_v61 = vor.u32 %v5234_v60, %v4351_v14  ;;  %v6607_v56 = vor.u32 %v5266_v63, %v4479_v28 }
  0xb9   : > { %8814 = vst [vmem:[#allocation55_spill] sm:$0xff] %v6583_v37  ;;  %v4191_v49 = vld [vmem:[%s8529_s3 + $0x188] sm:$0xf]  ;;  %v5194_v48 = vld [vmem:[%s8529_s3 + $0x194] sm:$0xf0]  ;;  %v6609_v46 = vor.u32 %v5162_v38, %v4063_v22 }
  0xba   : > { %1623 = vmatmul.bf16.vlgmr.msra.gmra.mxu2 %v6564_v24  ;;  %1636 = vmatmul.bf16.vlgmr.msra.gmra.mxu3 %v6580_v57  ;;  %8815 = vst [vmem:[#allocation56_spill] sm:$0xff] %v6603_v61  ;;  %v6618_v60 = vor.u32 %v5194_v48, %v4191_v49  ;;  %v4463_v14 = vld [vmem:[%s8529_s3 + $0x3a8] sm:$0xf]  ;;  %v5262_v28 = vld [vmem:[%s8529_s3 + $0x3b4] sm:$0xf0] }
  0xbb   : > { %1719 = vmatpush.bf16.msra.mxu2 %v6562_v13  ;;  %v742_v36 = vpop.f32.mrf.mxu2  ;;  %1732 = vmatpush.bf16.msra.mxu3 %v6567_v27  ;;  %v755_v62 = vpop.f32.mrf.mxu3  ;;  %8816 = vst [vmem:[#allocation57_spill] sm:$0xff] %v6607_v56  ;;  %v5230_v13 = vld [vmem:[%s8529_s3 + $0x2b4] sm:$0xf0]  ;;  %v4047_v63 = vld [vmem:[%s8529_s3 + $0x68] sm:$0xf] }
  0xbc   : > { %1695 = vmatpush.bf16.msra.mxu0 %v6569_v12  ;;  %8817 = vst [vmem:[#allocation58_spill] sm:$0xff] %v6609_v46  ;;  %1708 = vmatpush.bf16.msra.mxu1 %v6583_v37  ;;  %v5158_v22 = vld [vmem:[%s8529_s3 + $0x74] sm:$0xf0]  ;;  %v4175_v38 = vld [vmem:[%s8529_s3 + $0x168] sm:$0xf]  ;;  %v6639_v48 = vor.u32 %v5230_v13, %v4335_v34  ;;  %v6643_v36 = vor.u32 %v5262_v28, %v4463_v14 }
  0xbd   : > { %8818 = vst [vmem:[#allocation59_spill] sm:$0xff] %v6618_v60  ;;  %v5190_v49 = vld [vmem:[%s8529_s3 + $0x174] sm:$0xf0]  ;;  %v4319_v62 = vld [vmem:[%s8529_s3 + $0x288] sm:$0xf]  ;;  %v6652_v12 = vor.u32 %v5158_v22, %v4047_v63 }
  0xbe   : > { %8819 = vst [vmem:[#allocation60_spill] sm:$0xff] %v6639_v48  ;;  %v5226_v37 = vld [vmem:[%s8529_s3 + $0x294] sm:$0xf0]  ;;  %v6654_v34 = vor.u32 %v5190_v49, %v4175_v38  ;;  %v4447_v13 = vld [vmem:[%s8529_s3 + $0x388] sm:$0xf] }
  0xbf   : > { %1720 = vmatpush.bf16.msra.mxu2 %v6603_v61  ;;  %1733 = vmatpush.bf16.msra.mxu3 %v6607_v56  ;;  %8820 = vst [vmem:[#allocation61_spill] sm:$0xff] %v6643_v36  ;;  %v5258_v14 = vld [vmem:[%s8529_s3 + $0x394] sm:$0xf0]  ;;  %v4031_v28 = vld [vmem:[%s8529_s3 + $0x48] sm:$0xf]  ;;  %v6676_v38 = vor.u32 %v5226_v37, %v4319_v62 }
  0xc0   : > { %1696 = vmatpush.bf16.msra.mxu0 %v6609_v46  ;;  %1709 = vmatpush.bf16.msra.mxu1 %v6618_v60  ;;  %8821 = vst [vmem:[#allocation62_spill] sm:$0xff] %v6652_v12  ;;  %v5154_v60 = vld [vmem:[%s8529_s3 + $0x54] sm:$0xf0]  ;;  %v4159_v63 = vld [vmem:[%s8529_s3 + $0x148] sm:$0xf]  ;;  %v6680_v49 = vor.u32 %v5258_v14, %v4447_v13 }
  0xc1   : > { %8822 = vst [vmem:[#allocation63_spill] sm:$0xff] %v6654_v34  ;;  %v5186_v22 = vld [vmem:[%s8529_s3 + $0x154] sm:$0xf0]  ;;  %v4303_v46 = vld [vmem:[%s8529_s3 + $0x268] sm:$0xf]  ;;  %v6690_v37 = vor.u32 %v5154_v60, %v4031_v28 }
  0xc2   : > { %1649 = vmatmul.bf16.vlgmr.msrb.gmra.mxu0 %v6511_v52  ;;  %8823 = vst [vmem:[#allocation64_spill] sm:$0xff] %v6676_v38  ;;  %1662 = vmatmul.bf16.vlgmr.msrb.gmra.mxu1 %v6522_v25  ;;  %v5222_v56 = vld [vmem:[%s8529_s3 + $0x274] sm:$0xf0]  ;;  %v6692_v62 = vor.u32 %v5186_v22, %v4159_v63  ;;  %v4431_v13 = vld [vmem:[%s8529_s3 + $0x368] sm:$0xf] }
  0xc3   : > { %1721 = vmatpush.bf16.msra.mxu2 %v6639_v48  ;;  %1734 = vmatpush.bf16.msra.mxu3 %v6643_v36  ;;  %8824 = vst [vmem:[#allocation65_spill] sm:$0xff] %v6680_v49  ;;  %v5254_v14 = vld [vmem:[%s8529_s3 + $0x374] sm:$0xf0]  ;;  %v4015_v36 = vld [vmem:[%s8529_s3 + $0x28] sm:$0xf]  ;;  %v6713_v63 = vor.u32 %v5222_v56, %v4303_v46 }
  0xc4   : > { %1697 = vmatpush.bf16.msra.mxu0 %v6652_v12  ;;  %1710 = vmatpush.bf16.msra.mxu1 %v6654_v34  ;;  %8825 = vst [vmem:[#allocation66_spill] sm:$0xff] %v6690_v37  ;;  %v5150_v34 = vld [vmem:[%s8529_s3 + $0x34] sm:$0xf0]  ;;  %v4143_v60 = vld [vmem:[%s8529_s3 + $0x128] sm:$0xf]  ;;  %v6716_v22 = vor.u32 %v5254_v14, %v4431_v13 }
  0xc5   : > { %8826 = vst [vmem:[#allocation67_spill] sm:$0xff] %v6692_v62  ;;  %v5182_v28 = vld [vmem:[%s8529_s3 + $0x134] sm:$0xf0]  ;;  %v4287_v12 = vld [vmem:[%s8529_s3 + $0x248] sm:$0xf]  ;;  %v6729_v56 = vor.u32 %v5150_v34, %v4015_v36 }
  0xc6   : > { %8827 = vst [vmem:[#allocation68_spill] sm:$0xff] %v6713_v63  ;;  %v5218_v48 = vld [vmem:[%s8529_s3 + $0x254] sm:$0xf0]  ;;  %v4415_v61 = vld [vmem:[%s8529_s3 + $0x348] sm:$0xf]  ;;  %v6731_v46 = vor.u32 %v5182_v28, %v4143_v60 }
  0xc7   : > { %1722 = vmatpush.bf16.msra.mxu2 %v6676_v38  ;;  %1735 = vmatpush.bf16.msra.mxu3 %v6680_v49  ;;  %8828 = vst [vmem:[#allocation69_spill] sm:$0xff] %v6716_v22  ;;  %v5250_v13 = vld [vmem:[%s8529_s3 + $0x354] sm:$0xf0]  ;;  %v3999_v14 = vld [vmem:[%s8529_s3 + $0x8] sm:$0xf]  ;;  %v6754_v28 = vor.u32 %v5218_v48, %v4287_v12 }
  0xc8   : > { %1698 = vmatpush.bf16.msra.mxu0 %v6690_v37  ;;  %1711 = vmatpush.bf16.msra.mxu1 %v6692_v62  ;;  %8829 = vst [vmem:[#allocation70_spill] sm:$0xff] %v6729_v56  ;;  %v5146_v49 = vld [vmem:[%s8529_s3 + $0x14] sm:$0xf0]  ;;  %v4127_v36 = vld [vmem:[%s8529_s3 + $0x108] sm:$0xf]  ;;  %v6766_v27 = vor.u32 %v5250_v13, %v4415_v61 }
  0xc9   : > { %8830 = vst [vmem:[#allocation71_spill] sm:$0xff] %v6731_v46  ;;  %v5178_v34 = vld [vmem:[%s8529_s3 + $0x114] sm:$0xf0]  ;;  %v5172_v60 = vld [vmem:[%s8529_s3 + $0xec] sm:$0xf] }
  0xca   : > { %1675 = vmatmul.bf16.vlgmr.msrb.gmra.mxu2 %v6564_v24  ;;  %1688 = vmatmul.bf16.vlgmr.msrb.gmra.mxu3 %v6580_v57  ;;  %8831 = vst [vmem:[#allocation72_spill] sm:$0xff] %v6754_v28  ;;  %v4113_v62 = vld [vmem:[%s8529_s3 + $0xf8] sm:$0xf0]  ;;  %v5204_v37 = vld [vmem:[%s8529_s3 + $0x1ec] sm:$0xf]  ;;  %v6778_v32 = vor.u32 %v5178_v34, %v4127_v36 }
  0xcb   : > { %1723 = vmatpush.bf16.msra.mxu2 %v6713_v63  ;;  %v4241_v38 = vld [vmem:[%s8529_s3 + $0x1f8] sm:$0xf0]  ;;  %1736 = vmatpush.bf16.msra.mxu3 %v6716_v22  ;;  %8832 = vst [vmem:[#allocation73_spill] sm:$0xff] %v6766_v27  ;;  %v4271_v12 = vld [vmem:[%s8529_s3 + $0x228] sm:$0xf]  ;;  %v6776_v63 = vor.u32 %v5146_v49, %v3999_v14  ;;  %v6786_v22 = vor.u32 %v5172_v60, %v4113_v62 }
  0xcc   : > { %v5214_v48 = vld [vmem:[%s8529_s3 + $0x234] sm:$0xf0]  ;;  %1699 = vmatpush.bf16.msra.mxu0 %v6729_v56  ;;  %1712 = vmatpush.bf16.msra.mxu1 %v6731_v46  ;;  %8834 = vst [vmem:[#allocation75_spill] sm:$0xff] %v6778_v32  ;;  %v4399_v61 = vld [vmem:[%s8529_s3 + $0x328] sm:$0xf]  ;;  %v6788_v41 = vor.u32 %v5204_v37, %v4241_v38 }
  0xcd   : > { %8833 = vst [vmem:[#allocation74_spill] sm:$0xff] %v6776_v63  ;;  %v5246_v13 = vld [vmem:[%s8529_s3 + $0x334] sm:$0xf0]  ;;  %v5168_v46 = vld [vmem:[%s8529_s3 + $0xcc] sm:$0xf]  ;;  %v6794_v49 = vor.u32 %v5214_v48, %v4271_v12 }
  0xce   : > { %8835 = vst [vmem:[#allocation76_spill] sm:$0xff] %v6786_v22  ;;  %v4097_v14 = vld [vmem:[%s8529_s3 + $0xd8] sm:$0xf0]  ;;  %v5200_v36 = vld [vmem:[%s8529_s3 + $0x1cc] sm:$0xf]  ;;  %v6806_v37 = vor.u32 %v5246_v13, %v4399_v61 }
  0xcf   : > { %8836 = vst [vmem:[#allocation77_spill] sm:$0xff] %v6788_v41  ;;  %1724 = vmatpush.bf16.msra.mxu2 %v6754_v28  ;;  %v4225_v38 = vld [vmem:[%s8529_s3 + $0x1d8] sm:$0xf0]  ;;  %1737 = vmatpush.bf16.msra.mxu3 %v6766_v27  ;;  %v4255_v62 = vld [vmem:[%s8529_s3 + $0x208] sm:$0xf]  ;;  %v6830_v13 = vor.u32 %v5168_v46, %v4097_v14 }
  0xd0   : > { %8837 = vst [vmem:[#allocation78_spill] sm:$0xff] %v6794_v49  ;;  %v5210_v34 = vld [vmem:[%s8529_s3 + $0x214] sm:$0xf0]  ;;  %v4383_v60 = vld [vmem:[%s8529_s3 + $0x308] sm:$0xf]  ;;  %1700 = vmatpush.bf16.msra.mxu0 %v6776_v63  ;;  %1713 = vmatpush.bf16.msra.mxu1 %v6778_v32  ;;  %v6832_v63 = vor.u32 %v5200_v36, %v4225_v38 }
  0xd1   : > { %8838 = vst [vmem:[#allocation79_spill] sm:$0xff] %v6806_v37  ;;  %v5242_v12 = vld [vmem:[%s8529_s3 + $0x314] sm:$0xf0]  ;;  %v5236_v48 = vld [vmem:[%s8529_s3 + $0x2ec] sm:$0xf] }
  0xd2   : > { %v4369_v61 = vld [vmem:[%s8529_s3 + $0x2f8] sm:$0xf0]  ;;  %8839 = vst [vmem:[#allocation80_spill] sm:$0xff] %v6830_v13  ;;  %v5268_v32 = vld [vmem:[%s8529_s3 + $0x3ec] sm:$0xf]  ;;  %v6857_v38 = vor.u32 %v5242_v12, %v4383_v60 }
  0xd3   : > { %8840 = vst [vmem:[#allocation81_spill] sm:$0xff] %v6832_v63  ;;  %v4497_v27 = vld [vmem:[%s8529_s3 + $0x3f8] sm:$0xf0]  ;;  %v5164_v28 = vld [vmem:[%s8529_s3 + $0xac] sm:$0xf]  ;;  %1725 = vmatpush.bf16.msra.mxu2 %v6794_v49  ;;  %1738 = vmatpush.bf16.msra.mxu3 %v6806_v37 }
  0xd4   : > { %1745 = vmatpush.bf16.msrb.mxu0 %v6786_v22  ;;  %1758 = vmatpush.bf16.msrb.mxu1 %v6788_v41  ;;  %v6844_v22 = vor.u32 %v5210_v34, %v4255_v62  ;;  %v4081_v46 = vld [vmem:[%s8529_s3 + $0xb8] sm:$0xf0]  ;;  %v5196_v14 = vld [vmem:[%s8529_s3 + $0x1ac] sm:$0xf]  ;;  %8842 = vst [vmem:[#allocation83_spill] sm:$0xff] %v6857_v38  ;;  %v6859_v62 = vor.u32 %v5236_v48, %v4369_v61 }
  0xd5   : > { %v4209_v36 = vld [vmem:[%s8529_s3 + $0x1b8] sm:$0xf0]  ;;  %1701 = vmatmul.bf16.vlgmr.msra.gmra.mxu0 %v6511_v52  ;;  %1714 = vmatmul.bf16.vlgmr.msra.gmra.mxu1 %v6522_v25  ;;  %v6862_v34 = vor.u32 %v5268_v32, %v4497_v27  ;;  %v5232_v49 = vld [vmem:[%s8529_s3 + $0x2cc] sm:$0xf]  ;;  %v6872_v60 = vor.u32 %v5164_v28, %v4081_v46 }
  0xd6   : > { %8841 = vst [vmem:[#allocation82_spill] sm:$0xff] %v6844_v22  ;;  %v4353_v41 = vld [vmem:[%s8529_s3 + $0x2d8] sm:$0xf0]  ;;  %v6874_v12 = vor.u32 %v5196_v14, %v4209_v36  ;;  %v5264_v32 = vld [vmem:[%s8529_s3 + $0x3cc] sm:$0xf] }
  0xd7   : > { %8843 = vst [vmem:[#allocation84_spill] sm:$0xff] %v6859_v62  ;;  %v4481_v27 = vld [vmem:[%s8529_s3 + $0x3d8] sm:$0xf0]  ;;  %v5160_v48 = vld [vmem:[%s8529_s3 + $0x8c] sm:$0xf]  ;;  %1726 = vmatpush.bf16.msra.mxu2 %v6844_v22  ;;  %1739 = vmatpush.bf16.msra.mxu3 %v6857_v38  ;;  %v6897_v14 = vor.u32 %v5232_v49, %v4353_v41 }
  0xd8   : > { %8844 = vst [vmem:[#allocation85_spill] sm:$0xff] %v6862_v34  ;;  %1746 = vmatpush.bf16.msrb.mxu0 %v6830_v13  ;;  %1759 = vmatpush.bf16.msrb.mxu1 %v6832_v63  ;;  %v4065_v28 = vld [vmem:[%s8529_s3 + $0x98] sm:$0xf0]  ;;  %v5192_v61 = vld [vmem:[%s8529_s3 + $0x18c] sm:$0xf]  ;;  %v6900_v36 = vor.u32 %v5264_v32, %v4481_v27 }
  0xd9   : > { %8845 = vst [vmem:[#allocation86_spill] sm:$0xff] %v6872_v60  ;;  %v4193_v46 = vld [vmem:[%s8529_s3 + $0x198] sm:$0xf0]  ;;  %v5228_v22 = vld [vmem:[%s8529_s3 + $0x2ac] sm:$0xf]  ;;  %v6910_v38 = vor.u32 %v5160_v48, %v4065_v28 }
  0xda   : > { %8846 = vst [vmem:[#allocation87_spill] sm:$0xff] %v6874_v12  ;;  %v4337_v63 = vld [vmem:[%s8529_s3 + $0x2b8] sm:$0xf0]  ;;  %v6912_v41 = vor.u32 %v5192_v61, %v4193_v46  ;;  %v5260_v49 = vld [vmem:[%s8529_s3 + $0x3ac] sm:$0xf]  ;;  %1727 = vmatmul.bf16.vlgmr.msra.gmra.mxu2 %v6564_v24  ;;  %1740 = vmatmul.bf16.vlgmr.msra.gmra.mxu3 %v6580_v57 }
  0xdb   : > { %1771 = vmatpush.bf16.msrb.mxu2 %v6859_v62  ;;  %8847 = vst [vmem:[#allocation88_spill] sm:$0xff] %v6897_v14  ;;  %1784 = vmatpush.bf16.msrb.mxu3 %v6862_v34  ;;  %v4465_v32 = vld [vmem:[%s8529_s3 + $0x3b8] sm:$0xf0]  ;;  %v5156_v27 = vld [vmem:[%s8529_s3 + $0x6c] sm:$0xf]  ;;  %v6935_v46 = vor.u32 %v5228_v22, %v4337_v63 }
  0xdc   : > { %8848 = vst [vmem:[#allocation89_spill] sm:$0xff] %v6900_v36  ;;  %1747 = vmatpush.bf16.msrb.mxu0 %v6872_v60  ;;  %1760 = vmatpush.bf16.msrb.mxu1 %v6874_v12  ;;  %v4049_v48 = vld [vmem:[%s8529_s3 + $0x78] sm:$0xf0]  ;;  %v5188_v28 = vld [vmem:[%s8529_s3 + $0x16c] sm:$0xf]  ;;  %v6938_v12 = vor.u32 %v5260_v49, %v4465_v32 }
  0xdd   : > { %8849 = vst [vmem:[#allocation90_spill] sm:$0xff] %v6910_v38  ;;  %v4177_v61 = vld [vmem:[%s8529_s3 + $0x178] sm:$0xf0]  ;;  %v5224_v60 = vld [vmem:[%s8529_s3 + $0x28c] sm:$0xf]  ;;  %v6948_v62 = vor.u32 %v5156_v27, %v4049_v48 }
  0xde   : > { %8850 = vst [vmem:[#allocation91_spill] sm:$0xff] %v6912_v41  ;;  %v4321_v34 = vld [vmem:[%s8529_s3 + $0x298] sm:$0xf0]  ;;  %v6950_v63 = vor.u32 %v5188_v28, %v4177_v61  ;;  %v5256_v22 = vld [vmem:[%s8529_s3 + $0x38c] sm:$0xf] }
  0xdf   : > { %1772 = vmatpush.bf16.msrb.mxu2 %v6897_v14  ;;  %8851 = vst [vmem:[#allocation92_spill] sm:$0xff] %v6935_v46  ;;  %1785 = vmatpush.bf16.msrb.mxu3 %v6900_v36  ;;  %v4449_v49 = vld [vmem:[%s8529_s3 + $0x398] sm:$0xf0]  ;;  %v5152_v32 = vld [vmem:[%s8529_s3 + $0x4c] sm:$0xf]  ;;  %v6971_v28 = vor.u32 %v5224_v60, %v4321_v34 }
  0xe0   : > { %8852 = vst [vmem:[#allocation93_spill] sm:$0xff] %v6938_v12  ;;  %1748 = vmatpush.bf16.msrb.mxu0 %v6910_v38  ;;  %1761 = vmatpush.bf16.msrb.mxu1 %v6912_v41  ;;  %v4033_v41 = vld [vmem:[%s8529_s3 + $0x58] sm:$0xf0]  ;;  %v5184_v27 = vld [vmem:[%s8529_s3 + $0x14c] sm:$0xf]  ;;  %v6974_v61 = vor.u32 %v5256_v22, %v4449_v49 }
  0xe1   : > { %8853 = vst [vmem:[#allocation94_spill] sm:$0xff] %v6948_v62  ;;  %v4161_v48 = vld [vmem:[%s8529_s3 + $0x158] sm:$0xf0]  ;;  %v5220_v38 = vld [vmem:[%s8529_s3 + $0x26c] sm:$0xf]  ;;  %v6984_v14 = vor.u32 %v5152_v32, %v4033_v41 }
  0xe2   : > { %8854 = vst [vmem:[#allocation95_spill] sm:$0xff] %v6950_v63  ;;  %v4305_v36 = vld [vmem:[%s8529_s3 + $0x278] sm:$0xf0]  ;;  %v6986_v34 = vor.u32 %v5184_v27, %v4161_v48  ;;  %v5252_v60 = vld [vmem:[%s8529_s3 + $0x36c] sm:$0xf] }
  0xe3   : > { %1773 = vmatpush.bf16.msrb.mxu2 %v6935_v46  ;;  %8855 = vst [vmem:[#allocation96_spill] sm:$0xff] %v6971_v28  ;;  %1786 = vmatpush.bf16.msrb.mxu3 %v6938_v12  ;;  %v4433_v22 = vld [vmem:[%s8529_s3 + $0x378] sm:$0xf0]  ;;  %v5148_v49 = vld [vmem:[%s8529_s3 + $0x2c] sm:$0xf]  ;;  %v7007_v27 = vor.u32 %v5220_v38, %v4305_v36 }
  0xe4   : > { %8856 = vst [vmem:[#allocation97_spill] sm:$0xff] %v6974_v61  ;;  %1749 = vmatpush.bf16.msrb.mxu0 %v6948_v62  ;;  %1762 = vmatpush.bf16.msrb.mxu1 %v6950_v63  ;;  %v4017_v63 = vld [vmem:[%s8529_s3 + $0x38] sm:$0xf0]  ;;  %v5180_v41 = vld [vmem:[%s8529_s3 + $0x12c] sm:$0xf]  ;;  %v7010_v48 = vor.u32 %v5252_v60, %v4433_v22 }
  0xe5   : > { %8857 = vst [vmem:[#allocation98_spill] sm:$0xff] %v6984_v14  ;;  %v4145_v32 = vld [vmem:[%s8529_s3 + $0x138] sm:$0xf0]  ;;  %v5216_v62 = vld [vmem:[%s8529_s3 + $0x24c] sm:$0xf]  ;;  %v7020_v46 = vor.u32 %v5148_v49, %v4017_v63 }
  0xe6   : > { %8858 = vst [vmem:[#allocation99_spill] sm:$0xff] %v6986_v34  ;;  %v4289_v12 = vld [vmem:[%s8529_s3 + $0x258] sm:$0xf0]  ;;  %v7022_v38 = vor.u32 %v5180_v41, %v4145_v32  ;;  %v5248_v36 = vld [vmem:[%s8529_s3 + $0x34c] sm:$0xf] }
  0xe7   : > { %1774 = vmatpush.bf16.msrb.mxu2 %v6971_v28  ;;  %8859 = vst [vmem:[#allocation100_spill] sm:$0xff] %v7007_v27  ;;  %1787 = vmatpush.bf16.msrb.mxu3 %v6974_v61  ;;  %v4417_v60 = vld [vmem:[%s8529_s3 + $0x358] sm:$0xf0]  ;;  %v5144_v22 = vld [vmem:[%s8529_s3 + $0xc] sm:$0xf]  ;;  %v7043_v41 = vor.u32 %v5216_v62, %v4289_v12 }
  0xe8   : > { %8860 = vst [vmem:[#allocation101_spill] sm:$0xff] %v7010_v48  ;;  %1750 = vmatpush.bf16.msrb.mxu0 %v6984_v14  ;;  %1763 = vmatpush.bf16.msrb.mxu1 %v6986_v34  ;;  %v4001_v34 = vld [vmem:[%s8529_s3 + $0x18] sm:$0xf0]  ;;  %v5176_v63 = vld [vmem:[%s8529_s3 + $0x10c] sm:$0xf]  ;;  %v7046_v32 = vor.u32 %v5248_v36, %v4417_v60 }
  0xe9   : > { %8861 = vst [vmem:[#allocation102_spill] sm:$0xff] %v7020_v46  ;;  %v4129_v49 = vld [vmem:[%s8529_s3 + $0x118] sm:$0xf0]  ;;  %v5212_v14 = vld [vmem:[%s8529_s3 + $0x22c] sm:$0xf]  ;;  %v7056_v28 = vor.u32 %v5144_v22, %v4001_v34 }
  0xea   : > { %8862 = vst [vmem:[#allocation103_spill] sm:$0xff] %v7022_v38  ;;  %v4273_v61 = vld [vmem:[%s8529_s3 + $0x238] sm:$0xf0]  ;;  %v7058_v62 = vor.u32 %v5176_v63, %v4129_v49  ;;  %v5244_v12 = vld [vmem:[%s8529_s3 + $0x32c] sm:$0xf] }
  0xeb   : > { %1775 = vmatpush.bf16.msrb.mxu2 %v7007_v27  ;;  %8863 = vst [vmem:[#allocation104_spill] sm:$0xff] %v7043_v41  ;;  %1788 = vmatpush.bf16.msrb.mxu3 %v7010_v48  ;;  %v4401_v36 = vld [vmem:[%s8529_s3 + $0x338] sm:$0xf0]  ;;  %v7067_v60 = vor.u32 %v5212_v14, %v4273_v61  ;;  %v5208_v34 = vld [vmem:[%s8529_s3 + $0x20c] sm:$0xf] }
  0xec   : > { %8864 = vst [vmem:[#allocation105_spill] sm:$0xff] %v7046_v32  ;;  %1751 = vmatpush.bf16.msrb.mxu0 %v7020_v46  ;;  %1764 = vmatpush.bf16.msrb.mxu1 %v7022_v38  ;;  %v7070_v46 = vor.u32 %v5244_v12, %v4401_v36  ;;  %v4257_v22 = vld [vmem:[%s8529_s3 + $0x218] sm:$0xf0]  ;;  %v5240_v14 = vld [vmem:[%s8529_s3 + $0x30c] sm:$0xf]  ;;  %v766_v12 = vpop.f32.mrf.mxu0  ;;  %v779_v36 = vpop.f32.mrf.mxu1 }
  0xed   : > { %8865 = vst [vmem:[#allocation106_spill] sm:$0xff] %v7056_v28  ;;  %v4385_v61 = vld [vmem:[%s8529_s3 + $0x318] sm:$0xf0]  ;;  %v7089_v63 = vor.u32 %v5208_v34, %v4257_v22 }
  0xee   : > { %8866 = vst [vmem:[#allocation107_spill] sm:$0xff] %v7058_v62  ;;  %v7093_v49 = vor.u32 %v5240_v14, %v4385_v61 }
  0xef   : > { %1776 = vmatpush.bf16.msrb.mxu2 %v7043_v41  ;;  %8867 = vst [vmem:[#allocation108_spill] sm:$0xff] %v7067_v60  ;;  %1789 = vmatpush.bf16.msrb.mxu3 %v7046_v32 }
  0xf0   : > { %8868 = vst [vmem:[#allocation109_spill] sm:$0xff] %v7070_v46  ;;  %1752 = vmatpush.bf16.msrb.mxu0 %v7056_v28  ;;  %1765 = vmatpush.bf16.msrb.mxu1 %v7058_v62 }
  0xf1   : > { %8869 = vst [vmem:[#allocation110_spill] sm:$0xff] %v7093_v49 }
  0xf3   : > { %1777 = vmatpush.bf16.msrb.mxu2 %v7067_v60  ;;  %1790 = vmatpush.bf16.msrb.mxu3 %v7070_v46 }
  0xf4   : > { %1804 = vmatpush.bf16.msra.mxu0 %v5921_v5  ;;  %1817 = vmatpush.bf16.msra.mxu1 %v5932_v9  ;;  %v768_v34 = vpop.f32.mrf.mxu0  ;;  %v781_v22 = vpop.f32.mrf.mxu1  ;;  %v8910_v9 = vld [vmem:[#allocation63_spill] sm:$0xff] }
  0xf5   : > { %1753 = vmatmul.bf16.vlgmr.msrb.gmra.mxu0 %v6511_v52  ;;  %1766 = vmatmul.bf16.vlgmr.msrb.gmra.mxu1 %v6522_v25  ;;  %v792_v52 = vpop.f32.mrf.mxu2  ;;  %v805_v25 = vpop.f32.mrf.mxu3 }
  0xf7   : > { %1778 = vmatpush.bf16.msrb.mxu2 %v7089_v63  ;;  %1791 = vmatpush.bf16.msrb.mxu3 %v7093_v49 }
  0xf8   : > { %1805 = vmatpush.bf16.msra.mxu0 %v5952_v18  ;;  %1818 = vmatpush.bf16.msra.mxu1 %v5966_v23  ;;  %v8909_v23 = vld [vmem:[#allocation62_spill] sm:$0xff] }
  0xfa   : > { %1779 = vmatmul.bf16.vlgmr.msrb.gmra.mxu2 %v6564_v24  ;;  %1792 = vmatmul.bf16.vlgmr.msrb.gmra.mxu3 %v6580_v57  ;;  %v373_v24 = vperm.slane %v6492_v0, 4  ;;  %v374_v57 = vperm.slane %v6492_v0, 5 }
  0xfb   : > { %1830 = vmatpush.bf16.msra.mxu2 %v5949_v17  ;;  %1843 = vmatpush.bf16.msra.mxu3 %v5954_v19 }
  0xfc   : > { %1806 = vmatpush.bf16.msra.mxu0 %v5989_v30  ;;  %1819 = vmatpush.bf16.msra.mxu1 %v6003_v35  ;;  %v767_v34 = vadd.f32 %v766_v12, %v373_v24  ;;  %v780_v22 = vadd.f32 %v779_v36, %v374_v57  ;;  %v8904_v35 = vld [vmem:[#allocation57_spill] sm:$0xff] }
  0xfd   : > { %v794_v14 = vpop.f32.mrf.mxu2  ;;  %v807_v61 = vpop.f32.mrf.mxu3 }
  0xfe   : > { %v814_v14 = vmax.f32 %v780_v22, 0.0  ;;  %v8872_v61 = vld [vmem:[#allocation24_spill] sm:$0xff]  ;;  %v8874_v22 = vld [vmem:[#allocation29_spill] sm:$0xff] }
  0xff   : > { %1831 = vmatpush.bf16.msra.mxu2 %v5985_v29  ;;  %1844 = vmatpush.bf16.msra.mxu3 %v5991_v31  ;;  %v8908_v31 = vld [vmem:[#allocation61_spill] sm:$0xff] }
 0x100   : > { %1807 = vmatpush.bf16.msra.mxu0 %v6028_v43  ;;  %1820 = vmatpush.bf16.msra.mxu1 %v6042_v47  ;;  %v375_v47 = vperm.slane %v6492_v0, 6  ;;  %v7131_v57 = vpack.c.bf16 %v814_v14, %v814_v14  ;;  %v8875_v14 = vld [vmem:[#allocation26_spill] sm:$0xff] }
 0x102   : > { %v793_v12 = vadd.f32 %v792_v52, %v375_v47  ;;  %v8870_v52 = vld [vmem:[#allocation25_spill] sm:$0xff] }
 0x103   : > { %1832 = vmatpush.bf16.msra.mxu2 %v6024_v42  ;;  %1845 = vmatpush.bf16.msra.mxu3 %v6030_v44  ;;  %v376_v44 = vperm.slane %v6492_v0, 7 }
 0x104   : > { %1808 = vmatpush.bf16.msra.mxu0 %v6064_v54  ;;  %1821 = vmatpush.bf16.msra.mxu1 %v6078_v59  ;;  %v813_v59 = vmax.f32 %v767_v34, 0.0  ;;  %v815_v0 = vmax.f32 %v793_v12, 0.0  ;;  %v8873_v34 = vld [vmem:[#allocation27_spill] sm:$0xff]  ;;  %v8876_v12 = vld [vmem:[#allocation28_spill] sm:$0xff] }
 0x105   : > { %v806_v36 = vadd.f32 %v805_v25, %v376_v44  ;;  %v8871_v25 = vld [vmem:[#allocation23_spill] sm:$0xff] }
 0x106   : > { %v7128_v24 = vpack.c.bf16 %v813_v59, %v813_v59  ;;  %v7141_v44 = vpack.c.bf16 %v815_v0, %v815_v0  ;;  %v8878_v0 = vld [vmem:[#allocation33_spill] sm:$0xff] }
 0x107   : > { %1833 = vmatpush.bf16.msra.mxu2 %v6060_v53  ;;  %1846 = vmatpush.bf16.msra.mxu3 %v6066_v55  ;;  %v816_v47 = vmax.f32 %v806_v36, 0.0  ;;  %v8877_v36 = vld [vmem:[#allocation31_spill] sm:$0xff] }
 0x108   : > { %1809 = vmatpush.bf16.msra.mxu0 %v6103_v3  ;;  %1822 = vmatpush.bf16.msra.mxu1 %v6114_v8  ;;  %v8898_v8 = vld [vmem:[#allocation47_spill] sm:$0xff] }
 0x109   : > { %v7145_v59 = vpack.c.bf16 %v816_v47, %v816_v47  ;;  %v8879_v47 = vld [vmem:[#allocation30_spill] sm:$0xff]  ;;  %v8902_v55 = vld [vmem:[#allocation55_spill] sm:$0xff] }
 0x10b   : > { %1834 = vmatpush.bf16.msra.mxu2 %v6096_v1  ;;  %1847 = vmatpush.bf16.msra.mxu3 %v6105_v4 }
 0x10c   : > { %1810 = vmatpush.bf16.msra.mxu0 %v6139_v20  ;;  %1823 = vmatpush.bf16.msra.mxu1 %v6153_v26  ;;  %v8892_v26 = vld [vmem:[#allocation49_spill] sm:$0xff] }
 0x10f   : > { %1835 = vmatpush.bf16.msra.mxu2 %v6132_v15  ;;  %1848 = vmatpush.bf16.msra.mxu3 %v6141_v21  ;;  %v8894_v21 = vld [vmem:[#allocation45_spill] sm:$0xff] }
 0x110   : > { %1811 = vmatpush.bf16.msra.mxu0 %v6184_v40  ;;  %1824 = vmatpush.bf16.msra.mxu1 %v6201_v50  ;;  %v8888_v50 = vld [vmem:[#allocation41_spill] sm:$0xff] }
 0x113   : > { %1836 = vmatpush.bf16.msra.mxu2 %v6180_v39  ;;  %1849 = vmatpush.bf16.msra.mxu3 %v6186_v45  ;;  %v8890_v45 = vld [vmem:[#allocation43_spill] sm:$0xff] }
 0x114   : > { %1856 = vmatpush.bf16.msrb.mxu0 %v6203_v51  ;;  %1869 = vmatpush.bf16.msrb.mxu1 %v6214_v58  ;;  %v8884_v58 = vld [vmem:[#allocation37_spill] sm:$0xff] }
 0x115   : > { %1812 = vmatmul.bf16.vlgmr.msra.gmra.mxu0 %v7128_v24  ;;  %1825 = vmatmul.bf16.vlgmr.msra.gmra.mxu1 %v7131_v57 }
 0x117   : > { %1837 = vmatpush.bf16.msra.mxu2 %v6232_v2  ;;  %1850 = vmatpush.bf16.msra.mxu3 %v6236_v6  ;;  %v8886_v6 = vld [vmem:[#allocation39_spill] sm:$0xff] }
 0x118   : > { %1857 = vmatpush.bf16.msrb.mxu0 %v6242_v10  ;;  %1870 = vmatpush.bf16.msrb.mxu1 %v6256_v16  ;;  %v8881_v16 = vld [vmem:[#allocation34_spill] sm:$0xff] }
 0x11a   : > { %1838 = vmatmul.bf16.vlgmr.msra.gmra.mxu2 %v7141_v44  ;;  %1851 = vmatmul.bf16.vlgmr.msra.gmra.mxu3 %v7145_v59 }
 0x11b   : > { %1882 = vmatpush.bf16.msrb.mxu2 %v6238_v7  ;;  %1895 = vmatpush.bf16.msrb.mxu3 %v6244_v11  ;;  %v8882_v11 = vld [vmem:[#allocation35_spill] sm:$0xff] }
 0x11c   : > { %1858 = vmatpush.bf16.msrb.mxu0 %v6280_v33  ;;  %1871 = vmatpush.bf16.msrb.mxu1 %v8870_v52  ;;  %v8880_v52 = vld [vmem:[#allocation32_spill] sm:$0xff] }
 0x11f   : > { %1883 = vmatpush.bf16.msrb.mxu2 %v8871_v25  ;;  %1896 = vmatpush.bf16.msrb.mxu3 %v8872_v61  ;;  %v8883_v61 = vld [vmem:[#allocation36_spill] sm:$0xff] }
 0x120   : > { %1859 = vmatpush.bf16.msrb.mxu0 %v8873_v34  ;;  %1872 = vmatpush.bf16.msrb.mxu1 %v8874_v22  ;;  %v8885_v22 = vld [vmem:[#allocation38_spill] sm:$0xff] }
 0x123   : > { %1884 = vmatpush.bf16.msrb.mxu2 %v8875_v14  ;;  %1897 = vmatpush.bf16.msrb.mxu3 %v8876_v12  ;;  %v8887_v12 = vld [vmem:[#allocation40_spill] sm:$0xff] }
 0x124   : > { %1860 = vmatpush.bf16.msrb.mxu0 %v8877_v36  ;;  %1873 = vmatpush.bf16.msrb.mxu1 %v8878_v0  ;;  %v8889_v0 = vld [vmem:[#allocation42_spill] sm:$0xff] }
 0x127   : > { %1885 = vmatpush.bf16.msrb.mxu2 %v8879_v47  ;;  %1898 = vmatpush.bf16.msrb.mxu3 %v8880_v52  ;;  %v8891_v52 = vld [vmem:[#allocation48_spill] sm:$0xff] }
 0x128   : > { %1861 = vmatpush.bf16.msrb.mxu0 %v8881_v16  ;;  %1874 = vmatpush.bf16.msrb.mxu1 %v8882_v11  ;;  %v8893_v11 = vld [vmem:[#allocation44_spill] sm:$0xff] }
 0x12b   : > { %1886 = vmatpush.bf16.msrb.mxu2 %v8883_v61  ;;  %1899 = vmatpush.bf16.msrb.mxu3 %v8884_v58  ;;  %v8896_v58 = vld [vmem:[#allocation51_spill] sm:$0xff]  ;;  %v8942_v61 = vld [vmem:[#allocation98_spill] sm:$0xff] }
 0x12c   : > { %1862 = vmatpush.bf16.msrb.mxu0 %v8885_v22  ;;  %1875 = vmatpush.bf16.msrb.mxu1 %v8886_v6  ;;  %v8895_v6 = vld [vmem:[#allocation50_spill] sm:$0xff] }
 0x12f   : > { %1887 = vmatpush.bf16.msrb.mxu2 %v8887_v12  ;;  %1900 = vmatpush.bf16.msrb.mxu3 %v8888_v50  ;;  %v8897_v50 = vld [vmem:[#allocation46_spill] sm:$0xff]  ;;  %v1611_v4 = vpop.f32.mrf.mxu1 }
 0x130   : > { %1863 = vmatpush.bf16.msrb.mxu0 %v8889_v0  ;;  %1876 = vmatpush.bf16.msrb.mxu1 %v8890_v45  ;;  %v8899_v45 = vld [vmem:[#allocation52_spill] sm:$0xff] }
 0x133   : > { %1888 = vmatpush.bf16.msrb.mxu2 %v8893_v11  ;;  %1901 = vmatpush.bf16.msrb.mxu3 %v8894_v21  ;;  %v8901_v21 = vld [vmem:[#allocation54_spill] sm:$0xff] }
 0x134   : > { %1908 = vmatpush.bf16.msra.mxu0 %v8891_v52  ;;  %1921 = vmatpush.bf16.msra.mxu1 %v8892_v26  ;;  %v8900_v52 = vld [vmem:[#allocation53_spill] sm:$0xff]  ;;  %v1598_v26 = vpop.f32.mrf.mxu0  ;;  %v8938_v11 = vld [vmem:[#allocation94_spill] sm:$0xff] }
 0x135   : > { %1864 = vmatmul.bf16.vlgmr.msrb.gmra.mxu0 %v7128_v24  ;;  %1877 = vmatmul.bf16.vlgmr.msrb.gmra.mxu1 %v7131_v57 }
 0x137   : > { %1889 = vmatpush.bf16.msrb.mxu2 %v8897_v50  ;;  %1902 = vmatpush.bf16.msrb.mxu3 %v8898_v8  ;;  %v8905_v8 = vld [vmem:[#allocation58_spill] sm:$0xff]  ;;  %v1613_v19 = vpop.f32.mrf.mxu1 }
 0x138   : > { %1909 = vmatpush.bf16.msra.mxu0 %v8895_v6  ;;  %1922 = vmatpush.bf16.msra.mxu1 %v8896_v58  ;;  %v7190_v6 = vadd.f32 %v1611_v4, %v1598_v26  ;;  %v8903_v58 = vld [vmem:[#allocation56_spill] sm:$0xff]  ;;  %v8912_v26 = vld [vmem:[#allocation65_spill] sm:$0xff]  ;;  %v8924_v50 = vld [vmem:[#allocation78_spill] sm:$0xff] }
 0x139   : > { %v8911_v4 = vld [vmem:[#allocation64_spill] sm:$0xff] }
 0x13a   : > { %1890 = vmatmul.bf16.vlgmr.msrb.gmra.mxu2 %v7141_v44  ;;  %1903 = vmatmul.bf16.vlgmr.msrb.gmra.mxu3 %v7145_v59 }
 0x13b   : > { %1934 = vmatpush.bf16.msra.mxu2 %v8899_v45  ;;  %1947 = vmatpush.bf16.msra.mxu3 %v8900_v52  ;;  %v8906_v45 = vld [vmem:[#allocation59_spill] sm:$0xff]  ;;  %v8907_v52 = vld [vmem:[#allocation60_spill] sm:$0xff] }
 0x13c   : > { %1910 = vmatpush.bf16.msra.mxu0 %v8901_v21  ;;  %1923 = vmatpush.bf16.msra.mxu1 %v8902_v55  ;;  %v1600_v21 = vpop.f32.mrf.mxu0  ;;  %v8914_v55 = vld [vmem:[#allocation67_spill] sm:$0xff] }
 0x13d   : > { %v8916_v21 = vld [vmem:[#allocation69_spill] sm:$0xff] }
 0x13f   : > { %1935 = vmatpush.bf16.msra.mxu2 %v8903_v58  ;;  %1948 = vmatpush.bf16.msra.mxu3 %v8904_v35  ;;  %v8913_v58 = vld [vmem:[#allocation66_spill] sm:$0xff]  ;;  %v7203_v35 = vpop.f32.mrf.mxu2  ;;  %v7213_v19 = vpop.f32.mrf.mxu1 }
 0x140   : > { %1911 = vmatpush.bf16.msra.mxu0 %v8905_v8  ;;  %1924 = vmatpush.bf16.msra.mxu1 %v8906_v45  ;;  %v7206_v45 = vpop.f32.mrf.mxu3  ;;  %v8922_v8 = vld [vmem:[#allocation76_spill] sm:$0xff] }
 0x143   : > { %1936 = vmatpush.bf16.msra.mxu2 %v8907_v52  ;;  %1949 = vmatpush.bf16.msra.mxu3 %v8908_v31  ;;  %v8915_v52 = vld [vmem:[#allocation68_spill] sm:$0xff] }
 0x144   : > { %1912 = vmatpush.bf16.msra.mxu0 %v8909_v23  ;;  %1925 = vmatpush.bf16.msra.mxu1 %v8910_v9  ;;  %v7210_v31 = vpop.f32.mrf.mxu0  ;;  %v8919_v9 = vld [vmem:[#allocation73_spill] sm:$0xff]  ;;  %v8921_v23 = vld [vmem:[#allocation75_spill] sm:$0xff] }
 0x147   : > { %1937 = vmatpush.bf16.msra.mxu2 %v8911_v4  ;;  %1950 = vmatpush.bf16.msra.mxu3 %v8912_v26  ;;  %v8917_v4 = vld [vmem:[#allocation71_spill] sm:$0xff]  ;;  %v8918_v26 = vld [vmem:[#allocation72_spill] sm:$0xff] }
 0x148   : > { %1913 = vmatpush.bf16.msra.mxu0 %v8913_v58  ;;  %1926 = vmatpush.bf16.msra.mxu1 %v8914_v55  ;;  %v8920_v58 = vld [vmem:[#allocation74_spill] sm:$0xff]  ;;  %v1626_v55 = vpop.f32.mrf.mxu2 }
 0x149   : > { %v8925_v55 = vld [vmem:[#allocation81_spill] sm:$0xff] }
 0x14b   : > { %1938 = vmatpush.bf16.msra.mxu2 %v8915_v52  ;;  %1951 = vmatpush.bf16.msra.mxu3 %v8916_v21  ;;  %v1639_v52 = vpop.f32.mrf.mxu3  ;;  %v8923_v21 = vld [vmem:[#allocation77_spill] sm:$0xff] }
 0x14c   : > { %1914 = vmatpush.bf16.msra.mxu0 %v6729_v56  ;;  %1927 = vmatpush.bf16.msra.mxu1 %v8917_v4  ;;  %v1652_v4 = vpop.f32.mrf.mxu0  ;;  %v8927_v52 = vld [vmem:[#allocation83_spill] sm:$0xff] }
 0x14d   : > { %v8930_v4 = vld [vmem:[#allocation86_spill] sm:$0xff] }
 0x14f   : > { %1939 = vmatpush.bf16.msra.mxu2 %v8918_v26  ;;  %1952 = vmatpush.bf16.msra.mxu3 %v8919_v9  ;;  %v1665_v9 = vpop.f32.mrf.mxu1  ;;  %v8926_v26 = vld [vmem:[#allocation82_spill] sm:$0xff] }
 0x150   : > { %1915 = vmatpush.bf16.msra.mxu0 %v8920_v58  ;;  %1928 = vmatpush.bf16.msra.mxu1 %v8921_v23  ;;  %v8928_v23 = vld [vmem:[#allocation84_spill] sm:$0xff]  ;;  %v8931_v9 = vld [vmem:[#allocation87_spill] sm:$0xff]  ;;  %v8937_v58 = vld [vmem:[#allocation93_spill] sm:$0xff] }
 0x153   : > { %1940 = vmatpush.bf16.msra.mxu2 %v8924_v50  ;;  %1953 = vmatpush.bf16.msra.mxu3 %v6806_v37  ;;  %v7232_v50 = vpop.f32.mrf.mxu2  ;;  %v7234_v37 = vpop.f32.mrf.mxu3 }
 0x154   : > { %1960 = vmatpush.bf16.msrb.mxu0 %v8922_v8  ;;  %1973 = vmatpush.bf16.msrb.mxu1 %v8923_v21  ;;  %v8929_v21 = vld [vmem:[#allocation85_spill] sm:$0xff]  ;;  %v8936_v8 = vld [vmem:[#allocation92_spill] sm:$0xff] }
 0x155   : > { %1916 = vmatmul.bf16.vlgmr.msra.gmra.mxu0 %v7128_v24  ;;  %1929 = vmatmul.bf16.vlgmr.msra.gmra.mxu1 %v7131_v57 }
 0x157   : > { %1941 = vmatpush.bf16.msra.mxu2 %v8926_v26  ;;  %1954 = vmatpush.bf16.msra.mxu3 %v8927_v52  ;;  %v8933_v26 = vld [vmem:[#allocation89_spill] sm:$0xff]  ;;  %v7242_v52 = vpop.f32.mrf.mxu0 }
 0x158   : > { %1961 = vmatpush.bf16.msrb.mxu0 %v6830_v13  ;;  %1974 = vmatpush.bf16.msrb.mxu1 %v8925_v55  ;;  %v8932_v55 = vld [vmem:[#allocation88_spill] sm:$0xff]  ;;  %v8935_v13 = vld [vmem:[#allocation91_spill] sm:$0xff] }
 0x15a   : > { %1942 = vmatmul.bf16.vlgmr.msra.gmra.mxu2 %v7141_v44  ;;  %1955 = vmatmul.bf16.vlgmr.msra.gmra.mxu3 %v7145_v59 }
 0x15b   : > { %1986 = vmatpush.bf16.msrb.mxu2 %v8928_v23  ;;  %1999 = vmatpush.bf16.msrb.mxu3 %v8929_v21  ;;  %v7244_v23 = vpop.f32.mrf.mxu1  ;;  %v8934_v21 = vld [vmem:[#allocation90_spill] sm:$0xff]  ;;  %v1691_v56 = vpop.f32.mrf.mxu3 }
 0x15c   : > { %1962 = vmatpush.bf16.msrb.mxu0 %v8930_v4  ;;  %1975 = vmatpush.bf16.msrb.mxu1 %v8931_v9  ;;  %v1678_v4 = vpop.f32.mrf.mxu2  ;;  %v8939_v9 = vld [vmem:[#allocation95_spill] sm:$0xff]  ;;  %v4727_v56 = vld [vmem:[%s8530_s4 + $0x1c0] sm:$0xf] }
 0x15d   : > { %v5331_v4 = vld [vmem:[%s8530_s4 + $0x1dc] sm:$0xf0] }
 0x15f   : > { %1987 = vmatpush.bf16.msrb.mxu2 %v8932_v55  ;;  %2000 = vmatpush.bf16.msrb.mxu3 %v8933_v26  ;;  %v8940_v55 = vld [vmem:[#allocation96_spill] sm:$0xff]  ;;  %v8941_v26 = vld [vmem:[#allocation97_spill] sm:$0xff]  ;;  %v1704_v12 = vpop.f32.mrf.mxu0 }
 0x160   : > { %1963 = vmatpush.bf16.msrb.mxu0 %v8934_v21  ;;  %1976 = vmatpush.bf16.msrb.mxu1 %v8935_v13  ;;  %v8943_v21 = vld [vmem:[#allocation99_spill] sm:$0xff] }
 0x163   : > { %1988 = vmatpush.bf16.msrb.mxu2 %v8936_v8  ;;  %2001 = vmatpush.bf16.msrb.mxu3 %v8937_v58  ;;  %v1717_v0 = vpop.f32.mrf.mxu1  ;;  %v7266_v12 = vpop.f32.mrf.mxu3 }
 0x164   : > { %1964 = vmatpush.bf16.msrb.mxu0 %v8938_v11  ;;  %1977 = vmatpush.bf16.msrb.mxu1 %v8939_v9  ;;  %v7264_v58 = vpop.f32.mrf.mxu2  ;;  %v8944_v0 = vld [vmem:[#allocation102_spill] sm:$0xff] }
 0x167   : > { %1989 = vmatpush.bf16.msrb.mxu2 %v8940_v55  ;;  %2002 = vmatpush.bf16.msrb.mxu3 %v8941_v26  ;;  %v4728_v26 = vor.u32 %v5331_v4, %v4727_v56  ;;  %v5323_v55 = vld [vmem:[%s8530_s4 + $0x19c] sm:$0xf0]  ;;  %v4729_v56 = vld [vmem:[%s8530_s4 + $0x1e0] sm:$0xf0] }
 0x168   : > { %1965 = vmatpush.bf16.msrb.mxu0 %v8942_v61  ;;  %1978 = vmatpush.bf16.msrb.mxu1 %v8943_v21 }
 0x16b   : > { %1990 = vmatpush.bf16.msrb.mxu2 %v7007_v27  ;;  %2003 = vmatpush.bf16.msrb.mxu3 %v7010_v48  ;;  %v4695_v27 = vld [vmem:[%s8530_s4 + $0x180] sm:$0xf]  ;;  %v5327_v48 = vld [vmem:[%s8530_s4 + $0x1c4] sm:$0xf] }
 0x16c   : > { %1966 = vmatpush.bf16.msrb.mxu0 %v8944_v0  ;;  %1979 = vmatpush.bf16.msrb.mxu1 %v7022_v38  ;;  %v4696_v4 = vor.u32 %v5323_v55, %v4695_v27  ;;  %v4732_v38 = vor.u32 %v5327_v48, %v4729_v56  ;;  %v5319_v27 = vld [vmem:[%s8530_s4 + $0x184] sm:$0xf]  ;;  %v4631_v48 = vld [vmem:[%s8530_s4 + $0x100] sm:$0xf] }
 0x16d   : > { %v4697_v55 = vld [vmem:[%s8530_s4 + $0x1a0] sm:$0xf0]  ;;  %v4599_v56 = vld [vmem:[%s8530_s4 + $0xc0] sm:$0xf] }
 0x16f   : > { %1991 = vmatpush.bf16.msrb.mxu2 %v7043_v41  ;;  %2004 = vmatpush.bf16.msrb.mxu3 %v7046_v32  ;;  %v4663_v32 = vld [vmem:[%s8530_s4 + $0x140] sm:$0xf] }
 0x170   : > { %1967 = vmatpush.bf16.msrb.mxu0 %v7056_v28  ;;  %1980 = vmatpush.bf16.msrb.mxu1 %v7058_v62  ;;  %v5315_v41 = vld [vmem:[%s8530_s4 + $0x15c] sm:$0xf0]  ;;  %v1730_v62 = vpop.f32.mrf.mxu2 }
 0x171   : > { %v5307_v62 = vld [vmem:[%s8530_s4 + $0x11c] sm:$0xf0] }
 0x173   : > { %1992 = vmatpush.bf16.msrb.mxu2 %v7067_v60  ;;  %2005 = vmatpush.bf16.msrb.mxu3 %v7070_v46  ;;  %v4664_v60 = vor.u32 %v5315_v41, %v4663_v32  ;;  %v4665_v41 = vld [vmem:[%s8530_s4 + $0x160] sm:$0xf0]  ;;  %v4632_v32 = vor.u32 %v5307_v62, %v4631_v48  ;;  %v5291_v48 = vld [vmem:[%s8530_s4 + $0x9c] sm:$0xf0] }
 0x174   : > { %2803 = vmatpush.bf16.msra.mxu0 %v4728_v26  ;;  %1981 = vmatmul.bf16.vlgmr.msrb.gmra.mxu1 %v7131_v57  ;;  %v1743_v26 = vpop.f32.mrf.mxu3  ;;  %v5311_v57 = vld [vmem:[%s8530_s4 + $0x144] sm:$0xf] }
 0x175   : > { %1968 = vmatmul.bf16.vlgmr.msrb.gmra.mxu0 %v7128_v24  ;;  %v4700_v24 = vor.u32 %v5319_v27, %v4697_v55  ;;  %v1754_v26 = vpop.f32.mrf.mxu0  ;;  %v5303_v27 = vld [vmem:[%s8530_s4 + $0x104] sm:$0xf]  ;;  %v4567_v55 = vld [vmem:[%s8530_s4 + $0x80] sm:$0xf] }
 0x177   : > { %1993 = vmatpush.bf16.msrb.mxu2 %v7089_v63  ;;  %2006 = vmatpush.bf16.msrb.mxu3 %v7093_v49 }
 0x178   : > { %2804 = vmatpush.bf16.msra.mxu0 %v4696_v4  ;;  %v4668_v4 = vor.u32 %v5311_v57, %v4665_v41  ;;  %v4601_v57 = vld [vmem:[%s8530_s4 + $0xe0] sm:$0xf0]  ;;  %v4568_v41 = vor.u32 %v5291_v48, %v4567_v55  ;;  %v1716_v48 = vadd.f32 %v7244_v23, %v7242_v52  ;;  %v4735_v23 = vld [vmem:[%s8530_s4 + $0x1c8] sm:$0xf] }
 0x17a   : > { %1994 = vmatmul.bf16.vlgmr.msrb.gmra.mxu2 %v7141_v44  ;;  %2007 = vmatmul.bf16.vlgmr.msrb.gmra.mxu3 %v7145_v59  ;;  %v1767_v44 = vpop.f32.mrf.mxu1 }
 0x17b   : > { %2829 = vmatpush.bf16.msra.mxu2 %v4732_v38  ;;  %v5299_v38 = vld [vmem:[%s8530_s4 + $0xdc] sm:$0xf0] }
 0x17c   : > { %2805 = vmatpush.bf16.msra.mxu0 %v4664_v60  ;;  %v4633_v60 = vld [vmem:[%s8530_s4 + $0x120] sm:$0xf0]  ;;  %v4600_v59 = vor.u32 %v5299_v38, %v4599_v56  ;;  %v5283_v56 = vld [vmem:[%s8530_s4 + $0x5c] sm:$0xf0]  ;;  %v1664_v38 = vadd.f32 %v7213_v19, %v7210_v31 }
 0x17d   : > { %v4636_v62 = vor.u32 %v5303_v27, %v4633_v60  ;;  %v1756_v27 = vpop.f32.mrf.mxu0  ;;  %v5287_v60 = vld [vmem:[%s8530_s4 + $0x84] sm:$0xf]  ;;  %v4503_v31 = vld [vmem:[%s8530_s4] sm:$0xf]  ;;  %v1780_v52 = vpop.f32.mrf.mxu2 }
 0x17e   : > { %v1677_v55 = vadd.f32 %v7232_v50, %v1664_v38  ;;  %v5275_v19 = vld [vmem:[%s8530_s4 + $0x1c] sm:$0xf0]  ;;  %v1768_v50 = vadd.f32 %v1767_v44, %v1754_v26  ;;  %v1793_v26 = vpop.f32.mrf.mxu3 }
 0x17f   : > { %2830 = vmatpush.bf16.msra.mxu2 %v4700_v24  ;;  %v5295_v24 = vld [vmem:[%s8530_s4 + $0xc4] sm:$0xf]  ;;  %v4504_v44 = vor.u32 %v5275_v19, %v4503_v31 }
 0x180   : > { %2806 = vmatpush.bf16.msra.mxu0 %v4632_v32  ;;  %v4535_v32 = vld [vmem:[%s8530_s4 + $0x40] sm:$0xf] }
 0x181   : > { %v4536_v46 = vor.u32 %v5283_v56, %v4535_v32 }
 0x182   : > { %v1769_v49 = vpop.f32.mrf.mxu1 }
 0x183   : > { %2831 = vmatpush.bf16.msra.mxu2 %v4668_v4  ;;  %v4604_v4 = vor.u32 %v5295_v24, %v4601_v57  ;;  %v1729_v24 = vadd.f32 %v7264_v58, %v1716_v48  ;;  %v5332_v49 = vld [vmem:[%s8530_s4 + $0x1e4] sm:$0xf0]  ;;  %v1690_v58 = vadd.f32 %v7234_v37, %v1677_v55  ;;  %v5328_v55 = vld [vmem:[%s8530_s4 + $0x1cc] sm:$0xf] }
 0x184   : > { %2807 = vmatpush.bf16.msra.mxu0 %v4600_v59  ;;  %v4569_v59 = vld [vmem:[%s8530_s4 + $0xa0] sm:$0xf0]  ;;  %v4736_v32 = vor.u32 %v5332_v49, %v4735_v23  ;;  %v5324_v37 = vld [vmem:[%s8530_s4 + $0x1a4] sm:$0xf0]  ;;  %v4737_v48 = vld [vmem:[%s8530_s4 + $0x1e8] sm:$0xf0] }
 0x185   : > { %v4572_v57 = vor.u32 %v5287_v60, %v4569_v59  ;;  %v1742_v38 = vadd.f32 %v7266_v12, %v1729_v24  ;;  %v4703_v60 = vld [vmem:[%s8530_s4 + $0x188] sm:$0xf]  ;;  %v4740_v23 = vor.u32 %v5328_v55, %v4737_v48 }
 0x186   : > { %v4704_v31 = vor.u32 %v5324_v37, %v4703_v60  ;;  %v4671_v24 = vld [vmem:[%s8530_s4 + $0x148] sm:$0xf]  ;;  %v5304_v37 = vld [vmem:[%s8530_s4 + $0x10c] sm:$0xf] }
 0x187   : > { %2832 = vmatpush.bf16.msra.mxu2 %v4636_v62  ;;  %v1625_v62 = vadd.f32 %v7203_v35, %v7190_v6  ;;  %v4537_v35 = vld [vmem:[%s8530_s4 + $0x60] sm:$0xf0]  ;;  %v1781_v6 = vadd.f32 %v1780_v52, %v1768_v50  ;;  %v5316_v50 = vld [vmem:[%s8530_s4 + $0x164] sm:$0xf0]  ;;  %v1795_v52 = vpop.f32.mrf.mxu3 }
 0x188   : > { %2808 = vmatpush.bf16.msra.mxu0 %v4568_v41  ;;  %v5279_v41 = vld [vmem:[%s8530_s4 + $0x44] sm:$0xf]  ;;  %v4575_v55 = vld [vmem:[%s8530_s4 + $0x88] sm:$0xf] }
 0x189   : > { %v1638_v56 = vadd.f32 %v7206_v45, %v1625_v62  ;;  %v4540_v27 = vor.u32 %v5279_v41, %v4537_v35  ;;  %v4505_v45 = vld [vmem:[%s8530_s4 + $0x20] sm:$0xf0]  ;;  %v5320_v41 = vld [vmem:[%s8530_s4 + $0x18c] sm:$0xf]  ;;  %v5292_v48 = vld [vmem:[%s8530_s4 + $0xa4] sm:$0xf0] }
 0x18a   : > { %v4705_v35 = vld [vmem:[%s8530_s4 + $0x1a8] sm:$0xf0] }
 0x18b   : > { %2833 = vmatpush.bf16.msra.mxu2 %v4604_v4  ;;  %v1794_v4 = vadd.f32 %v1793_v26, %v1781_v6  ;;  %v1797_v12 = vmax.f32 %v1638_v56, %v1690_v58  ;;  %v4672_v58 = vor.u32 %v5316_v50, %v4671_v24  ;;  %v4639_v6 = vld [vmem:[%s8530_s4 + $0x108] sm:$0xf]  ;;  %v4673_v56 = vld [vmem:[%s8530_s4 + $0x168] sm:$0xf0]  ;;  %v4576_v50 = vor.u32 %v5292_v48, %v4575_v55  ;;  %v4711_v48 = vld [vmem:[%s8530_s4 + $0x190] sm:$0xf] }
 0x18c   : > { %2809 = vmatpush.bf16.msra.mxu0 %v4536_v46  ;;  %v5271_v46 = vld [vmem:[%s8530_s4 + $0x4] sm:$0xf]  ;;  %v5308_v26 = vld [vmem:[%s8530_s4 + $0x124] sm:$0xf0]  ;;  %v4609_v24 = vld [vmem:[%s8530_s4 + $0xe8] sm:$0xf0] }
 0x18d   : > { %v1798_v59 = vmax.f32 %v1742_v38, %v1794_v4  ;;  %v4508_v62 = vor.u32 %v5271_v46, %v4505_v45  ;;  %v4640_v38 = vor.u32 %v5308_v26, %v4639_v6  ;;  %v4607_v4 = vld [vmem:[%s8530_s4 + $0xc8] sm:$0xf]  ;;  %v4641_v46 = vld [vmem:[%s8530_s4 + $0x128] sm:$0xf0] }
 0x18f   : > { %2834 = vmatpush.bf16.msra.mxu2 %v4572_v57  ;;  %v1799_v19 = vmax.f32 %v1797_v12, %v1798_v59  ;;  %v1782_v57 = vpop.f32.mrf.mxu2 }
 0x190   : > { %2810 = vmatpush.bf16.msra.mxu0 %v4504_v44  ;;  %v4708_v44 = vor.u32 %v5320_v41, %v4705_v35  ;;  %v4543_v57 = vld [vmem:[%s8530_s4 + $0x48] sm:$0xf]  ;;  %v5288_v41 = vld [vmem:[%s8530_s4 + $0x8c] sm:$0xf] }
 0x191   : > { %v7407_v49 = vpack.c.bf16 %v1799_v19, %v1799_v19  ;;  %v4644_v19 = vor.u32 %v5304_v37, %v4641_v46  ;;  %v4577_v35 = vld [vmem:[%s8530_s4 + $0xa8] sm:$0xf0] }
 0x192   : > { %v1813_v45 = vpop.f32.mrf.mxu0  ;;  %v1826_v59 = vpop.f32.mrf.mxu1 }
 0x193   : > { %2835 = vmatpush.bf16.msra.mxu2 %v4540_v27  ;;  %2811 = vmatmul.bf16.vlgmr.msra.gmra.mxu0 %v7407_v49  ;;  %v5300_v27 = vld [vmem:[%s8530_s4 + $0xe4] sm:$0xf0] }
 0x194   : > { %2855 = vmatpush.bf16.msrb.mxu0 %v4736_v32  ;;  %v5312_v32 = vld [vmem:[%s8530_s4 + $0x14c] sm:$0xf]  ;;  %v4608_v12 = vor.u32 %v5300_v27, %v4607_v4  ;;  %v5333_v4 = vld [vmem:[%s8530_s4 + $0x1ec] sm:$0xf0] }
 0x195   : > { %v4676_v60 = vor.u32 %v5312_v32, %v4673_v56  ;;  %v5276_v32 = vld [vmem:[%s8530_s4 + $0x24] sm:$0xf0]  ;;  %v4580_v56 = vor.u32 %v5288_v41, %v4577_v35  ;;  %v5280_v27 = vld [vmem:[%s8530_s4 + $0x4c] sm:$0xf]  ;;  %v5395_v41 = vld [vmem:[%s8530_s4 + $0x3dc] sm:$0xf0] }
 0x196   : > { %v5391_v35 = vld [vmem:[%s8530_s4 + $0x3c4] sm:$0xf] }
 0x197   : > { %2836 = vmatpush.bf16.msra.mxu2 %v4508_v62  ;;  %v5296_v62 = vld [vmem:[%s8530_s4 + $0xcc] sm:$0xf] }
 0x198   : > { %2856 = vmatpush.bf16.msrb.mxu0 %v4704_v31  ;;  %v1827_v31 = vadd.f32 %v1826_v59, %v1813_v45  ;;  %v4612_v52 = vor.u32 %v5296_v62, %v4609_v24  ;;  %v5272_v24 = vld [vmem:[%s8530_s4 + $0xc] sm:$0xf] }
 0x19a   : > { %2837 = vmatmul.bf16.vlgmr.msra.gmra.mxu2 %v7407_v49  ;;  %v1828_v26 = vpop.f32.mrf.mxu1 }
 0x19b   : > { %2881 = vmatpush.bf16.msrb.mxu2 %v4740_v23  ;;  %v5284_v23 = vld [vmem:[%s8530_s4 + $0x64] sm:$0xf0]  ;;  %v5317_v26 = vld [vmem:[%s8530_s4 + $0x16c] sm:$0xf0] }
 0x19c   : > { %2857 = vmatpush.bf16.msrb.mxu0 %v4672_v58  ;;  %v1815_v58 = vpop.f32.mrf.mxu0  ;;  %v4544_v6 = vor.u32 %v5284_v23, %v4543_v57  ;;  %v4745_v57 = vld [vmem:[%s8530_s4 + $0x1f0] sm:$0xf0] }
 0x19d   : > { %v1839_v37 = vpop.f32.mrf.mxu2 }
 0x19e   : > { %v1840_v45 = vadd.f32 %v1839_v37, %v1827_v31  ;;  %v4513_v31 = vld [vmem:[%s8530_s4 + $0x28] sm:$0xf0] }
 0x19f   : > { %2882 = vmatpush.bf16.msrb.mxu2 %v4708_v44  ;;  %v4511_v44 = vld [vmem:[%s8530_s4 + $0x8] sm:$0xf]  ;;  %v4516_v58 = vor.u32 %v5272_v24, %v4513_v31  ;;  %v4953_v24 = vld [vmem:[%s8530_s4 + $0x3a0] sm:$0xf0] }
 0x1a0   : > { %2858 = vmatpush.bf16.msrb.mxu0 %v4640_v38  ;;  %v4743_v38 = vld [vmem:[%s8530_s4 + $0x1d0] sm:$0xf]  ;;  %v4512_v46 = vor.u32 %v5276_v32, %v4511_v44  ;;  %v4985_v32 = vld [vmem:[%s8530_s4 + $0x3e0] sm:$0xf0] }
 0x1a1   : > { %v4744_v59 = vor.u32 %v5333_v4, %v4743_v38  ;;  %v4988_v4 = vor.u32 %v5391_v35, %v4985_v32  ;;  %v5379_v35 = vld [vmem:[%s8530_s4 + $0x35c] sm:$0xf0]  ;;  %v4921_v32 = vld [vmem:[%s8530_s4 + $0x360] sm:$0xf0] }
 0x1a3   : > { %2883 = vmatpush.bf16.msrb.mxu2 %v4676_v60  ;;  %v4545_v60 = vld [vmem:[%s8530_s4 + $0x68] sm:$0xf0]  ;;  %2842 = vmatpush.bf16.msra.mxu3 %v4988_v4 }
 0x1a4   : > { %2859 = vmatpush.bf16.msrb.mxu0 %v4608_v12  ;;  %v1852_v12 = vpop.f32.mrf.mxu3  ;;  %v4548_v55 = vor.u32 %v5280_v27, %v4545_v60  ;;  %v5321_v27 = vld [vmem:[%s8530_s4 + $0x194] sm:$0xf] }
 0x1a5   : > { %v7489_v62 = vadd.f32 %v1852_v12, %v1840_v45  ;;  %v1841_v38 = vpop.f32.mrf.mxu2  ;;  %v4713_v60 = vld [vmem:[%s8530_s4 + $0x1b0] sm:$0xf0]  ;;  %v4951_v45 = vld [vmem:[%s8530_s4 + $0x380] sm:$0xf] }
 0x1a6   : > { %v5387_v12 = vld [vmem:[%s8530_s4 + $0x39c] sm:$0xf0]  ;;  %v4716_v31 = vor.u32 %v5321_v27, %v4713_v60  ;;  %v5305_v27 = vld [vmem:[%s8530_s4 + $0x114] sm:$0xf] }
 0x1a7   : > { %2884 = vmatpush.bf16.msrb.mxu2 %v4644_v19  ;;  %v5325_v19 = vld [vmem:[%s8530_s4 + $0x1ac] sm:$0xf0]  ;;  %v4649_v60 = vld [vmem:[%s8530_s4 + $0x130] sm:$0xf0] }
 0x1a8   : > { %2860 = vmatpush.bf16.msrb.mxu0 %v4576_v50  ;;  %v5329_v50 = vld [vmem:[%s8530_s4 + $0x1d4] sm:$0xf]  ;;  %v4712_v23 = vor.u32 %v5325_v19, %v4711_v48  ;;  %v5309_v48 = vld [vmem:[%s8530_s4 + $0x12c] sm:$0xf0]  ;;  %v4952_v19 = vor.u32 %v5387_v12, %v4951_v45  ;;  %v4887_v45 = vld [vmem:[%s8530_s4 + $0x300] sm:$0xf] }
 0x1a9   : > { %v5371_v12 = vld [vmem:[%s8530_s4 + $0x31c] sm:$0xf0] }
 0x1ab   : > { %2885 = vmatpush.bf16.msrb.mxu2 %v4612_v52  ;;  %v4983_v52 = vld [vmem:[%s8530_s4 + $0x3c0] sm:$0xf] }
 0x1ac   : > { %2861 = vmatpush.bf16.msrb.mxu0 %v4544_v6  ;;  %v4679_v6 = vld [vmem:[%s8530_s4 + $0x150] sm:$0xf]  ;;  %v4984_v44 = vor.u32 %v5395_v41, %v4983_v52  ;;  %v1854_v37 = vpop.f32.mrf.mxu3  ;;  %v4919_v41 = vld [vmem:[%s8530_s4 + $0x340] sm:$0xf] }
 0x1ae   : > { %2816 = vmatpush.bf16.msra.mxu1 %v4984_v44  ;;  %v4920_v44 = vor.u32 %v5379_v35, %v4919_v41  ;;  %v4855_v35 = vld [vmem:[%s8530_s4 + $0x2c0] sm:$0xf] }
 0x1af   : > { %2886 = vmatpush.bf16.msrb.mxu2 %v4580_v56  ;;  %v4748_v56 = vor.u32 %v5329_v50, %v4745_v57  ;;  %v5313_v57 = vld [vmem:[%s8530_s4 + $0x154] sm:$0xf] }
 0x1b0   : > { %2862 = vmatpush.bf16.msrb.mxu0 %v4512_v46  ;;  %v4680_v46 = vor.u32 %v5317_v26, %v4679_v6  ;;  %v4615_v6 = vld [vmem:[%s8530_s4 + $0xd0] sm:$0xf] }
 0x1b1   : > { %v5301_v26 = vld [vmem:[%s8530_s4 + $0xec] sm:$0xf0] }
 0x1b2   : > { %2817 = vmatpush.bf16.msra.mxu1 %v4952_v19  ;;  %v1865_v4 = vpop.f32.mrf.mxu0  ;;  %v1878_v37 = vpop.f32.mrf.mxu1  ;;  %v5293_v19 = vld [vmem:[%s8530_s4 + $0xac] sm:$0xf0] }
 0x1b3   : > { %2887 = vmatpush.bf16.msrb.mxu2 %v4548_v55  ;;  %2863 = vmatmul.bf16.vlgmr.msrb.gmra.mxu0 %v7407_v49  ;;  %v4647_v55 = vld [vmem:[%s8530_s4 + $0x110] sm:$0xf] }
 0x1b4   : > { %2907 = vmatpush.bf16.msra.mxu0 %v4744_v59  ;;  %v5383_v59 = vld [vmem:[%s8530_s4 + $0x384] sm:$0xf]  ;;  %v4648_v52 = vor.u32 %v5309_v48, %v4647_v55  ;;  %v1879_v55 = vadd.f32 %v1878_v37, %v1865_v4  ;;  %v4583_v48 = vld [vmem:[%s8530_s4 + $0x90] sm:$0xf]  ;;  %v4585_v37 = vld [vmem:[%s8530_s4 + $0xb0] sm:$0xf0] }
 0x1b5   : > { %v4956_v50 = vor.u32 %v5383_v59, %v4953_v24  ;;  %v5367_v59 = vld [vmem:[%s8530_s4 + $0x304] sm:$0xf]  ;;  %v4888_v24 = vor.u32 %v5371_v12, %v4887_v45  ;;  %v4584_v41 = vor.u32 %v5293_v19, %v4583_v48  ;;  %v4823_v12 = vld [vmem:[%s8530_s4 + $0x280] sm:$0xf]  ;;  %v4519_v19 = vld [vmem:[%s8530_s4 + $0x10] sm:$0xf] }
 0x1b6   : > { %2818 = vmatpush.bf16.msra.mxu1 %v4920_v44  ;;  %v5285_v44 = vld [vmem:[%s8530_s4 + $0x6c] sm:$0xf0]  ;;  %v5351_v48 = vld [vmem:[%s8530_s4 + $0x284] sm:$0xf] }
 0x1b7   : > { %2888 = vmatpush.bf16.msrb.mxu2 %v4516_v58  ;;  %v5375_v58 = vld [vmem:[%s8530_s4 + $0x344] sm:$0xf]  ;;  %2843 = vmatpush.bf16.msra.mxu3 %v4956_v50  ;;  %v4652_v50 = vor.u32 %v5305_v27, %v4649_v60  ;;  %v5289_v60 = vld [vmem:[%s8530_s4 + $0x94] sm:$0xf] }
 0x1b8   : > { %2908 = vmatpush.bf16.msra.mxu0 %v4712_v23  ;;  %v4681_v23 = vld [vmem:[%s8530_s4 + $0x170] sm:$0xf0]  ;;  %v4924_v38 = vor.u32 %v5375_v58, %v4921_v32  ;;  %v5363_v58 = vld [vmem:[%s8530_s4 + $0x2dc] sm:$0xf0] }
 0x1b9   : > { %v4856_v32 = vor.u32 %v5363_v58, %v4855_v35  ;;  %v5281_v58 = vld [vmem:[%s8530_s4 + $0x54] sm:$0xf] }
 0x1ba   : > { %2889 = vmatmul.bf16.vlgmr.msrb.gmra.mxu2 %v7407_v49  ;;  %2819 = vmatpush.bf16.msra.mxu1 %v4888_v24  ;;  %v1867_v27 = vpop.f32.mrf.mxu0  ;;  %v5277_v24 = vld [vmem:[%s8530_s4 + $0x2c] sm:$0xf0] }
 0x1bb   : > { %2933 = vmatpush.bf16.msra.mxu2 %v4748_v56  ;;  %v4684_v56 = vor.u32 %v5313_v57, %v4681_v23  ;;  %2844 = vmatpush.bf16.msra.mxu3 %v4924_v38  ;;  %v5297_v23 = vld [vmem:[%s8530_s4 + $0xd4] sm:$0xf] }
 0x1bc   : > { %2909 = vmatpush.bf16.msra.mxu0 %v4680_v46  ;;  %v4616_v46 = vor.u32 %v5301_v26, %v4615_v6  ;;  %v5359_v6 = vld [vmem:[%s8530_s4 + $0x2c4] sm:$0xf]  ;;  %v4551_v26 = vld [vmem:[%s8530_s4 + $0x50] sm:$0xf] }
 0x1bd   : > { %v4552_v45 = vor.u32 %v5285_v44, %v4551_v26  ;;  %v1891_v35 = vpop.f32.mrf.mxu2  ;;  %v1904_v44 = vpop.f32.mrf.mxu3 }
 0x1be   : > { %2820 = vmatpush.bf16.msra.mxu1 %v4856_v32  ;;  %v1892_v26 = vadd.f32 %v1891_v35, %v1879_v55  ;;  %v4520_v32 = vor.u32 %v5277_v24, %v4519_v19  ;;  %v4793_v55 = vld [vmem:[%s8530_s4 + $0x260] sm:$0xf0]  ;;  %v4521_v19 = vld [vmem:[%s8530_s4 + $0x30] sm:$0xf0]  ;;  %v5330_v24 = vld [vmem:[%s8530_s4 + $0x1dc] sm:$0xf] }
 0x1bf   : > { %2934 = vmatpush.bf16.msra.mxu2 %v4716_v31  ;;  %v4889_v31 = vld [vmem:[%s8530_s4 + $0x320] sm:$0xf0] }
 0x1c0   : > { %2910 = vmatpush.bf16.msra.mxu0 %v4648_v52  ;;  %v4892_v57 = vor.u32 %v5367_v59, %v4889_v31  ;;  %v4617_v52 = vld [vmem:[%s8530_s4 + $0xf0] sm:$0xf0]  ;;  %v5355_v59 = vld [vmem:[%s8530_s4 + $0x29c] sm:$0xf0] }
 0x1c1   : > { %v4620_v38 = vor.u32 %v5297_v23, %v4617_v52  ;;  %v4824_v31 = vor.u32 %v5355_v59, %v4823_v12  ;;  %v4751_v23 = vld [vmem:[%s8530_s4 + $0x1d8] sm:$0xf]  ;;  %v5273_v59 = vld [vmem:[%s8530_s4 + $0x14] sm:$0xf] }
 0x1c2   : > { %2845 = vmatpush.bf16.msra.mxu3 %v4892_v57  ;;  %v4588_v57 = vor.u32 %v5289_v60, %v4585_v37  ;;  %v5334_v52 = vld [vmem:[%s8530_s4 + $0x1f4] sm:$0xf0]  ;;  %v7667_v37 = vadd.f32 %v1904_v44, %v1892_v26  ;;  %v4991_v26 = vld [vmem:[%s8530_s4 + $0x3c8] sm:$0xf] }
 0x1c3   : > { %2935 = vmatpush.bf16.msra.mxu2 %v4684_v56  ;;  %v4857_v56 = vld [vmem:[%s8530_s4 + $0x2e0] sm:$0xf0]  ;;  %2821 = vmatpush.bf16.msra.mxu1 %v4824_v31  ;;  %v4752_v27 = vor.u32 %v5334_v52, %v4751_v23  ;;  %v5326_v12 = vld [vmem:[%s8530_s4 + $0x1b4] sm:$0xf0]  ;;  %v4753_v31 = vld [vmem:[%s8530_s4 + $0x1f8] sm:$0xf0] }
 0x1c4   : > { %2911 = vmatpush.bf16.msra.mxu0 %v4616_v46  ;;  %v4860_v4 = vor.u32 %v5359_v6, %v4857_v56  ;;  %v1880_v46 = vpop.f32.mrf.mxu1  ;;  %v4553_v6 = vld [vmem:[%s8530_s4 + $0x70] sm:$0xf0]  ;;  %v4791_v56 = vld [vmem:[%s8530_s4 + $0x240] sm:$0xf]  ;;  %v5396_v44 = vld [vmem:[%s8530_s4 + $0x3e4] sm:$0xf0] }
 0x1c5   : > { %v4556_v46 = vor.u32 %v5281_v58, %v4553_v6  ;;  %v4759_v23 = vld [vmem:[%s8530_s4 + $0x200] sm:$0xf]  ;;  %v4761_v6 = vld [vmem:[%s8530_s4 + $0x220] sm:$0xf0] }
 0x1c6   : > { %2846 = vmatpush.bf16.msra.mxu3 %v4860_v4  ;;  %v5343_v4 = vld [vmem:[%s8530_s4 + $0x244] sm:$0xf]  ;;  %v5339_v52 = vld [vmem:[%s8530_s4 + $0x21c] sm:$0xf0] }
 0x1c7   : > { %2936 = vmatpush.bf16.msra.mxu2 %v4652_v50  ;;  %v4825_v50 = vld [vmem:[%s8530_s4 + $0x2a0] sm:$0xf0]  ;;  %v4760_v58 = vor.u32 %v5339_v52, %v4759_v23  ;;  %v4959_v23 = vld [vmem:[%s8530_s4 + $0x388] sm:$0xf]  ;;  %v4655_v52 = vld [vmem:[%s8530_s4 + $0x118] sm:$0xf] }
 0x1c8   : > { %2912 = vmatpush.bf16.msra.mxu0 %v4584_v41  ;;  %v4828_v41 = vor.u32 %v5351_v48, %v4825_v50  ;;  %v4796_v48 = vor.u32 %v5343_v4, %v4793_v55  ;;  %v2012_v50 = vmax.f32 %v7489_v62, %v7667_v37  ;;  %v4992_v4 = vor.u32 %v5396_v44, %v4991_v26  ;;  %v1893_v55 = vpop.f32.mrf.mxu2  ;;  %v5314_v26 = vld [vmem:[%s8530_s4 + $0x15c] sm:$0xf]  ;;  %v5385_v62 = vld [vmem:[%s8530_s4 + $0x394] sm:$0xf] }
 0x1c9   : > { %v4689_v44 = vld [vmem:[%s8530_s4 + $0x178] sm:$0xf0]  ;;  %v4969_v37 = vld [vmem:[%s8530_s4 + $0x3b0] sm:$0xf0] }
 0x1ca   : > { %2847 = vmatpush.bf16.msra.mxu3 %v4828_v41  ;;  %v5335_v41 = vld [vmem:[%s8530_s4 + $0x204] sm:$0xf] }
 0x1cb   : > { %2937 = vmatpush.bf16.msra.mxu2 %v4620_v38  ;;  %v5347_v38 = vld [vmem:[%s8530_s4 + $0x25c] sm:$0xf0] }
 0x1cc   : > { %2913 = vmatpush.bf16.msra.mxu0 %v4552_v45  ;;  %v4792_v60 = vor.u32 %v5347_v38, %v4791_v56  ;;  %v4719_v45 = vld [vmem:[%s8530_s4 + $0x198] sm:$0xf]  ;;  %v4764_v38 = vor.u32 %v5335_v41, %v4761_v6 }
 0x1cd   : > { %v4720_v35 = vor.u32 %v5326_v12, %v4719_v45  ;;  %v5318_v56 = vld [vmem:[%s8530_s4 + $0x174] sm:$0xf0]  ;;  %v4756_v45 = vor.u32 %v5330_v24, %v4753_v31  ;;  %v1906_v12 = vpop.f32.mrf.mxu3  ;;  %v5388_v24 = vld [vmem:[%s8530_s4 + $0x3a4] sm:$0xf0]  ;;  %v5384_v31 = vld [vmem:[%s8530_s4 + $0x38c] sm:$0xf] }
 0x1ce   : > { %2822 = vmatpush.bf16.msra.mxu1 %v4792_v60  ;;  %2848 = vmatpush.bf16.msra.mxu3 %v4796_v48  ;;  %v4993_v60 = vld [vmem:[%s8530_s4 + $0x3e8] sm:$0xf0]  ;;  %v4721_v48 = vld [vmem:[%s8530_s4 + $0x1b8] sm:$0xf0]  ;;  %v4960_v41 = vor.u32 %v5388_v24, %v4959_v23 }
 0x1cf   : > { %2938 = vmatpush.bf16.msra.mxu2 %v4588_v57  ;;  %v4687_v57 = vld [vmem:[%s8530_s4 + $0x158] sm:$0xf]  ;;  %v5306_v24 = vld [vmem:[%s8530_s4 + $0x11c] sm:$0xf] }
 0x1d0   : > { %2914 = vmatpush.bf16.msra.mxu0 %v4520_v32  ;;  %v4524_v32 = vor.u32 %v5273_v59, %v4521_v19  ;;  %v5322_v59 = vld [vmem:[%s8530_s4 + $0x19c] sm:$0xf]  ;;  %v4688_v19 = vor.u32 %v5318_v56, %v4687_v57  ;;  %v5310_v57 = vld [vmem:[%s8530_s4 + $0x134] sm:$0xf0]  ;;  %v4927_v56 = vld [vmem:[%s8530_s4 + $0x348] sm:$0xf] }
 0x1d2   : > { %2823 = vmatpush.bf16.msra.mxu1 %v4760_v58  ;;  %2849 = vmatpush.bf16.msra.mxu3 %v4764_v38  ;;  %v4724_v58 = vor.u32 %v5322_v59, %v4721_v48  ;;  %v5380_v38 = vld [vmem:[%s8530_s4 + $0x364] sm:$0xf0]  ;;  %v7778_v23 = vpop.f32.mrf.mxu0 }
 0x1d3   : > { %2939 = vmatpush.bf16.msra.mxu2 %v4556_v46  ;;  %2915 = vmatmul.bf16.vlgmr.msra.gmra.mxu0 %v7407_v49  ;;  %v4928_v55 = vor.u32 %v5380_v38, %v4927_v56  ;;  %v4895_v59 = vld [vmem:[%s8530_s4 + $0x308] sm:$0xf]  ;;  %v5298_v56 = vld [vmem:[%s8530_s4 + $0xdc] sm:$0xf] }
 0x1d4   : > { %2959 = vmatpush.bf16.msrb.mxu0 %v4752_v27  ;;  %v5392_v27 = vld [vmem:[%s8530_s4 + $0x3cc] sm:$0xf]  ;;  %v5372_v48 = vld [vmem:[%s8530_s4 + $0x324] sm:$0xf0] }
 0x1d5   : > { %v4996_v46 = vor.u32 %v5392_v27, %v4993_v60  ;;  %v4623_v27 = vld [vmem:[%s8530_s4 + $0xd8] sm:$0xf] }
 0x1d6   : > { %2868 = vmatpush.bf16.msrb.mxu1 %v4992_v4  ;;  %v5376_v4 = vld [vmem:[%s8530_s4 + $0x34c] sm:$0xf]  ;;  %v5302_v60 = vld [vmem:[%s8530_s4 + $0xf4] sm:$0xf0] }
 0x1d7   : > { %2940 = vmatpush.bf16.msra.mxu2 %v4524_v32  ;;  %2894 = vmatpush.bf16.msrb.mxu3 %v4996_v46  ;;  %v4656_v32 = vor.u32 %v5310_v57, %v4655_v52  ;;  %v4692_v46 = vor.u32 %v5314_v26, %v4689_v44  ;;  %v4896_v52 = vor.u32 %v5372_v48, %v4895_v59  ;;  %v4897_v57 = vld [vmem:[%s8530_s4 + $0x328] sm:$0xf0] }
 0x1d8   : > { %2960 = vmatpush.bf16.msrb.mxu0 %v4720_v35  ;;  %v4961_v35 = vld [vmem:[%s8530_s4 + $0x3a8] sm:$0xf0] }
 0x1d9   : > { %v4964_v6 = vor.u32 %v5384_v31, %v4961_v35  ;;  %v4657_v31 = vld [vmem:[%s8530_s4 + $0x138] sm:$0xf0]  ;;  %v4624_v35 = vor.u32 %v5302_v60, %v4623_v27  ;;  %v5364_v27 = vld [vmem:[%s8530_s4 + $0x2e4] sm:$0xf0]  ;;  %v5360_v60 = vld [vmem:[%s8530_s4 + $0x2cc] sm:$0xf] }
 0x1da   : > { %2869 = vmatpush.bf16.msrb.mxu1 %v4960_v41  ;;  %2941 = vmatmul.bf16.vlgmr.msra.gmra.mxu2 %v7407_v49  ;;  %v7789_v41 = vpop.f32.mrf.mxu1  ;;  %v4660_v44 = vor.u32 %v5306_v24, %v4657_v31  ;;  %v5290_v24 = vld [vmem:[%s8530_s4 + $0x9c] sm:$0xf] }
 0x1db   : > { %2985 = vmatpush.bf16.msrb.mxu2 %v4756_v45  ;;  %2895 = vmatpush.bf16.msrb.mxu3 %v4964_v6  ;;  %v4929_v45 = vld [vmem:[%s8530_s4 + $0x368] sm:$0xf0]  ;;  %v5294_v6 = vld [vmem:[%s8530_s4 + $0xb4] sm:$0xf0]  ;;  %v4593_v31 = vld [vmem:[%s8530_s4 + $0xb8] sm:$0xf0] }
 0x1dc   : > { %2961 = vmatpush.bf16.msrb.mxu0 %v4688_v19  ;;  %v4932_v12 = vor.u32 %v5376_v4, %v4929_v45  ;;  %v5368_v19 = vld [vmem:[%s8530_s4 + $0x30c] sm:$0xf]  ;;  %v4863_v4 = vld [vmem:[%s8530_s4 + $0x2c8] sm:$0xf]  ;;  %v5286_v45 = vld [vmem:[%s8530_s4 + $0x74] sm:$0xf0] }
 0x1dd   : > { %v4900_v26 = vor.u32 %v5368_v19, %v4897_v57  ;;  %v1919_v19 = vpop.f32.mrf.mxu0 }
 0x1de   : > { %2870 = vmatpush.bf16.msrb.mxu1 %v4928_v55  ;;  %v4559_v55 = vld [vmem:[%s8530_s4 + $0x58] sm:$0xf] }
 0x1df   : > { %2986 = vmatpush.bf16.msrb.mxu2 %v4724_v58  ;;  %v4591_v58 = vld [vmem:[%s8530_s4 + $0x98] sm:$0xf]  ;;  %2896 = vmatpush.bf16.msrb.mxu3 %v4932_v12  ;;  %v4865_v12 = vld [vmem:[%s8530_s4 + $0x2e8] sm:$0xf0]  ;;  %v4560_v57 = vor.u32 %v5286_v45, %v4559_v55  ;;  %v4561_v55 = vld [vmem:[%s8530_s4 + $0x78] sm:$0xf0]  ;;  %v1956_v45 = vpop.f32.mrf.mxu3 }
 0x1e0   : > { %2962 = vmatpush.bf16.msrb.mxu0 %v4656_v32  ;;  %v4625_v32 = vld [vmem:[%s8530_s4 + $0xf8] sm:$0xf0]  ;;  %v4592_v38 = vor.u32 %v5294_v6, %v4591_v58  ;;  %v4868_v48 = vor.u32 %v5360_v60, %v4865_v12  ;;  %v5356_v58 = vld [vmem:[%s8530_s4 + $0x2a4] sm:$0xf0]  ;;  %v5352_v6 = vld [vmem:[%s8530_s4 + $0x28c] sm:$0xf] }
 0x1e1   : > { %v4628_v59 = vor.u32 %v5298_v56, %v4625_v32  ;;  %v4833_v32 = vld [vmem:[%s8530_s4 + $0x2a8] sm:$0xf0]  ;;  %v5282_v60 = vld [vmem:[%s8530_s4 + $0x5c] sm:$0xf]  ;;  %v4799_v12 = vld [vmem:[%s8530_s4 + $0x248] sm:$0xf] }
 0x1e2   : > { %2871 = vmatpush.bf16.msrb.mxu1 %v4896_v52  ;;  %v1932_v52 = vpop.f32.mrf.mxu1 }
 0x1e3   : > { %2987 = vmatpush.bf16.msrb.mxu2 %v4692_v46  ;;  %2897 = vmatpush.bf16.msrb.mxu3 %v4900_v26  ;;  %v4864_v46 = vor.u32 %v5364_v27, %v4863_v4  ;;  %v4527_v26 = vld [vmem:[%s8530_s4 + $0x18] sm:$0xf]  ;;  %v4836_v4 = vor.u32 %v5352_v6, %v4833_v32  ;;  %v1943_v27 = vpop.f32.mrf.mxu2  ;;  %v5340_v6 = vld [vmem:[%s8530_s4 + $0x224] sm:$0xf0] }
 0x1e4   : > { %2963 = vmatpush.bf16.msrb.mxu0 %v4624_v35  ;;  %v4831_v35 = vld [vmem:[%s8530_s4 + $0x288] sm:$0xf] }
 0x1e5   : > { %v4832_v56 = vor.u32 %v5356_v58, %v4831_v35  ;;  %v4529_v35 = vld [vmem:[%s8530_s4 + $0x38] sm:$0xf0]  ;;  %v4767_v58 = vld [vmem:[%s8530_s4 + $0x208] sm:$0xf] }
 0x1e6   : > { %2872 = vmatpush.bf16.msrb.mxu1 %v4864_v46 }
 0x1e7   : > { %2988 = vmatpush.bf16.msrb.mxu2 %v4660_v44  ;;  %v5278_v44 = vld [vmem:[%s8530_s4 + $0x34] sm:$0xf0]  ;;  %2898 = vmatpush.bf16.msrb.mxu3 %v4868_v48  ;;  %v5344_v48 = vld [vmem:[%s8530_s4 + $0x24c] sm:$0xf] }
 0x1e8   : > { %2964 = vmatpush.bf16.msrb.mxu0 %v4592_v38  ;;  %v4596_v38 = vor.u32 %v5290_v24, %v4593_v31  ;;  %v4528_v46 = vor.u32 %v5278_v44, %v4527_v26  ;;  %v4801_v24 = vld [vmem:[%s8530_s4 + $0x268] sm:$0xf0]  ;;  %v4564_v31 = vor.u32 %v5282_v60, %v4561_v55  ;;  %v4768_v44 = vor.u32 %v5340_v6, %v4767_v58  ;;  %v1958_v60 = vpop.f32.mrf.mxu3  ;;  %v5393_v58 = vld [vmem:[%s8530_s4 + $0x3d4] sm:$0xf] }
 0x1e9   : > { %v4804_v52 = vor.u32 %v5344_v48, %v4801_v24  ;;  %v5336_v26 = vld [vmem:[%s8530_s4 + $0x20c] sm:$0xf]  ;;  %v5389_v60 = vld [vmem:[%s8530_s4 + $0x3ac] sm:$0xf0] }
 0x1ea   : > { %2873 = vmatpush.bf16.msrb.mxu1 %v4832_v56  ;;  %v4769_v56 = vld [vmem:[%s8530_s4 + $0x228] sm:$0xf0] }
 0x1eb   : > { %2989 = vmatpush.bf16.msrb.mxu2 %v4628_v59  ;;  %v5348_v59 = vld [vmem:[%s8530_s4 + $0x264] sm:$0xf0]  ;;  %2899 = vmatpush.bf16.msrb.mxu3 %v4836_v4  ;;  %v1945_v4 = vpop.f32.mrf.mxu2 }
 0x1ec   : > { %2965 = vmatpush.bf16.msrb.mxu0 %v4560_v57  ;;  %v4800_v19 = vor.u32 %v5348_v59, %v4799_v12  ;;  %v5274_v57 = vld [vmem:[%s8530_s4 + $0x1c] sm:$0xf]  ;;  %v1931_v59 = vadd.f32 %v7789_v41, %v7778_v23  ;;  %v4999_v23 = vld [vmem:[%s8530_s4 + $0x3d0] sm:$0xf] }
 0x1ed   : > { %v4532_v32 = vor.u32 %v5274_v57, %v4529_v35 }
 0x1ee   : > { %2874 = vmatpush.bf16.msrb.mxu1 %v4800_v19 }
 0x1ef   : > { %2990 = vmatpush.bf16.msrb.mxu2 %v4596_v38  ;;  %2900 = vmatpush.bf16.msrb.mxu3 %v4804_v52  ;;  %v4772_v38 = vor.u32 %v5336_v26, %v4769_v56 }
 0x1f0   : > { %2966 = vmatpush.bf16.msrb.mxu0 %v4528_v46 }
 0x1f1   : > { %v1982_v46 = vpop.f32.mrf.mxu1 }
 0x1f2   : > { %2875 = vmatpush.bf16.msrb.mxu1 %v4768_v44  ;;  %v1969_v55 = vpop.f32.mrf.mxu0 }
 0x1f3   : > { %2991 = vmatpush.bf16.msrb.mxu2 %v4564_v31  ;;  %2967 = vmatmul.bf16.vlgmr.msrb.gmra.mxu0 %v7407_v49  ;;  %v1983_v19 = vadd.f32 %v1982_v46, %v1969_v55  ;;  %v4972_v55 = vor.u32 %v5385_v62, %v4969_v37  ;;  %v4935_v46 = vld [vmem:[%s8530_s4 + $0x350] sm:$0xf] }
 0x1f4   : > { %3023 = vmatpush.bf16.msra.mxu0 %v5921_v5  ;;  %2901 = vmatpush.bf16.msrb.mxu3 %v4772_v38 }
 0x1f7   : > { %2992 = vmatpush.bf16.msrb.mxu2 %v4532_v32  ;;  %v4967_v32 = vld [vmem:[%s8530_s4 + $0x390] sm:$0xf] }
 0x1f8   : > { %3024 = vmatpush.bf16.msra.mxu0 %v5952_v18 }
 0x1f9   : > { %v1984_v48 = vpop.f32.mrf.mxu1 }
 0x1fa   : > { %2993 = vmatmul.bf16.vlgmr.msrb.gmra.mxu2 %v7407_v49  ;;  %v1971_v12 = vpop.f32.mrf.mxu0  ;;  %v1944_v49 = vadd.f32 %v1943_v27, %v1931_v59  ;;  %v5397_v27 = vld [vmem:[%s8530_s4 + $0x3ec] sm:$0xf0]  ;;  %v5377_v59 = vld [vmem:[%s8530_s4 + $0x354] sm:$0xf] }
 0x1fb   : > { %3049 = vmatpush.bf16.msra.mxu2 %v5949_v17  ;;  %v5000_v44 = vor.u32 %v5397_v27, %v4999_v23  ;;  %v5381_v12 = vld [vmem:[%s8530_s4 + $0x36c] sm:$0xf0]  ;;  %v4937_v48 = vld [vmem:[%s8530_s4 + $0x370] sm:$0xf0] }
 0x1fc   : > { %3025 = vmatpush.bf16.msra.mxu0 %v5989_v30  ;;  %v1957_v57 = vadd.f32 %v1956_v45, %v1944_v49  ;;  %v5001_v45 = vld [vmem:[%s8530_s4 + $0x3f0] sm:$0xf0]  ;;  %v4936_v49 = vor.u32 %v5381_v12, %v4935_v46  ;;  %v4871_v27 = vld [vmem:[%s8530_s4 + $0x2d0] sm:$0xf] }
 0x1fd   : > { %v1995_v24 = vpop.f32.mrf.mxu2  ;;  %v2008_v52 = vpop.f32.mrf.mxu3  ;;  %v5004_v56 = vor.u32 %v5393_v58, %v5001_v45  ;;  %v5365_v58 = vld [vmem:[%s8530_s4 + $0x2ec] sm:$0xf0]  ;;  %v5361_v45 = vld [vmem:[%s8530_s4 + $0x2d4] sm:$0xf] }
 0x1fe   : > { %v1996_v31 = vadd.f32 %v1995_v24, %v1983_v19  ;;  %v4940_v19 = vor.u32 %v5377_v59, %v4937_v48  ;;  %v4903_v24 = vld [vmem:[%s8530_s4 + $0x310] sm:$0xf]  ;;  %v5345_v59 = vld [vmem:[%s8530_s4 + $0x254] sm:$0xf] }
 0x1ff   : > { %3050 = vmatpush.bf16.msra.mxu2 %v5985_v29  ;;  %v5349_v12 = vld [vmem:[%s8530_s4 + $0x26c] sm:$0xf0]  ;;  %v4809_v48 = vld [vmem:[%s8530_s4 + $0x270] sm:$0xf0] }
 0x200   : > { %3026 = vmatpush.bf16.msra.mxu0 %v6028_v43  ;;  %v2009_v35 = vadd.f32 %v2008_v52, %v1996_v31  ;;  %v5373_v31 = vld [vmem:[%s8530_s4 + $0x32c] sm:$0xf0]  ;;  %v5369_v52 = vld [vmem:[%s8530_s4 + $0x314] sm:$0xf] }
 0x201   : > { %v4904_v23 = vor.u32 %v5373_v31, %v4903_v24  ;;  %v4812_v24 = vor.u32 %v5345_v59, %v4809_v48  ;;  %v4775_v31 = vld [vmem:[%s8530_s4 + $0x210] sm:$0xf] }
 0x202   : > { %v2013_v41 = vmax.f32 %v1957_v57, %v2009_v35  ;;  %v4905_v57 = vld [vmem:[%s8530_s4 + $0x330] sm:$0xf0] }
 0x203   : > { %3051 = vmatpush.bf16.msra.mxu2 %v6024_v42 }
 0x204   : > { %3027 = vmatpush.bf16.msra.mxu0 %v6064_v54  ;;  %v2014_v6 = vmax.f32 %v2012_v50, %v2013_v41  ;;  %v4968_v50 = vor.u32 %v5389_v60, %v4967_v32  ;;  %v4908_v41 = vor.u32 %v5369_v52, %v4905_v57  ;;  %v5357_v32 = vld [vmem:[%s8530_s4 + $0x2ac] sm:$0xf0]  ;;  %v4841_v60 = vld [vmem:[%s8530_s4 + $0x2b0] sm:$0xf0] }
 0x205   : > { %v1997_v26 = vpop.f32.mrf.mxu2  ;;  %v2010_v4 = vpop.f32.mrf.mxu3  ;;  %v5341_v52 = vld [vmem:[%s8530_s4 + $0x22c] sm:$0xf0]  ;;  %v5337_v57 = vld [vmem:[%s8530_s4 + $0x214] sm:$0xf] }
 0x206   : > { %v7919_v38 = vpack.c.bf16 %v2014_v6, %v2014_v6  ;;  %v4873_v6 = vld [vmem:[%s8530_s4 + $0x2f0] sm:$0xf0]  ;;  %v4872_v26 = vor.u32 %v5365_v58, %v4871_v27  ;;  %v5398_v27 = vld [vmem:[%s8530_s4 + $0x3f4] sm:$0xf0]  ;;  %v5394_v58 = vld [vmem:[%s8530_s4 + $0x3dc] sm:$0xf] }
 0x207   : > { %3052 = vmatpush.bf16.msra.mxu2 %v6060_v53  ;;  %v5353_v4 = vld [vmem:[%s8530_s4 + $0x294] sm:$0xf] }
 0x208   : > { %3028 = vmatpush.bf16.msra.mxu0 %v6103_v3  ;;  %2824 = vmatmul.bf16.vlgmr.msra.gmra.mxu1 %v7919_v38 }
 0x209   : > { %2850 = vmatmul.bf16.vlgmr.msra.gmra.mxu3 %v7919_v38  ;;  %2920 = vmatpush.bf16.msra.mxu1 %v5000_v44  ;;  %v4876_v44 = vor.u32 %v5361_v45, %v4873_v6  ;;  %v5009_v45 = vld [vmem:[%s8530_s4 + $0x3f8] sm:$0xf0]  ;;  %v8946_v6 = vld [vmem:[#allocation42_spill] sm:$0xff] }
 0x20a   : > { %2946 = vmatpush.bf16.msra.mxu3 %v5004_v56  ;;  %v4839_v56 = vld [vmem:[%s8530_s4 + $0x290] sm:$0xf] }
 0x20b   : > { %3053 = vmatpush.bf16.msra.mxu2 %v6096_v1  ;;  %v4840_v37 = vor.u32 %v5357_v32, %v4839_v56 }
 0x20c   : > { %3029 = vmatpush.bf16.msra.mxu0 %v6139_v20 }
 0x20d   : > { %2921 = vmatpush.bf16.msra.mxu1 %v4968_v50  ;;  %v4844_v50 = vor.u32 %v5353_v4, %v4841_v60  ;;  %v5012_v60 = vor.u32 %v5394_v58, %v5009_v45  ;;  %v5374_v45 = vld [vmem:[%s8530_s4 + $0x334] sm:$0xf0] }
 0x20e   : > { %2947 = vmatpush.bf16.msra.mxu3 %v4972_v55  ;;  %v4807_v55 = vld [vmem:[%s8530_s4 + $0x250] sm:$0xf] }
 0x20f   : > { %3054 = vmatpush.bf16.msra.mxu2 %v6132_v15 }
 0x210   : > { %3030 = vmatpush.bf16.msra.mxu0 %v6184_v40  ;;  %v7962_v35 = vpop.f32.mrf.mxu0 }
 0x211   : > { %2922 = vmatpush.bf16.msra.mxu1 %v4936_v49  ;;  %v8945_v49 = vld [vmem:[#allocation36_spill] sm:$0xff] }
 0x212   : > { %2948 = vmatpush.bf16.msra.mxu3 %v4940_v19  ;;  %v4808_v19 = vor.u32 %v5349_v12, %v4807_v55  ;;  %v4977_v55 = vld [vmem:[%s8530_s4 + $0x3b8] sm:$0xf0]  ;;  %v8948_v12 = vld [vmem:[#allocation44_spill] sm:$0xff] }
 0x213   : > { %3055 = vmatpush.bf16.msra.mxu2 %v6180_v39 }
 0x214   : > { %3075 = vmatpush.bf16.msrb.mxu0 %v6203_v51 }
 0x215   : > { %2923 = vmatpush.bf16.msra.mxu1 %v4904_v23  ;;  %v4777_v23 = vld [vmem:[%s8530_s4 + $0x230] sm:$0xf0] }
 0x216   : > { %2949 = vmatpush.bf16.msra.mxu3 %v4908_v41  ;;  %v5007_v41 = vld [vmem:[%s8530_s4 + $0x3d8] sm:$0xf]  ;;  %v4780_v56 = vor.u32 %v5337_v57, %v4777_v23  ;;  %v8949_v57 = vld [vmem:[#allocation46_spill] sm:$0xff] }
 0x217   : > { %3056 = vmatpush.bf16.msra.mxu2 %v6232_v2  ;;  %v5008_v4 = vor.u32 %v5398_v27, %v5007_v41  ;;  %v4911_v27 = vld [vmem:[%s8530_s4 + $0x318] sm:$0xf]  ;;  %v8981_v2 = vld [vmem:[#allocation43_spill] sm:$0xff] }
 0x218   : > { %3076 = vmatpush.bf16.msrb.mxu0 %v6242_v10  ;;  %2876 = vmatmul.bf16.vlgmr.msrb.gmra.mxu1 %v7919_v38  ;;  %v2814_v62 = vpop.f32.mrf.mxu0 }
 0x219   : > { %2902 = vmatmul.bf16.vlgmr.msrb.gmra.mxu3 %v7919_v38  ;;  %2924 = vmatpush.bf16.msra.mxu1 %v4872_v26  ;;  %v8947_v26 = vld [vmem:[#allocation40_spill] sm:$0xff]  ;;  %v4975_v62 = vld [vmem:[%s8530_s4 + $0x398] sm:$0xf] }
 0x21a   : > { %2950 = vmatpush.bf16.msra.mxu3 %v4876_v44  ;;  %v4776_v44 = vor.u32 %v5341_v52, %v4775_v31  ;;  %v5378_v31 = vld [vmem:[%s8530_s4 + $0x35c] sm:$0xf] }
 0x21b   : > { %3101 = vmatpush.bf16.msrb.mxu2 %v6238_v7  ;;  %v4945_v52 = vld [vmem:[%s8530_s4 + $0x378] sm:$0xf0]  ;;  %v8979_v7 = vld [vmem:[#allocation39_spill] sm:$0xff] }
 0x21c   : > { %3077 = vmatpush.bf16.msrb.mxu0 %v6280_v33  ;;  %v4948_v41 = vor.u32 %v5378_v31, %v4945_v52  ;;  %v5354_v31 = vld [vmem:[%s8530_s4 + $0x29c] sm:$0xf] }
 0x21d   : > { %v7997_v46 = vpop.f32.mrf.mxu2  ;;  %2925 = vmatpush.bf16.msra.mxu1 %v4840_v37  ;;  %v5390_v37 = vld [vmem:[%s8530_s4 + $0x3b4] sm:$0xf0]  ;;  %v4849_v52 = vld [vmem:[%s8530_s4 + $0x2b8] sm:$0xf0] }
 0x21e   : > { %2951 = vmatpush.bf16.msra.mxu3 %v4844_v50  ;;  %v5386_v50 = vld [vmem:[%s8530_s4 + $0x39c] sm:$0xf]  ;;  %v4976_v59 = vor.u32 %v5390_v37, %v4975_v62  ;;  %v5366_v62 = vld [vmem:[%s8530_s4 + $0x2f4] sm:$0xf0] }
 0x21f   : > { %3102 = vmatpush.bf16.msrb.mxu2 %v8871_v25  ;;  %v4980_v48 = vor.u32 %v5386_v50, %v4977_v55  ;;  %v5362_v37 = vld [vmem:[%s8530_s4 + $0x2dc] sm:$0xf] }
 0x220   : > { %3078 = vmatpush.bf16.msrb.mxu0 %v8873_v34  ;;  %v4881_v50 = vld [vmem:[%s8530_s4 + $0x2f8] sm:$0xf0] }
 0x221   : > { %2926 = vmatpush.bf16.msra.mxu1 %v4808_v19  ;;  %v4943_v19 = vld [vmem:[%s8530_s4 + $0x358] sm:$0xf] }
 0x222   : > { %2952 = vmatpush.bf16.msra.mxu3 %v4812_v24  ;;  %v5382_v24 = vld [vmem:[%s8530_s4 + $0x374] sm:$0xf0] }
 0x223   : > { %3103 = vmatpush.bf16.msrb.mxu2 %v8875_v14  ;;  %v4944_v23 = vor.u32 %v5382_v24, %v4943_v19  ;;  %v5358_v24 = vld [vmem:[%s8530_s4 + $0x2b4] sm:$0xf0]  ;;  %v8971_v14 = vld [vmem:[#allocation28_spill] sm:$0xff] }
 0x224   : > { %3079 = vmatpush.bf16.msrb.mxu0 %v8877_v36  ;;  %v8980_v36 = vld [vmem:[#allocation45_spill] sm:$0xff] }
 0x225   : > { %v2840_v32 = vpop.f32.mrf.mxu2  ;;  %2927 = vmatpush.bf16.msra.mxu1 %v4776_v44  ;;  %v5370_v44 = vld [vmem:[%s8530_s4 + $0x31c] sm:$0xf] }
 0x226   : > { %2953 = vmatpush.bf16.msra.mxu3 %v4780_v56  ;;  %v4913_v56 = vld [vmem:[%s8530_s4 + $0x338] sm:$0xf0]  ;;  %v4912_v32 = vor.u32 %v5374_v45, %v4911_v27  ;;  %v4815_v27 = vld [vmem:[%s8530_s4 + $0x258] sm:$0xf] }
 0x227   : > { %3104 = vmatpush.bf16.msrb.mxu2 %v8879_v47 }
 0x228   : > { %3080 = vmatpush.bf16.msrb.mxu0 %v8881_v16  ;;  %2928 = vmatmul.bf16.vlgmr.msra.gmra.mxu1 %v7919_v38  ;;  %v8975_v16 = vld [vmem:[#allocation37_spill] sm:$0xff] }
 0x229   : > { %2972 = vmatpush.bf16.msrb.mxu1 %v5008_v4  ;;  %2954 = vmatmul.bf16.vlgmr.msra.gmra.mxu3 %v7919_v38  ;;  %v4916_v4 = vor.u32 %v5370_v44, %v4913_v56  ;;  %v5350_v44 = vld [vmem:[%s8530_s4 + $0x274] sm:$0xf0]  ;;  %v5346_v56 = vld [vmem:[%s8530_s4 + $0x25c] sm:$0xf] }
 0x22a   : > { %2998 = vmatpush.bf16.msrb.mxu3 %v5012_v60  ;;  %v4879_v60 = vld [vmem:[%s8530_s4 + $0x2d8] sm:$0xf] }
 0x22b   : > { %3105 = vmatpush.bf16.msrb.mxu2 %v8945_v49  ;;  %v4880_v55 = vor.u32 %v5366_v62, %v4879_v60  ;;  %v4783_v62 = vld [vmem:[%s8530_s4 + $0x218] sm:$0xf]  ;;  %v8969_v49 = vld [vmem:[#allocation24_spill] sm:$0xff] }
 0x22c   : > { %3081 = vmatpush.bf16.msrb.mxu0 %v8885_v22  ;;  %v8972_v22 = vld [vmem:[#allocation29_spill] sm:$0xff] }
 0x22d   : > { %2973 = vmatpush.bf16.msrb.mxu1 %v4976_v59  ;;  %v4884_v59 = vor.u32 %v5362_v37, %v4881_v50  ;;  %v5342_v37 = vld [vmem:[%s8530_s4 + $0x234] sm:$0xf0]  ;;  %v5338_v50 = vld [vmem:[%s8530_s4 + $0x21c] sm:$0xf] }
 0x22e   : > { %2999 = vmatpush.bf16.msrb.mxu3 %v4980_v48  ;;  %v4847_v48 = vld [vmem:[%s8530_s4 + $0x298] sm:$0xf] }
 0x22f   : > { %3106 = vmatpush.bf16.msrb.mxu2 %v8947_v26  ;;  %v8968_v26 = vld [vmem:[#allocation22_spill] sm:$0xff] }
 0x230   : > { %3082 = vmatpush.bf16.msrb.mxu0 %v8946_v6  ;;  %v8067_v58 = vpop.f32.mrf.mxu0  ;;  %v8970_v6 = vld [vmem:[#allocation25_spill] sm:$0xff] }
 0x231   : > { %2974 = vmatpush.bf16.msrb.mxu1 %v4944_v23  ;;  %v4848_v23 = vor.u32 %v5358_v24, %v4847_v48  ;;  %v8950_v24 = vld [vmem:[#allocation2_spill] sm:$0xff] }
 0x232   : > { %3000 = vmatpush.bf16.msrb.mxu3 %v4948_v41  ;;  %v4852_v41 = vor.u32 %v5354_v31, %v4849_v52  ;;  %v8951_v31 = vld [vmem:[#allocation3_spill] sm:$0xff]  ;;  %v8952_v52 = vld [vmem:[#allocation4_spill] sm:$0xff] }
 0x233   : > { %3107 = vmatpush.bf16.msrb.mxu2 %v8948_v12  ;;  %v8967_v12 = vld [vmem:[#allocation21_spill] sm:$0xff] }
 0x235   : > { %2975 = vmatpush.bf16.msrb.mxu1 %v4912_v32  ;;  %v4817_v32 = vld [vmem:[%s8530_s4 + $0x278] sm:$0xf0] }
 0x236   : > { %3001 = vmatpush.bf16.msrb.mxu3 %v4916_v4  ;;  %v4816_v4 = vor.u32 %v5350_v44, %v4815_v27  ;;  %v4820_v60 = vor.u32 %v5346_v56, %v4817_v32  ;;  %v8954_v27 = vld [vmem:[#allocation6_spill] sm:$0xff]  ;;  %v8955_v44 = vld [vmem:[#allocation7_spill] sm:$0xff]  ;;  %v8956_v56 = vld [vmem:[#allocation8_spill] sm:$0xff] }
 0x237   : > { %3108 = vmatpush.bf16.msrb.mxu2 %v8949_v57  ;;  %v8957_v32 = vld [vmem:[#allocation9_spill] sm:$0xff]  ;;  %v8965_v57 = vld [vmem:[#allocation19_spill] sm:$0xff] }
 0x238   : > { %v2866_v19 = vpop.f32.mrf.mxu0 }
 0x239   : > { %2976 = vmatpush.bf16.msrb.mxu1 %v4880_v55  ;;  %v4785_v55 = vld [vmem:[%s8530_s4 + $0x238] sm:$0xf0] }
 0x23a   : > { %3002 = vmatpush.bf16.msrb.mxu3 %v4884_v59  ;;  %v4784_v59 = vor.u32 %v5342_v37, %v4783_v62  ;;  %v4788_v48 = vor.u32 %v5338_v50, %v4785_v55  ;;  %v8959_v62 = vld [vmem:[#allocation11_spill] sm:$0xff]  ;;  %v8960_v37 = vld [vmem:[#allocation12_spill] sm:$0xff]  ;;  %v8961_v50 = vld [vmem:[#allocation13_spill] sm:$0xff] }
 0x23b   : > { %v8962_v55 = vld [vmem:[#allocation14_spill] sm:$0xff] }
 0x23d   : > { %v8105_v45 = vpop.f32.mrf.mxu2  ;;  %2977 = vmatpush.bf16.msrb.mxu1 %v4848_v23  ;;  %v8953_v23 = vld [vmem:[#allocation5_spill] sm:$0xff] }
 0x23e   : > { %3003 = vmatpush.bf16.msrb.mxu3 %v4852_v41 }
 0x241   : > { %2978 = vmatpush.bf16.msrb.mxu1 %v4816_v4 }
 0x242   : > { %3004 = vmatpush.bf16.msrb.mxu3 %v4820_v60  ;;  %v8958_v60 = vld [vmem:[#allocation10_spill] sm:$0xff] }
 0x245   : > { %v2892_v19 = vpop.f32.mrf.mxu2  ;;  %2979 = vmatpush.bf16.msrb.mxu1 %v4784_v59  ;;  %v8963_v59 = vld [vmem:[#allocation15_spill] sm:$0xff] }
 0x246   : > { %3005 = vmatpush.bf16.msrb.mxu3 %v4788_v48  ;;  %v8964_v19 = vld [vmem:[#allocation16_spill] sm:$0xff] }
 0x248   : > { %2980 = vmatmul.bf16.vlgmr.msrb.gmra.mxu1 %v7919_v38 }
 0x249   : > { %3036 = vmatpush.bf16.msra.mxu1 %v8950_v24  ;;  %3006 = vmatmul.bf16.vlgmr.msrb.gmra.mxu3 %v7919_v38 }
 0x24a   : > { %3062 = vmatpush.bf16.msra.mxu3 %v8951_v31 }
 0x24d   : > { %3037 = vmatpush.bf16.msra.mxu1 %v8952_v52 }
 0x24e   : > { %3063 = vmatpush.bf16.msra.mxu3 %v8953_v23 }
 0x250   : > { %v8134_v41 = vpop.f32.mrf.mxu0 }
 0x251   : > { %3038 = vmatpush.bf16.msra.mxu1 %v8954_v27 }
 0x252   : > { %3064 = vmatpush.bf16.msra.mxu3 %v8955_v44 }
 0x255   : > { %3039 = vmatpush.bf16.msra.mxu1 %v8956_v56 }
 0x256   : > { %3065 = vmatpush.bf16.msra.mxu3 %v8957_v32 }
 0x258   : > { %v2918_v4 = vpop.f32.mrf.mxu0 }
 0x259   : > { %3040 = vmatpush.bf16.msra.mxu1 %v8958_v60  ;;  %v8966_v4 = vld [vmem:[#allocation17_spill] sm:$0xff] }
 0x25a   : > { %3066 = vmatpush.bf16.msra.mxu3 %v8959_v62 }
 0x25d   : > { %v8142_v38 = vpop.f32.mrf.mxu2  ;;  %3041 = vmatpush.bf16.msra.mxu1 %v8960_v37 }
 0x25e   : > { %3067 = vmatpush.bf16.msra.mxu3 %v8961_v50 }
 0x261   : > { %3042 = vmatpush.bf16.msra.mxu1 %v8962_v55 }
 0x262   : > { %3068 = vmatpush.bf16.msra.mxu3 %v8963_v59  ;;  %v8977_v59 = vld [vmem:[#allocation35_spill] sm:$0xff] }
 0x265   : > { %v2944_v48 = vpop.f32.mrf.mxu2  ;;  %3043 = vmatpush.bf16.msra.mxu1 %v8964_v19 }
 0x266   : > { %3069 = vmatpush.bf16.msra.mxu3 %v8965_v57  ;;  %v8973_v48 = vld [vmem:[#allocation32_spill] sm:$0xff]  ;;  %v8974_v57 = vld [vmem:[#allocation33_spill] sm:$0xff] }
 0x269   : > { %3088 = vmatpush.bf16.msrb.mxu1 %v8966_v4 }
 0x26a   : > { %3114 = vmatpush.bf16.msrb.mxu3 %v8967_v12 }
 0x26d   : > { %3089 = vmatpush.bf16.msrb.mxu1 %v8968_v26 }
 0x26e   : > { %3115 = vmatpush.bf16.msrb.mxu3 %v8969_v49  ;;  %v8978_v49 = vld [vmem:[#allocation41_spill] sm:$0xff] }
 0x270   : > { %v8154_v47 = vpop.f32.mrf.mxu0 }
 0x271   : > { %3090 = vmatpush.bf16.msrb.mxu1 %v8970_v6  ;;  %v8983_v6 = vld [vmem:[#allocation48_spill] sm:$0xff] }
 0x272   : > { %3116 = vmatpush.bf16.msrb.mxu3 %v8971_v14 }
 0x275   : > { %3091 = vmatpush.bf16.msrb.mxu1 %v8972_v22  ;;  %v8982_v22 = vld [vmem:[#allocation47_spill] sm:$0xff] }
 0x276   : > { %3117 = vmatpush.bf16.msrb.mxu3 %v8973_v48 }
 0x278   : > { %v2970_v25 = vpop.f32.mrf.mxu0 }
 0x279   : > { %3092 = vmatpush.bf16.msrb.mxu1 %v8974_v57  ;;  %v8173_v25 = vld [vmem:[%s8531_s5] sm:$0xff] }
 0x27a   : > { %3118 = vmatpush.bf16.msrb.mxu3 %v8975_v16  ;;  %v2147_v16 = vperm.slane %v8173_v25, 0 }
 0x27c   : > { %v2813_v48 = vadd.f32 %v7962_v35, %v2147_v16  ;;  %v8984_v35 = vld [vmem:[#allocation50_spill] sm:$0xff] }
 0x27d   : > { %v8162_v12 = vpop.f32.mrf.mxu2  ;;  %3093 = vmatpush.bf16.msrb.mxu1 %v8977_v59 }
 0x27e   : > { %8976 = vst [vmem:[#allocation94_spill] sm:$0xff] %v8162_v12  ;;  %3119 = vmatpush.bf16.msrb.mxu3 %v8978_v49  ;;  %v2148_v49 = vperm.slane %v8173_v25, 1  ;;  %v2149_v12 = vperm.slane %v8173_v25, 2 }
 0x281   : > { %3094 = vmatpush.bf16.msrb.mxu1 %v8979_v7 }
 0x282   : > { %3120 = vmatpush.bf16.msrb.mxu3 %v8980_v36 }
 0x285   : > { %v2996_v14 = vpop.f32.mrf.mxu2  ;;  %3095 = vmatpush.bf16.msrb.mxu1 %v8981_v2  ;;  %v2825_v59 = vpop.f32.mrf.mxu1 }
 0x286   : > { %3121 = vmatpush.bf16.msrb.mxu3 %v8982_v22  ;;  %v2826_v7 = vadd.f32 %v2825_v59, %v2813_v48  ;;  %v2839_v14 = vadd.f32 %v7997_v46, %v2148_v49  ;;  %v2865_v49 = vadd.f32 %v8067_v58, %v2149_v12  ;;  %v2150_v59 = vperm.slane %v8173_v25, 3  ;;  %v8990_v12 = vld [vmem:[#allocation62_spill] sm:$0xff]  ;;  %v8991_v58 = vld [vmem:[#allocation52_spill] sm:$0xff] }
 0x288   : > { %v3011_v57 = vmax.f32 %v2826_v7, 0.0  ;;  %v8985_v7 = vld [vmem:[#allocation49_spill] sm:$0xff] }
 0x28a   : > { %v8179_v36 = vpack.c.bf16 %v3011_v57, %v3011_v57 }
 0x28c   : > { %v2851_v2 = vpop.f32.mrf.mxu3  ;;  %3031 = vmatmul.bf16.vlgmr.msra.gmra.mxu0 %v8179_v36 }
 0x28d   : > { %v2852_v22 = vadd.f32 %v2851_v2, %v2839_v14  ;;  %3127 = vmatpush.bf16.msra.mxu0 %v8983_v6  ;;  %v2827_v50 = vpop.f32.mrf.mxu1  ;;  %v8986_v2 = vld [vmem:[#allocation54_spill] sm:$0xff]  ;;  %v2891_v14 = vadd.f32 %v8105_v45, %v2150_v59  ;;  %v8989_v6 = vld [vmem:[#allocation55_spill] sm:$0xff]  ;;  %v8994_v59 = vld [vmem:[#allocation56_spill] sm:$0xff] }
 0x28e   : > { %v8993_v45 = vld [vmem:[#allocation66_spill] sm:$0xff] }
 0x28f   : > { %v3012_v34 = vmax.f32 %v2852_v22, 0.0  ;;  %v8987_v22 = vld [vmem:[#allocation51_spill] sm:$0xff] }
 0x291   : > { %v8184_v16 = vpack.c.bf16 %v3012_v34, %v3012_v34  ;;  %3128 = vmatpush.bf16.msra.mxu0 %v8984_v35  ;;  %v8988_v34 = vld [vmem:[#allocation58_spill] sm:$0xff] }
 0x293   : > { %3044 = vmatmul.bf16.vlgmr.msra.gmra.mxu1 %v8184_v16 }
 0x294   : > { %3140 = vmatpush.bf16.msra.mxu1 %v8985_v7  ;;  %v2853_v46 = vpop.f32.mrf.mxu3 }
 0x295   : > { %3129 = vmatpush.bf16.msra.mxu0 %v8986_v2  ;;  %v2877_v57 = vpop.f32.mrf.mxu1 }
 0x296   : > { %v2878_v50 = vadd.f32 %v2877_v57, %v2865_v49 }
 0x298   : > { %3141 = vmatpush.bf16.msra.mxu1 %v8987_v22  ;;  %v3013_v48 = vmax.f32 %v2878_v50, 0.0  ;;  %v8992_v50 = vld [vmem:[#allocation59_spill] sm:$0xff] }
 0x299   : > { %3130 = vmatpush.bf16.msra.mxu0 %v8988_v34 }
 0x29a   : > { %v8195_v35 = vpack.c.bf16 %v3013_v48, %v3013_v48  ;;  %v8995_v48 = vld [vmem:[#allocation63_spill] sm:$0xff] }
 0x29c   : > { %3142 = vmatpush.bf16.msra.mxu1 %v8989_v6  ;;  %v2903_v46 = vpop.f32.mrf.mxu3  ;;  %3057 = vmatmul.bf16.vlgmr.msra.gmra.mxu2 %v8195_v35  ;;  %v9021_v6 = vld [vmem:[#allocation79_spill] sm:$0xff] }
 0x29d   : > { %v2904_v7 = vadd.f32 %v2903_v46, %v2891_v14  ;;  %3083 = vmatmul.bf16.vlgmr.msrb.gmra.mxu0 %v8179_v36  ;;  %3153 = vmatpush.bf16.msra.mxu2 %v8991_v58  ;;  %v2879_v49 = vpop.f32.mrf.mxu1  ;;  %v8996_v14 = vld [vmem:[#allocation53_spill] sm:$0xff]  ;;  %v8997_v58 = vld [vmem:[#allocation70_spill] sm:$0xff] }
 0x29e   : > { %3131 = vmatpush.bf16.msra.mxu0 %v8990_v12  ;;  %v9003_v12 = vld [vmem:[#allocation76_spill] sm:$0xff] }
 0x29f   : > { %v3014_v57 = vmax.f32 %v2904_v7, 0.0  ;;  %v8998_v7 = vld [vmem:[#allocation60_spill] sm:$0xff] }
 0x2a0   : > { %3143 = vmatpush.bf16.msra.mxu1 %v8992_v50  ;;  %v9002_v50 = vld [vmem:[#allocation64_spill] sm:$0xff] }
 0x2a1   : > { %v8203_v34 = vpack.c.bf16 %v3014_v57, %v3014_v57  ;;  %3154 = vmatpush.bf16.msra.mxu2 %v8994_v59  ;;  %v8999_v57 = vld [vmem:[#allocation67_spill] sm:$0xff]  ;;  %v9001_v59 = vld [vmem:[#allocation74_spill] sm:$0xff] }
 0x2a2   : > { %3132 = vmatpush.bf16.msra.mxu0 %v8993_v45  ;;  %v9000_v45 = vld [vmem:[#allocation57_spill] sm:$0xff] }
 0x2a3   : > { %3070 = vmatmul.bf16.vlgmr.msra.gmra.mxu3 %v8203_v34  ;;  %3096 = vmatmul.bf16.vlgmr.msrb.gmra.mxu1 %v8184_v16 }
 0x2a4   : > { %3144 = vmatpush.bf16.msra.mxu1 %v8995_v48  ;;  %3166 = vmatpush.bf16.msra.mxu3 %v8996_v14  ;;  %v2905_v46 = vpop.f32.mrf.mxu3  ;;  %v9004_v48 = vld [vmem:[#allocation71_spill] sm:$0xff]  ;;  %v9005_v14 = vld [vmem:[#allocation61_spill] sm:$0xff] }
 0x2a5   : > { %3155 = vmatpush.bf16.msra.mxu2 %v8998_v7  ;;  %v8213_v49 = vpop.f32.mrf.mxu1  ;;  %v9006_v7 = vld [vmem:[#allocation68_spill] sm:$0xff] }
 0x2a6   : > { %3133 = vmatpush.bf16.msra.mxu0 %v8997_v58  ;;  %v9013_v58 = vld [vmem:[#allocation69_spill] sm:$0xff] }
 0x2a8   : > { %3145 = vmatpush.bf16.msra.mxu1 %v8999_v57  ;;  %3167 = vmatpush.bf16.msra.mxu3 %v9000_v45  ;;  %v9007_v45 = vld [vmem:[#allocation80_spill] sm:$0xff] }
 0x2a9   : > { %3156 = vmatpush.bf16.msra.mxu2 %v9002_v50  ;;  %v9009_v50 = vld [vmem:[#allocation65_spill] sm:$0xff] }
 0x2aa   : > { %3134 = vmatpush.bf16.msra.mxu0 %v9001_v59  ;;  %v9008_v59 = vld [vmem:[#allocation75_spill] sm:$0xff] }
 0x2ac   : > { %3146 = vmatpush.bf16.msra.mxu1 %v9004_v48  ;;  %3168 = vmatpush.bf16.msra.mxu3 %v9005_v14  ;;  %v8222_v46 = vpop.f32.mrf.mxu3  ;;  %v9011_v48 = vld [vmem:[#allocation72_spill] sm:$0xff]  ;;  %v9012_v14 = vld [vmem:[#allocation86_spill] sm:$0xff] }
 0x2ad   : > { %3109 = vmatmul.bf16.vlgmr.msrb.gmra.mxu2 %v8195_v35  ;;  %3135 = vmatmul.bf16.vlgmr.msra.gmra.mxu0 %v8179_v36  ;;  %v2931_v57 = vpop.f32.mrf.mxu1 }
 0x2ae   : > { %3179 = vmatpush.bf16.msrb.mxu0 %v9003_v12  ;;  %3157 = vmatpush.bf16.msra.mxu2 %v9006_v7  ;;  %v9010_v12 = vld [vmem:[#allocation77_spill] sm:$0xff] }
 0x2af   : > { %v9014_v57 = vld [vmem:[#allocation81_spill] sm:$0xff] }
 0x2b0   : > { %3147 = vmatpush.bf16.msra.mxu1 %v9008_v59  ;;  %3169 = vmatpush.bf16.msra.mxu3 %v9009_v50  ;;  %v9016_v59 = vld [vmem:[#allocation90_spill] sm:$0xff]  ;;  %v9017_v50 = vld [vmem:[#allocation73_spill] sm:$0xff] }
 0x2b2   : > { %3180 = vmatpush.bf16.msrb.mxu0 %v9007_v45  ;;  %3158 = vmatpush.bf16.msra.mxu2 %v9011_v48  ;;  %v9015_v45 = vld [vmem:[#allocation78_spill] sm:$0xff] }
 0x2b3   : > { %3122 = vmatmul.bf16.vlgmr.msrb.gmra.mxu3 %v8203_v34  ;;  %3148 = vmatmul.bf16.vlgmr.msra.gmra.mxu1 %v8184_v16  ;;  %v9019_v48 = vld [vmem:[#allocation82_spill] sm:$0xff] }
 0x2b4   : > { %3192 = vmatpush.bf16.msrb.mxu1 %v9010_v12  ;;  %3170 = vmatpush.bf16.msra.mxu3 %v9013_v58  ;;  %v2957_v7 = vpop.f32.mrf.mxu3  ;;  %v9018_v12 = vld [vmem:[#allocation87_spill] sm:$0xff] }
 0x2b5   : > { %v9022_v7 = vld [vmem:[#allocation88_spill] sm:$0xff] }
 0x2b6   : > { %3181 = vmatpush.bf16.msrb.mxu0 %v9012_v14  ;;  %3159 = vmatpush.bf16.msra.mxu2 %v9015_v45  ;;  %v9020_v14 = vld [vmem:[#allocation84_spill] sm:$0xff] }
 0x2b8   : > { %3193 = vmatpush.bf16.msrb.mxu1 %v9014_v57  ;;  %3171 = vmatpush.bf16.msra.mxu3 %v9017_v50 }
 0x2ba   : > { %3182 = vmatpush.bf16.msrb.mxu0 %v9016_v59  ;;  %3160 = vmatpush.bf16.msra.mxu2 %v9019_v48  ;;  %v9023_v59 = vld [vmem:[#allocation83_spill] sm:$0xff] }
 0x2bc   : > { %3194 = vmatpush.bf16.msrb.mxu1 %v9018_v12  ;;  %3172 = vmatpush.bf16.msra.mxu3 %v9021_v6  ;;  %v9024_v12 = vld [vmem:[#allocation85_spill] sm:$0xff] }
 0x2bd   : > { %3161 = vmatmul.bf16.vlgmr.msra.gmra.mxu2 %v8195_v35 }
 0x2be   : > { %3183 = vmatpush.bf16.msrb.mxu0 %v8938_v11  ;;  %3205 = vmatpush.bf16.msrb.mxu2 %v9020_v14 }
 0x2c0   : > { %3195 = vmatpush.bf16.msrb.mxu1 %v8935_v13  ;;  %3173 = vmatpush.bf16.msra.mxu3 %v9023_v59  ;;  %v9025_v13 = vld [vmem:[#allocation89_spill] sm:$0xff] }
 0x2c1   : > { %v9028_v59 = vld [vmem:[#allocation93_spill] sm:$0xff] }
 0x2c2   : > { %3184 = vmatpush.bf16.msrb.mxu0 %v8942_v61  ;;  %3206 = vmatpush.bf16.msrb.mxu2 %v9022_v7  ;;  %v9026_v7 = vld [vmem:[#allocation96_spill] sm:$0xff] }
 0x2c3   : > { %3174 = vmatmul.bf16.vlgmr.msra.gmra.mxu3 %v8203_v34 }
 0x2c4   : > { %3196 = vmatpush.bf16.msrb.mxu1 %v8939_v9  ;;  %3218 = vmatpush.bf16.msrb.mxu3 %v9024_v12  ;;  %v9027_v12 = vld [vmem:[#allocation103_spill] sm:$0xff] }
 0x2c5   : > { %v8252_v48 = vpop.f32.mrf.mxu1 }
 0x2c6   : > { %3185 = vmatpush.bf16.msrb.mxu0 %v8944_v0  ;;  %3207 = vmatpush.bf16.msrb.mxu2 %v8936_v8  ;;  %v9029_v0 = vld [vmem:[#allocation100_spill] sm:$0xff] }
 0x2c8   : > { %3197 = vmatpush.bf16.msrb.mxu1 %v8943_v21  ;;  %3219 = vmatpush.bf16.msrb.mxu3 %v9025_v13  ;;  %v9030_v13 = vld [vmem:[#allocation107_spill] sm:$0xff] }
 0x2ca   : > { %3186 = vmatpush.bf16.msrb.mxu0 %v7056_v28  ;;  %3208 = vmatpush.bf16.msrb.mxu2 %v9026_v7  ;;  %v9031_v28 = vld [vmem:[#allocation97_spill] sm:$0xff] }
 0x2cc   : > { %v8262_v9 = vpop.f32.mrf.mxu3  ;;  %3198 = vmatpush.bf16.msrb.mxu1 %v9027_v12  ;;  %3220 = vmatpush.bf16.msrb.mxu3 %v9028_v59  ;;  %v9033_v12 = vld [vmem:[#allocation101_spill] sm:$0xff] }
 0x2cd   : > { %3187 = vmatmul.bf16.vlgmr.msrb.gmra.mxu0 %v8179_v36  ;;  %v2983_v8 = vpop.f32.mrf.mxu1  ;;  %v2151_v36 = vperm.slane %v8173_v25, 4 }
 0x2ce   : > { %3238 = vmatpush.bf16.msra.mxu0 %v5921_v5  ;;  %3209 = vmatpush.bf16.msrb.mxu2 %v9029_v0  ;;  %v9032_v5 = vld [vmem:[#allocation104_spill] sm:$0xff] }
 0x2cf   : > { %v9034_v8 = vld [vmem:[#allocation108_spill] sm:$0xff] }
 0x2d0   : > { %3199 = vmatpush.bf16.msrb.mxu1 %v9030_v13  ;;  %3221 = vmatpush.bf16.msrb.mxu3 %v9031_v28 }
 0x2d2   : > { %3239 = vmatpush.bf16.msra.mxu0 %v5952_v18  ;;  %3210 = vmatpush.bf16.msrb.mxu2 %v9032_v5  ;;  %v9035_v18 = vld [vmem:[#allocation105_spill] sm:$0xff] }
 0x2d3   : > { %3200 = vmatmul.bf16.vlgmr.msrb.gmra.mxu1 %v8184_v16  ;;  %v9053_v16 = vld [vmem:[#allocation26_spill] sm:$0xff] }
 0x2d4   : > { %3251 = vmatpush.bf16.msra.mxu1 %v8950_v24  ;;  %v3009_v59 = vpop.f32.mrf.mxu3  ;;  %3222 = vmatpush.bf16.msrb.mxu3 %v9033_v12  ;;  %v2152_v24 = vperm.slane %v8173_v25, 5 }
 0x2d5   : > { %v9056_v59 = vld [vmem:[#allocation42_spill] sm:$0xff] }
 0x2d6   : > { %3240 = vmatpush.bf16.msra.mxu0 %v5989_v30  ;;  %3211 = vmatpush.bf16.msrb.mxu2 %v9034_v8  ;;  %v9036_v30 = vld [vmem:[#allocation109_spill] sm:$0xff] }
 0x2d8   : > { %3252 = vmatpush.bf16.msra.mxu1 %v8952_v52  ;;  %3223 = vmatpush.bf16.msrb.mxu3 %v9035_v18 }
 0x2da   : > { %3241 = vmatpush.bf16.msra.mxu0 %v6028_v43  ;;  %3212 = vmatpush.bf16.msrb.mxu2 %v7089_v63  ;;  %v2917_v43 = vadd.f32 %v8134_v41, %v2151_v36  ;;  %v9041_v41 = vld [vmem:[#allocation25_spill] sm:$0xff]  ;;  %v9060_v36 = vld [vmem:[#allocation28_spill] sm:$0xff] }
 0x2dc   : > { %3253 = vmatpush.bf16.msra.mxu1 %v8954_v27  ;;  %3224 = vmatpush.bf16.msrb.mxu3 %v9036_v30  ;;  %v2930_v52 = vadd.f32 %v8213_v49, %v2917_v43  ;;  %v9037_v27 = vld [vmem:[#allocation110_spill] sm:$0xff]  ;;  %v9058_v49 = vld [vmem:[#allocation48_spill] sm:$0xff] }
 0x2dd   : > { %3213 = vmatmul.bf16.vlgmr.msrb.gmra.mxu2 %v8195_v35  ;;  %v9054_v35 = vld [vmem:[#allocation35_spill] sm:$0xff]  ;;  %v9061_v43 = vld [vmem:[#allocation36_spill] sm:$0xff] }
 0x2de   : > { %3242 = vmatpush.bf16.msra.mxu0 %v6064_v54  ;;  %3264 = vmatpush.bf16.msra.mxu2 %v5949_v17  ;;  %v2943_v17 = vadd.f32 %v8142_v38, %v2152_v24  ;;  %v3015_v54 = vmax.f32 %v2930_v52, 0.0  ;;  %v9047_v38 = vld [vmem:[#allocation34_spill] sm:$0xff]  ;;  %v9063_v52 = vld [vmem:[#allocation43_spill] sm:$0xff] }
 0x2df   : > { %v9062_v24 = vld [vmem:[#allocation50_spill] sm:$0xff] }
 0x2e0   : > { %3254 = vmatpush.bf16.msra.mxu1 %v8956_v56  ;;  %3225 = vmatpush.bf16.msrb.mxu3 %v9037_v27  ;;  %v9042_v56 = vld [vmem:[#allocation18_spill] sm:$0xff] }
 0x2e2   : > { %3243 = vmatpush.bf16.msra.mxu0 %v6103_v3  ;;  %3265 = vmatpush.bf16.msra.mxu2 %v5985_v29  ;;  %v2956_v29 = vadd.f32 %v8222_v46, %v2943_v17  ;;  %v8304_v3 = vpack.c.bf16 %v3015_v54, %v3015_v54  ;;  %v9059_v46 = vld [vmem:[#allocation39_spill] sm:$0xff]  ;;  %v9064_v17 = vld [vmem:[#allocation32_spill] sm:$0xff]  ;;  %v9065_v54 = vld [vmem:[#allocation49_spill] sm:$0xff] }
 0x2e3   : > { %3226 = vmatmul.bf16.vlgmr.msrb.gmra.mxu3 %v8203_v34  ;;  %v9055_v34 = vld [vmem:[#allocation24_spill] sm:$0xff] }
 0x2e4   : > { %3255 = vmatpush.bf16.msra.mxu1 %v8958_v60  ;;  %3277 = vmatpush.bf16.msra.mxu3 %v8951_v31  ;;  %v9046_v60 = vld [vmem:[#allocation29_spill] sm:$0xff] }
 0x2e6   : > { %3244 = vmatpush.bf16.msra.mxu0 %v6139_v20  ;;  %3266 = vmatpush.bf16.msra.mxu2 %v6024_v42  ;;  %v3016_v20 = vmax.f32 %v2956_v29, 0.0  ;;  %v2153_v42 = vperm.slane %v8173_v25, 6 }
 0x2e8   : > { %3256 = vmatpush.bf16.msra.mxu1 %v8960_v37  ;;  %3278 = vmatpush.bf16.msra.mxu3 %v8953_v23  ;;  %v9048_v37 = vld [vmem:[#allocation23_spill] sm:$0xff] }
 0x2ea   : > { %3245 = vmatpush.bf16.msra.mxu0 %v6184_v40  ;;  %3267 = vmatpush.bf16.msra.mxu2 %v6060_v53  ;;  %v8316_v53 = vpack.c.bf16 %v3016_v20, %v3016_v20  ;;  %v2969_v40 = vadd.f32 %v8154_v47, %v2153_v42  ;;  %v9039_v47 = vld [vmem:[#allocation27_spill] sm:$0xff]  ;;  %v9066_v20 = vld [vmem:[#allocation40_spill] sm:$0xff]  ;;  %v9067_v42 = vld [vmem:[#allocation37_spill] sm:$0xff] }
 0x2ec   : > { %3257 = vmatpush.bf16.msra.mxu1 %v8962_v55  ;;  %3279 = vmatpush.bf16.msra.mxu3 %v8955_v44  ;;  %v9050_v55 = vld [vmem:[#allocation33_spill] sm:$0xff] }
 0x2ed   : > { %3246 = vmatmul.bf16.vlgmr.msra.gmra.mxu0 %v8304_v3 }
 0x2ee   : > { %3290 = vmatpush.bf16.msrb.mxu0 %v6203_v51  ;;  %3268 = vmatpush.bf16.msra.mxu2 %v6096_v1  ;;  %v2154_v51 = vperm.slane %v8173_v25, 7  ;;  %v2982_v1 = vadd.f32 %v8252_v48, %v2969_v40  ;;  %v9052_v25 = vld [vmem:[#allocation38_spill] sm:$0xff]  ;;  %v9068_v40 = vld [vmem:[#allocation44_spill] sm:$0xff] }
 0x2ef   : > { %v9057_v48 = vld [vmem:[#allocation30_spill] sm:$0xff] }
 0x2f0   : > { %3258 = vmatpush.bf16.msra.mxu1 %v8964_v19  ;;  %3280 = vmatpush.bf16.msra.mxu3 %v8957_v32  ;;  %v3017_v23 = vmax.f32 %v2982_v1, 0.0  ;;  %v9043_v32 = vld [vmem:[#allocation31_spill] sm:$0xff]  ;;  %v9070_v1 = vld [vmem:[#allocation41_spill] sm:$0xff] }
 0x2f2   : > { %3291 = vmatpush.bf16.msrb.mxu0 %v6242_v10  ;;  %3269 = vmatpush.bf16.msra.mxu2 %v6132_v15  ;;  %v9038_v10 = vld [vmem:[#allocation94_spill] sm:$0xff]  ;;  %v9040_v15 = vld [vmem:[#allocation13_spill] sm:$0xff] }
 0x2f3   : > { %3259 = vmatmul.bf16.vlgmr.msra.gmra.mxu1 %v8316_v53  ;;  %v2995_v31 = vadd.f32 %v9038_v10, %v2154_v51  ;;  %v9069_v51 = vld [vmem:[#allocation58_spill] sm:$0xff] }
 0x2f4   : > { %3303 = vmatpush.bf16.msrb.mxu1 %v8966_v4  ;;  %3281 = vmatpush.bf16.msra.mxu3 %v8959_v62  ;;  %v9051_v4 = vld [vmem:[#allocation21_spill] sm:$0xff] }
 0x2f5   : > { %v3008_v44 = vadd.f32 %v8262_v9, %v2995_v31  ;;  %v9049_v9 = vld [vmem:[#allocation19_spill] sm:$0xff] }
 0x2f6   : > { %3292 = vmatpush.bf16.msrb.mxu0 %v6280_v33  ;;  %3270 = vmatpush.bf16.msra.mxu2 %v6180_v39  ;;  %v8334_v33 = vpack.c.bf16 %v3017_v23, %v3017_v23  ;;  %v9045_v39 = vld [vmem:[#allocation15_spill] sm:$0xff] }
 0x2f7   : > { %v3018_v62 = vmax.f32 %v3008_v44, 0.0  ;;  %v9071_v31 = vld [vmem:[#allocation55_spill] sm:$0xff]  ;;  %v9075_v44 = vld [vmem:[#allocation45_spill] sm:$0xff] }
 0x2f8   : > { %3304 = vmatpush.bf16.msrb.mxu1 %v8968_v26  ;;  %3282 = vmatpush.bf16.msra.mxu3 %v9040_v15  ;;  %v9044_v26 = vld [vmem:[#allocation20_spill] sm:$0xff]  ;;  %v9072_v15 = vld [vmem:[#allocation46_spill] sm:$0xff] }
 0x2f9   : > { %v8345_v19 = vpack.c.bf16 %v3018_v62, %v3018_v62  ;;  %v9081_v62 = vld [vmem:[#allocation53_spill] sm:$0xff] }
 0x2fa   : > { %3293 = vmatpush.bf16.msrb.mxu0 %v9039_v47  ;;  %3271 = vmatpush.bf16.msra.mxu2 %v9042_v56  ;;  %v9077_v56 = vld [vmem:[#allocation66_spill] sm:$0xff] }
 0x2fc   : > { %3305 = vmatpush.bf16.msrb.mxu1 %v9041_v41  ;;  %3283 = vmatpush.bf16.msra.mxu3 %v9045_v39  ;;  %v9073_v41 = vld [vmem:[#allocation62_spill] sm:$0xff]  ;;  %v9079_v39 = vld [vmem:[#allocation47_spill] sm:$0xff] }
 0x2fd   : > { %3272 = vmatmul.bf16.vlgmr.msra.gmra.mxu2 %v8334_v33 }
 0x2fe   : > { %3294 = vmatpush.bf16.msrb.mxu0 %v9043_v32  ;;  %3316 = vmatpush.bf16.msrb.mxu2 %v9044_v26  ;;  %v9078_v32 = vld [vmem:[#allocation56_spill] sm:$0xff] }
 0x300   : > { %3306 = vmatpush.bf16.msrb.mxu1 %v9046_v60  ;;  %3284 = vmatpush.bf16.msra.mxu3 %v9049_v9  ;;  %v9080_v60 = vld [vmem:[#allocation63_spill] sm:$0xff]  ;;  %v9083_v9 = vld [vmem:[#allocation60_spill] sm:$0xff] }
 0x302   : > { %3295 = vmatpush.bf16.msrb.mxu0 %v9047_v38  ;;  %3317 = vmatpush.bf16.msrb.mxu2 %v9048_v37  ;;  %v9082_v37 = vld [vmem:[#allocation70_spill] sm:$0xff] }
 0x303   : > { %3285 = vmatmul.bf16.vlgmr.msra.gmra.mxu3 %v8345_v19 }
 0x304   : > { %3307 = vmatpush.bf16.msrb.mxu1 %v9050_v55  ;;  %3329 = vmatpush.bf16.msrb.mxu3 %v9051_v4  ;;  %v9084_v55 = vld [vmem:[#allocation67_spill] sm:$0xff]  ;;  %v9085_v4 = vld [vmem:[#allocation57_spill] sm:$0xff] }
 0x306   : > { %3296 = vmatpush.bf16.msrb.mxu0 %v9052_v25  ;;  %3318 = vmatpush.bf16.msrb.mxu2 %v9053_v16  ;;  %v9086_v25 = vld [vmem:[#allocation74_spill] sm:$0xff] }
 0x308   : > { %3308 = vmatpush.bf16.msrb.mxu1 %v9054_v35  ;;  %3330 = vmatpush.bf16.msrb.mxu3 %v9055_v34  ;;  %v9087_v34 = vld [vmem:[#allocation64_spill] sm:$0xff] }
 0x309   : > { %v3032_v29 = vpop.f32.mrf.mxu0 }
 0x30a   : > { %3297 = vmatpush.bf16.msrb.mxu0 %v9056_v59  ;;  %3319 = vmatpush.bf16.msrb.mxu2 %v9057_v48  ;;  %v9088_v59 = vld [vmem:[#allocation76_spill] sm:$0xff] }
 0x30c   : > { %3309 = vmatpush.bf16.msrb.mxu1 %v9059_v46  ;;  %3331 = vmatpush.bf16.msrb.mxu3 %v9060_v36  ;;  %v9090_v46 = vld [vmem:[#allocation61_spill] sm:$0xff] }
 0x30d   : > { %3298 = vmatmul.bf16.vlgmr.msrb.gmra.mxu0 %v8304_v3 }
 0x30e   : > { %3342 = vmatpush.bf16.msra.mxu0 %v9058_v49  ;;  %3320 = vmatpush.bf16.msrb.mxu2 %v9061_v43  ;;  %v9089_v49 = vld [vmem:[#allocation71_spill] sm:$0xff]  ;;  %v9091_v43 = vld [vmem:[#allocation68_spill] sm:$0xff] }
 0x310   : > { %3310 = vmatpush.bf16.msrb.mxu1 %v9063_v52  ;;  %3332 = vmatpush.bf16.msrb.mxu3 %v9064_v17  ;;  %v3045_v10 = vpop.f32.mrf.mxu1  ;;  %v9093_v52 = vld [vmem:[#allocation75_spill] sm:$0xff]  ;;  %v9094_v17 = vld [vmem:[#allocation65_spill] sm:$0xff] }
 0x311   : > { %v3046_v23 = vadd.f32 %v3045_v10, %v3032_v29  ;;  %v3034_v47 = vpop.f32.mrf.mxu0  ;;  %v9095_v29 = vld [vmem:[#allocation77_spill] sm:$0xff]  ;;  %v9098_v10 = vld [vmem:[#allocation90_spill] sm:$0xff] }
 0x312   : > { %3343 = vmatpush.bf16.msra.mxu0 %v9062_v24  ;;  %3321 = vmatpush.bf16.msrb.mxu2 %v9066_v20  ;;  %v9092_v24 = vld [vmem:[#allocation80_spill] sm:$0xff] }
 0x313   : > { %3311 = vmatmul.bf16.vlgmr.msrb.gmra.mxu1 %v8316_v53 }
 0x314   : > { %3355 = vmatpush.bf16.msra.mxu1 %v9065_v54  ;;  %3333 = vmatpush.bf16.msrb.mxu3 %v9067_v42 }
 0x316   : > { %3344 = vmatpush.bf16.msra.mxu0 %v8986_v2  ;;  %3322 = vmatpush.bf16.msrb.mxu2 %v9068_v40  ;;  %v9074_v2 = vld [vmem:[#allocation52_spill] sm:$0xff] }
 0x317   : > { %v9096_v40 = vld [vmem:[#allocation72_spill] sm:$0xff] }
 0x318   : > { %3356 = vmatpush.bf16.msra.mxu1 %v8987_v22  ;;  %3334 = vmatpush.bf16.msrb.mxu3 %v9070_v1  ;;  %v9076_v22 = vld [vmem:[#allocation59_spill] sm:$0xff]  ;;  %v3047_v26 = vpop.f32.mrf.mxu1 }
 0x31a   : > { %3345 = vmatpush.bf16.msra.mxu0 %v9069_v51  ;;  %3323 = vmatpush.bf16.msrb.mxu2 %v9072_v15  ;;  %v3084_v38 = vpop.f32.mrf.mxu0  ;;  %v9097_v51 = vld [vmem:[#allocation86_spill] sm:$0xff] }
 0x31b   : > { %v9100_v15 = vld [vmem:[#allocation82_spill] sm:$0xff] }
 0x31c   : > { %3357 = vmatpush.bf16.msra.mxu1 %v9071_v31  ;;  %3335 = vmatpush.bf16.msrb.mxu3 %v9075_v44 }
 0x31d   : > { %3324 = vmatmul.bf16.vlgmr.msrb.gmra.mxu2 %v8334_v33 }
 0x31e   : > { %3346 = vmatpush.bf16.msra.mxu0 %v9073_v41  ;;  %3368 = vmatpush.bf16.msra.mxu2 %v9074_v2  ;;  %v9102_v2 = vld [vmem:[#allocation88_spill] sm:$0xff] }
 0x31f   : > { %v3058_v16 = vpop.f32.mrf.mxu2 }
 0x320   : > { %3358 = vmatpush.bf16.msra.mxu1 %v9076_v22  ;;  %3336 = vmatpush.bf16.msrb.mxu3 %v9079_v39  ;;  %v3097_v35 = vpop.f32.mrf.mxu1  ;;  %v3059_v48 = vadd.f32 %v3058_v16, %v3046_v23  ;;  %v9099_v23 = vld [vmem:[#allocation87_spill] sm:$0xff] }
 0x322   : > { %3347 = vmatpush.bf16.msra.mxu0 %v9077_v56  ;;  %3369 = vmatpush.bf16.msra.mxu2 %v9078_v32  ;;  %v3086_v36 = vpop.f32.mrf.mxu0  ;;  %v9103_v56 = vld [vmem:[#allocation83_spill] sm:$0xff]  ;;  %v9105_v32 = vld [vmem:[#allocation85_spill] sm:$0xff] }
 0x323   : > { %3337 = vmatmul.bf16.vlgmr.msrb.gmra.mxu3 %v8345_v19 }
 0x324   : > { %3359 = vmatpush.bf16.msra.mxu1 %v9080_v60  ;;  %3381 = vmatpush.bf16.msra.mxu3 %v9081_v62  ;;  %v9107_v60 = vld [vmem:[#allocation92_spill] sm:$0xff]  ;;  %v9108_v62 = vld [vmem:[#allocation89_spill] sm:$0xff] }
 0x326   : > { %3348 = vmatpush.bf16.msra.mxu0 %v9082_v37  ;;  %3370 = vmatpush.bf16.msra.mxu2 %v9083_v9  ;;  %v3071_v54 = vpop.f32.mrf.mxu3  ;;  %v9109_v37 = vld [vmem:[#allocation106_spill] sm:$0xff] }
 0x327   : > { %v3060_v20 = vpop.f32.mrf.mxu2  ;;  %v8421_v22 = vadd.f32 %v3071_v54, %v3059_v48 }
 0x328   : > { %3360 = vmatpush.bf16.msra.mxu1 %v9084_v55  ;;  %3382 = vmatpush.bf16.msra.mxu3 %v9085_v4  ;;  %v3099_v42 = vpop.f32.mrf.mxu1  ;;  %v9110_v55 = vld [vmem:[#allocation103_spill] sm:$0xff]  ;;  %v9111_v4 = vld [vmem:[#allocation93_spill] sm:$0xff] }
 0x32a   : > { %3349 = vmatpush.bf16.msra.mxu0 %v9086_v25  ;;  %3371 = vmatpush.bf16.msra.mxu2 %v9087_v34  ;;  %v8404_v1 = vpop.f32.mrf.mxu0 }
 0x32c   : > { %3361 = vmatpush.bf16.msra.mxu1 %v9089_v49  ;;  %3383 = vmatpush.bf16.msra.mxu3 %v9090_v46 }
 0x32d   : > { %3350 = vmatmul.bf16.vlgmr.msra.gmra.mxu0 %v8304_v3 }
 0x32e   : > { %3394 = vmatpush.bf16.msrb.mxu0 %v9088_v59  ;;  %3372 = vmatpush.bf16.msra.mxu2 %v9091_v43  ;;  %v3073_v31 = vpop.f32.mrf.mxu3 }
 0x330   : > { %3362 = vmatpush.bf16.msra.mxu1 %v9093_v52  ;;  %3384 = vmatpush.bf16.msra.mxu3 %v9094_v17  ;;  %v3110_v47 = vpop.f32.mrf.mxu2  ;;  %v8412_v41 = vpop.f32.mrf.mxu1 }
 0x332   : > { %3395 = vmatpush.bf16.msrb.mxu0 %v9092_v24  ;;  %3373 = vmatpush.bf16.msra.mxu2 %v9096_v40 }
 0x333   : > { %3363 = vmatmul.bf16.vlgmr.msra.gmra.mxu1 %v8316_v53 }
 0x334   : > { %3407 = vmatpush.bf16.msrb.mxu1 %v9095_v29  ;;  %3385 = vmatpush.bf16.msra.mxu3 %v9013_v58  ;;  %v3138_v58 = vpop.f32.mrf.mxu0 }
 0x336   : > { %3396 = vmatpush.bf16.msrb.mxu0 %v9097_v51  ;;  %3374 = vmatpush.bf16.msra.mxu2 %v9015_v45  ;;  %v9101_v45 = vld [vmem:[#allocation91_spill] sm:$0xff]  ;;  %v3123_v44 = vpop.f32.mrf.mxu3 }
 0x338   : > { %3408 = vmatpush.bf16.msrb.mxu1 %v9014_v57  ;;  %3386 = vmatpush.bf16.msra.mxu3 %v9017_v50  ;;  %v3098_v57 = vadd.f32 %v3097_v35, %v3084_v38  ;;  %v3151_v39 = vpop.f32.mrf.mxu1  ;;  %v5406_v38 = vld [vmem:[%s8532_s6 + $0x38] sm:$0xff] }
 0x33a   : > { %3397 = vmatpush.bf16.msrb.mxu0 %v9098_v10  ;;  %3375 = vmatpush.bf16.msra.mxu2 %v9100_v15  ;;  %v3111_v50 = vadd.f32 %v3110_v47, %v3098_v57 }
 0x33c   : > { %3409 = vmatpush.bf16.msrb.mxu1 %v9099_v23  ;;  %3387 = vmatpush.bf16.msra.mxu3 %v9021_v6  ;;  %v3112_v6 = vpop.f32.mrf.mxu2 }
 0x33d   : > { %3376 = vmatmul.bf16.vlgmr.msra.gmra.mxu2 %v8334_v33  ;;  %v5413_v6 = vld [vmem:[%s8532_s6 + $0x70] sm:$0xff] }
 0x33e   : > { %3398 = vmatpush.bf16.msrb.mxu0 %v8938_v11  ;;  %3420 = vmatpush.bf16.msrb.mxu2 %v9020_v14  ;;  %v9104_v11 = vld [vmem:[#allocation95_spill] sm:$0xff]  ;;  %v8425_v14 = vadd.f32 %v3123_v44, %v3111_v50  ;;  %v3125_v9 = vpop.f32.mrf.mxu3 }
 0x340   : > { %3410 = vmatpush.bf16.msrb.mxu1 %v9101_v45  ;;  %3388 = vmatpush.bf16.msra.mxu3 %v9103_v56  ;;  %v3231_v26 = vmax.f32 %v8421_v22, %v8425_v14  ;;  %v5414_v14 = vld [vmem:[%s8532_s6 + $0x78] sm:$0xff] }
 0x342   : > { %3399 = vmatpush.bf16.msrb.mxu0 %v8942_v61  ;;  %3421 = vmatpush.bf16.msrb.mxu2 %v9102_v2  ;;  %v9106_v61 = vld [vmem:[#allocation102_spill] sm:$0xff] }
 0x343   : > { %3389 = vmatmul.bf16.vlgmr.msra.gmra.mxu3 %v8345_v19 }
 0x344   : > { %3411 = vmatpush.bf16.msrb.mxu1 %v9104_v11  ;;  %3433 = vmatpush.bf16.msrb.mxu3 %v9105_v32  ;;  %v3162_v25 = vpop.f32.mrf.mxu2 }
 0x346   : > { %3400 = vmatpush.bf16.msrb.mxu0 %v9106_v61  ;;  %3422 = vmatpush.bf16.msrb.mxu2 %v9107_v60  ;;  %v3175_v16 = vpop.f32.mrf.mxu3  ;;  %v5412_v61 = vld [vmem:[%s8532_s6 + $0x68] sm:$0xff]  ;;  %v5411_v60 = vld [vmem:[%s8532_s6 + $0x60] sm:$0xff] }
 0x348   : > { %3412 = vmatpush.bf16.msrb.mxu1 %v8943_v21  ;;  %3434 = vmatpush.bf16.msrb.mxu3 %v9108_v62  ;;  %v5405_v21 = vld [vmem:[%s8532_s6 + $0x30] sm:$0xff] }
 0x34a   : > { %3401 = vmatpush.bf16.msrb.mxu0 %v9109_v37  ;;  %3423 = vmatpush.bf16.msrb.mxu2 %v9026_v7  ;;  %v5404_v7 = vld [vmem:[%s8532_s6 + $0x28] sm:$0xff]  ;;  %v3188_v35 = vpop.f32.mrf.mxu0  ;;  %v5409_v37 = vld [vmem:[%s8532_s6 + $0x50] sm:$0xff] }
 0x34c   : > { %3413 = vmatpush.bf16.msrb.mxu1 %v9110_v55  ;;  %3435 = vmatpush.bf16.msrb.mxu3 %v9111_v4  ;;  %v5408_v55 = vld [vmem:[%s8532_s6 + $0x48] sm:$0xff] }
 0x34d   : > { %3402 = vmatmul.bf16.vlgmr.msrb.gmra.mxu0 %v8304_v3  ;;  %v3164_v3 = vpop.f32.mrf.mxu2 }
 0x34e   : > { %3583 = vmatpush.bf16.msra.mxu0 %v5406_v38  ;;  %3424 = vmatpush.bf16.msrb.mxu2 %v9029_v0  ;;  %v5410_v38 = vld [vmem:[%s8532_s6 + $0x58] sm:$0xff] }
 0x350   : > { %3414 = vmatpush.bf16.msrb.mxu1 %v9030_v13  ;;  %3436 = vmatpush.bf16.msrb.mxu3 %v9031_v28  ;;  %v5403_v13 = vld [vmem:[%s8532_s6 + $0x20] sm:$0xff]  ;;  %v5402_v28 = vld [vmem:[%s8532_s6 + $0x18] sm:$0xff]  ;;  %v3201_v0 = vpop.f32.mrf.mxu1 }
 0x351   : > { %v3202_v34 = vadd.f32 %v3201_v0, %v3188_v35 }
 0x352   : > { %3584 = vmatpush.bf16.msra.mxu0 %v5405_v21  ;;  %3425 = vmatpush.bf16.msrb.mxu2 %v9032_v5  ;;  %v3177_v5 = vpop.f32.mrf.mxu3 }
 0x353   : > { %3415 = vmatmul.bf16.vlgmr.msrb.gmra.mxu1 %v8316_v53  ;;  %v5401_v53 = vld [vmem:[%s8532_s6 + $0x10] sm:$0xff] }
 0x354   : > { %3437 = vmatpush.bf16.msrb.mxu3 %v9033_v12  ;;  %v3190_v12 = vpop.f32.mrf.mxu0  ;;  %3596 = vmatpush.bf16.msra.mxu1 %v5414_v14 }
 0x356   : > { %3585 = vmatpush.bf16.msra.mxu0 %v5404_v7  ;;  %3426 = vmatpush.bf16.msrb.mxu2 %v9034_v8  ;;  %v5400_v8 = vld [vmem:[%s8532_s6 + $0x8] sm:$0xff]  ;;  %v5407_v7 = vld [vmem:[%s8532_s6 + $0x40] sm:$0xff] }
 0x358   : > { %3438 = vmatpush.bf16.msrb.mxu3 %v9035_v18  ;;  %v3203_v18 = vpop.f32.mrf.mxu1  ;;  %3597 = vmatpush.bf16.msra.mxu1 %v5413_v6 }
 0x35a   : > { %3586 = vmatpush.bf16.msra.mxu0 %v5403_v13  ;;  %3427 = vmatpush.bf16.msrb.mxu2 %v7089_v63  ;;  %v5399_v63 = vld [vmem:[%s8532_s6] sm:$0xff] }
 0x35c   : > { %3439 = vmatpush.bf16.msrb.mxu3 %v9036_v30  ;;  %3598 = vmatpush.bf16.msra.mxu1 %v5412_v61 }
 0x35d   : > { %3428 = vmatmul.bf16.vlgmr.msrb.gmra.mxu2 %v8334_v33  ;;  %v3150_v33 = vadd.f32 %v8412_v41, %v8404_v1 }
 0x35e   : > { %3587 = vmatpush.bf16.msra.mxu0 %v5402_v28 }
 0x360   : > { %3440 = vmatpush.bf16.msrb.mxu3 %v9037_v27  ;;  %v3214_v30 = vpop.f32.mrf.mxu2  ;;  %v3163_v27 = vadd.f32 %v3162_v25, %v3150_v33  ;;  %3599 = vmatpush.bf16.msra.mxu1 %v5411_v60 }
 0x361   : > { %v3215_v59 = vadd.f32 %v3214_v30, %v3202_v34 }
 0x362   : > { %3588 = vmatpush.bf16.msra.mxu0 %v5401_v53  ;;  %v3176_v49 = vadd.f32 %v3175_v16, %v3163_v27 }
 0x363   : > { %3441 = vmatmul.bf16.vlgmr.msrb.gmra.mxu3 %v8345_v19 }
 0x364   : > { %3600 = vmatpush.bf16.msra.mxu1 %v5410_v38 }
 0x366   : > { %3589 = vmatpush.bf16.msra.mxu0 %v5400_v8  ;;  %v3227_v48 = vpop.f32.mrf.mxu3 }
 0x367   : > { %v3228_v46 = vadd.f32 %v3227_v48, %v3215_v59 }
 0x368   : > { %v3216_v43 = vpop.f32.mrf.mxu2  ;;  %3601 = vmatpush.bf16.msra.mxu1 %v5409_v37 }
 0x369   : > { %v3232_v24 = vmax.f32 %v3176_v49, %v3228_v46  ;;  %v5426_v46 = vld [vmem:[%s8533_s7] ss:$0 sm:$0xff] }
 0x36a   : > { %3590 = vmatpush.bf16.msra.mxu0 %v5399_v63  ;;  %v3247_v36 = vpop.f32.mrf.mxu0 }
 0x36b   : > { %v3233_v19 = vmax.f32 %v3231_v26, %v3232_v24 }
 0x36c   : > { %3602 = vmatpush.bf16.msra.mxu1 %v5408_v55 }
 0x36d   : > { %v3449_v52 = vpack.c.bf16 %v3233_v19, %v3233_v19 }
 0x36e   : > { %v3229_v29 = vpop.f32.mrf.mxu3 }
 0x36f   : > { %3591 = vmatmul.bf16.vlgmr.msra.gmra.mxu0 %v3449_v52 }
 0x370   : > { %v3260_v17 = vpop.f32.mrf.mxu1  ;;  %3603 = vmatpush.bf16.msra.mxu1 %v5407_v7 }
 0x371   : > { %v3261_v54 = vadd.f32 %v3260_v17, %v3247_v36 }
 0x372   : > { %v3249_v20 = vpop.f32.mrf.mxu0 }
 0x378   : > { %v3262_v42 = vpop.f32.mrf.mxu1 }
 0x380   : > { %v3273_v40 = vpop.f32.mrf.mxu2 }
 0x381   : > { %v3274_v51 = vadd.f32 %v3273_v40, %v3261_v54 }
 0x386   : > { %v3286_v1 = vpop.f32.mrf.mxu3 }
 0x387   : > { %v3287_v10 = vadd.f32 %v3286_v1, %v3274_v51 }
 0x388   : > { %v3275_v23 = vpop.f32.mrf.mxu2 }
 0x38a   : > { %v3299_v31 = vpop.f32.mrf.mxu0 }
 0x38e   : > { %v3288_v41 = vpop.f32.mrf.mxu3 }
 0x390   : > { %v3312_v47 = vpop.f32.mrf.mxu1 }
 0x391   : > { %v3313_v15 = vadd.f32 %v3312_v47, %v3299_v31 }
 0x392   : > { %v3301_v58 = vpop.f32.mrf.mxu0 }
 0x398   : > { %v3314_v57 = vpop.f32.mrf.mxu1 }
 0x3a0   : > { %v3325_v45 = vpop.f32.mrf.mxu2 }
 0x3a1   : > { %v3326_v50 = vadd.f32 %v3325_v45, %v3313_v15 }
 0x3a6   : > { %v3338_v2 = vpop.f32.mrf.mxu3 }
 0x3a7   : > { %v3339_v44 = vadd.f32 %v3338_v2, %v3326_v50 }
 0x3a8   : > { %v3327_v56 = vpop.f32.mrf.mxu2 }
 0x3a9   : > { %v3446_v11 = vmax.f32 %v3287_v10, %v3339_v44 }
 0x3aa   : > { %v3351_v22 = vpop.f32.mrf.mxu0 }
 0x3ae   : > { %v3340_v26 = vpop.f32.mrf.mxu3 }
 0x3b0   : > { %v3364_v32 = vpop.f32.mrf.mxu1 }
 0x3b1   : > { %v3365_v0 = vadd.f32 %v3364_v32, %v3351_v22 }
 0x3b2   : > { %v3353_v39 = vpop.f32.mrf.mxu0 }
 0x3b8   : > { %v3366_v62 = vpop.f32.mrf.mxu1 }
 0x3c0   : > { %v3377_v9 = vpop.f32.mrf.mxu2 }
 0x3c1   : > { %v3378_v12 = vadd.f32 %v3377_v9, %v3365_v0 }
 0x3c6   : > { %v3390_v4 = vpop.f32.mrf.mxu3 }
 0x3c7   : > { %v3391_v18 = vadd.f32 %v3390_v4, %v3378_v12 }
 0x3c8   : > { %v3379_v21 = vpop.f32.mrf.mxu2 }
 0x3ca   : > { %v3403_v25 = vpop.f32.mrf.mxu0 }
 0x3ce   : > { %v3392_v35 = vpop.f32.mrf.mxu3 }
 0x3d0   : > { %v3416_v16 = vpop.f32.mrf.mxu1 }
 0x3d1   : > { %v3417_v5 = vadd.f32 %v3416_v16, %v3403_v25 }
 0x3d2   : > { %v3405_v3 = vpop.f32.mrf.mxu0 }
 0x3d8   : > { %v3418_v13 = vpop.f32.mrf.mxu1 }
 0x3e0   : > { %v3429_v28 = vpop.f32.mrf.mxu2 }
 0x3e1   : > { %v3430_v53 = vadd.f32 %v3429_v28, %v3417_v5 }
 0x3e6   : > { %v3442_v8 = vpop.f32.mrf.mxu3 }
 0x3e7   : > { %v3443_v63 = vadd.f32 %v3442_v8, %v3430_v53 }
 0x3e8   : > { %v3431_v33 = vpop.f32.mrf.mxu2 }
 0x3e9   : > { %v3447_v30 = vmax.f32 %v3391_v18, %v3443_v63 }
 0x3eb   : > { %v3448_v34 = vmax.f32 %v3446_v11, %v3447_v30 }
 0x3ec   : > { %v3592_v48 = vpop.f32.mrf.mxu0 }
 0x3ed   : > { %v3450_v27 = vpack.c.bf16 %v3448_v34, %v3448_v34  ;;  %v3593_v36 = vadd.f32 %v5426_v46, %v3592_v48 }
 0x3ee   : > { %v3444_v59 = vpop.f32.mrf.mxu3 }
 0x3ef   : > { %3604 = vmatmul.bf16.vlgmr.msra.gmra.mxu1 %v3450_v27 }
 0x3f4   : > { %v3594_v49 = vpop.f32.mrf.mxu0 }
 0x46c   : > { %v3605_v43 = vpop.f32.mrf.mxu1 }
 0x46d   : > { %v3606_v24 = vadd.f32 %v3605_v43, %v3593_v36 }
 0x46f   : > { %v3657_v19 = vsel %vm3656_vm0, %v3606_v24, -inf  ;;  %v3623_v52 = vsel %vm3622_vm1, %v3606_v24, -inf  ;;  %v3640_v54 = vsel %vm3639_vm2, %v3606_v24, -inf  ;;  %v3610_v29 = vsel %vm3609_vm3, %v3606_v24, -inf }
 0x470   : > { %3658 = vmax.xlane.f32.xlu1 %v3657_v19  ;;  %3624 = vmax.xlane.f32.xlu0 %v3623_v52 }
 0x474   : > { %v3607_v17 = vpop.f32.mrf.mxu1 }
 0x478   : > { %3641 = vmax.xlane.f32.xlu0 %v3640_v54  ;;  %3611 = vmax.xlane.f32.xlu1 %v3610_v29 }
 0x4e3   : > { %v3659_v20 = vpop.xlane.xlu1 %3658  ;;  %v3625_v42 = vpop.xlane.xlu0 %3624 }
 0x4e4   : > { %v3660_v40 = vsub.f32 %v3606_v24, %v3659_v20  ;;  %v3626_v51 = vsub.f32 %v3606_v24, %v3625_v42 }
 0x4e6   : > { %v3661_v1 = vmul.f32 1.442695, %v3660_v40  ;;  %v3627_v10 = vmul.f32 1.442695, %v3626_v51 }
 0x4e8   : > { %5427 = vpow2.f32 %v3661_v1 }
 0x4e9   : > { %5429 = vpow2.f32 %v3627_v10 }
 0x4eb   : > { %v3642_v31 = vpop.xlane.xlu0 %3641  ;;  %v3612_v23 = vpop.xlane.xlu1 %3611 }
 0x4ec   : > { %v3643_v47 = vsub.f32 %v3606_v24, %v3642_v31  ;;  %v3613_v15 = vsub.f32 %v3606_v24, %v3612_v23 }
 0x4ee   : > { %v5428_v41 = vpop.eup %5427  ;;  %v3644_v58 = vmul.f32 1.442695, %v3643_v47  ;;  %v3614_v57 = vmul.f32 1.442695, %v3613_v15 }
 0x4ef   : > { %v5430_v45 = vpop.eup %5429  ;;  %3664 = vrot.lane.b32.xlu0 %v5428_v41, %s5451_s11 }
 0x4f0   : > { %5431 = vpow2.f32 %v3644_v58  ;;  %3630 = vrot.lane.b32.xlu2 %v5430_v45, %s5452_s12 }
 0x4f1   : > { %5433 = vpow2.f32 %v3614_v57 }
 0x4f6   : > { %v5432_v50 = vpop.eup %5431 }
 0x4f7   : > { %v5434_v2 = vpop.eup %5433 }
 0x4f8   : > { %3647 = vrot.lane.b32.xlu2 %v5432_v50, %s5453_s14  ;;  %v3616_v44 = vsel %vm3609_vm3, %v5434_v2, 0.0 }
 0x4f9   : > { %3617 = vadd.xlane.f32.xlu1 %v3616_v44 }
 0x54a   : > { %v3631_v22 = vpop.permute.xlu2 %3630 }
 0x54b   : > { %v3633_v56 = vsel %vm3609_vm3, %v3631_v22, 0.0 }
 0x54c   : > { %3634 = vadd.xlane.f32.xlu2 %v3633_v56 }
 0x552   : > { %v3648_v11 = vpop.permute.xlu2 %3647 }
 0x553   : > { %v3650_v14 = vsel %vm3609_vm3, %v3648_v11, 0.0 }
 0x554   : > { %3651 = vadd.xlane.f32.xlu1 %v3650_v14 }
 0x561   : > { %v3665_v32 = vpop.permute.xlu0 %3664 }
 0x562   : > { %v3667_v6 = vsel %vm3609_vm3, %v3665_v32, 0.0 }
 0x563   : > { %3668 = vadd.xlane.f32.xlu1 %v3667_v6 }
 0x56c   : > { %v3618_v26 = vpop.xlane.xlu1 %3617 }
 0x56d   : > { %5435 = vrcp.f32 %v3618_v26 }
 0x573   : > { %v5436_v39 = vpop.eup %5435 }
 0x574   : > { %v3620_v61 = vmul.f32 %v5436_v39, %v5434_v2 }
 0x576   : > { %3621 = vst.msk [vmem:[%s300_s17] sm:$0xff] %vm3609_vm3, %v3620_v61 }
 0x5bf   : > { %v3635_v60 = vpop.xlane.xlu2 %3634 }
 0x5c0   : > { %5437 = vrcp.f32 %v3635_v60 }
 0x5c6   : > { %v5438_v62 = vpop.eup %5437 }
 0x5c7   : > { %v3637_v38 = vmul.f32 %v5438_v62, %v5430_v45  ;;  %v3652_v37 = vpop.xlane.xlu1 %3651 }
 0x5c8   : > { %5439 = vrcp.f32 %v3652_v37 }
 0x5c9   : > { %3638 = vst.msk [vmem:[%s300_s17] sm:$0xff] %vm3622_vm1, %v3637_v38 }
 0x5ce   : > { %v5440_v9 = vpop.eup %5439 }
 0x5cf   : > { %v3654_v55 = vmul.f32 %v5440_v9, %v5432_v50 }
 0x5d1   : > { %3655 = vst.msk [vmem:[%s300_s17] sm:$0xff] %vm3639_vm2, %v3654_v55 }
 0x5d6   : > { %v3669_v4 = vpop.xlane.xlu1 %3668 }
 0x5d7   : > { %5441 = vrcp.f32 %v3669_v4 }
 0x5dd   : > { %v5442_v25 = vpop.eup %5441 }
 0x5de   : > { %v3671_v21 = vmul.f32 %v5442_v25, %v5428_v41 }
 0x5e0   : > { %3672 = vst.msk [vmem:[%s300_s17] sm:$0xff] %vm3656_vm0, %v3671_v21 }
 0x5e1 PF: > { %s18_s27 = sadd.s32 1, %s5449_s27  }
 0x5e2   : > { %p15_p4 = scmp.ge.s32.totalorder %s18_s27, 4  }
 0x5e4   :  { %17 = sbr.rel (!%p15_p4) target bundleno = 1 (0x1), region = 82 }

</bundles_post_ra>
